<compile_context>
chip_gen: v7x
topology: tpu7x:2x2x1
jax: 0.10.0
libtpu: 0.0.40
codegen_flags: <defaults>
</compile_context>

<pallas_src>
import functools
import math

import jax
import jax.numpy as jnp
from jax import lax
from jax.experimental import pallas as pl
from jax.experimental.pallas import tpu as pltpu

LN_EPS = 1e-5   # PyTorch nn.LayerNorm default


# ----------------------------------------------------------------------------- helpers
def _layernorm_f32(y, gamma, beta):
    mean = jnp.mean(y, axis=-1, keepdims=True)
    c = y - mean
    var = jnp.mean(c * c, axis=-1, keepdims=True)
    return c * lax.rsqrt(var + LN_EPS) * gamma + beta


def _attention_outproj(q, k, v, out_w_ref, acc0, *, num_heads, scale, return_weights):
    """Multi-head softmax attention fused with the output projection.

    q: (T, E) f32, k/v: (S, E) f32, out_w_ref: (E, E) bf16 VMEM ref.
    Returns (acc0 + concat_h(softmax(q_h k_h^T * scale) v_h) @ W_out,
             head-averaged attention weights (T, S) or None).
    The head concat is never materialized: each head's (T, hd) output is
    contracted against the matching W_out row-block and accumulated in f32.
    """
    T, E = q.shape
    S = k.shape[0]
    hd = E // num_heads
    acc = acc0
    w_sum = jnp.zeros((T, S), jnp.float32) if return_weights else None
    for h in range(num_heads):
        lo, hi = h * hd, (h + 1) * hd
        qh = q[:, lo:hi].astype(jnp.bfloat16)
        kh = k[:, lo:hi].astype(jnp.bfloat16)
        vh = v[:, lo:hi].astype(jnp.bfloat16)
        s = jnp.dot(qh, kh.T, preferred_element_type=jnp.float32) * scale
        m = jnp.max(s, axis=-1, keepdims=True)
        p = jnp.exp(s - m)
        inv = pl.reciprocal(jnp.sum(p, axis=-1, keepdims=True), approx=True)
        pn = p * inv                                            # (T, S) f32
        oh = jnp.dot(pn.astype(jnp.bfloat16), vh,
                     preferred_element_type=jnp.float32)        # (T, hd)
        acc = acc + jnp.dot(oh.astype(jnp.bfloat16), out_w_ref[lo:hi, :],
                            preferred_element_type=jnp.float32)
        if return_weights:
            w_sum = w_sum + pn
    return acc, w_sum


# ----------------------------------------------------------------------------- kernels
def _branch_kernel(tok_ref, pat_ref,
                   qw_ref, qb_ref, kvw_ref, kvb_ref,
                   ow_ref, ob_ref, g1_ref, be1_ref,
                   w1_ref, b1_ref, w2_ref, b2_ref,
                   att_ref, wgt_ref, *, num_heads, scale):
    """One (modality, batch) element: cross-attn -> add&LN -> FFN, all in VMEM."""
    E = qw_ref.shape[0]
    tok = tok_ref[...]                                          # (T, E) f32
    pat = pat_ref[...]                                          # (S, E) f32

    q = jnp.dot(tok.astype(jnp.bfloat16), qw_ref[...],
                preferred_element_type=jnp.float32) + qb_ref[...]       # (T, E)
    kv = jnp.dot(pat.astype(jnp.bfloat16), kvw_ref[...],
                 preferred_element_type=jnp.float32) + kvb_ref[...]     # (S, 2E)

    acc0 = ob_ref[...] + tok                                    # out-proj bias + residual
    y, w_sum = _attention_outproj(q, kv[:, :E], kv[:, E:], ow_ref, acc0,
                                  num_heads=num_heads, scale=scale,
                                  return_weights=True)
    wgt_ref[...] = (w_sum * (1.0 / num_heads)).astype(wgt_ref.dtype)

    y = _layernorm_f32(y, g1_ref[...], be1_ref[...])

    h1 = jnp.dot(y.astype(jnp.bfloat16), w1_ref[...],
                 preferred_element_type=jnp.float32) + b1_ref[...]
    h1 = jnp.maximum(h1, 0.0).astype(jnp.bfloat16)
    y2 = jnp.dot(h1, w2_ref[...], preferred_element_type=jnp.float32) + b2_ref[...]
    att_ref[...] = y2.astype(att_ref.dtype)


def _tail_kernel(va_ref, ca_ref,
                 w1a_ref, w1b_ref, b1_ref, w2_ref, b2_ref, gf_ref, bf_ref,
                 qkvw_ref, qkvb_ref, ow_ref, ob_ref, gs_ref, bs_ref,
                 out_ref, *, num_heads, scale):
    """One batch element: fusion-FFN + LN -> self-attn -> add&LN (concat never built)."""
    E = ow_ref.shape[0]
    xa = va_ref[...].astype(jnp.bfloat16)                       # (T, E)
    xb = ca_ref[...].astype(jnp.bfloat16)

    h1 = (jnp.dot(xa, w1a_ref[...], preferred_element_type=jnp.float32)
          + jnp.dot(xb, w1b_ref[...], preferred_element_type=jnp.float32)
          + b1_ref[...])
    h1 = jnp.maximum(h1, 0.0).astype(jnp.bfloat16)
    fused = jnp.dot(h1, w2_ref[...], preferred_element_type=jnp.float32) + b2_ref[...]
    expert = _layernorm_f32(fused, gf_ref[...], bf_ref[...])    # (T, E) f32

    qkv = jnp.dot(expert.astype(jnp.bfloat16), qkvw_ref[...],   # packed N = 3E
                  preferred_element_type=jnp.float32) + qkvb_ref[...]

    acc0 = ob_ref[...] + expert                                 # out-proj bias + residual
    refined, _ = _attention_outproj(qkv[:, :E], qkv[:, E:2 * E], qkv[:, 2 * E:],
                                    ow_ref, acc0,
                                    num_heads=num_heads, scale=scale,
                                    return_weights=False)
    out_ref[...] = _layernorm_f32(refined, gs_ref[...], bs_ref[...]).astype(out_ref.dtype)


# ----------------------------------------------------------------------------- wrappers
def fused_branch(tokens, patches, p, *, num_heads):
    """tokens: (2, B, T, E) f32, patches: (2, B, S, E) f32, p: stacked per-modality params.
    Returns attended (2, B, T, E) f32 and head-averaged weights (2, B, T, S) f32."""
    nm, B, T, E = tokens.shape
    S = patches.shape[2]
    hd = E // num_heads
    scale = 1.0 / math.sqrt(hd)

    def per_modality(arr):
        nzeros = arr.ndim - 1

        def idx(m, b):
            return (m,) + (0,) * nzeros

        return pl.BlockSpec((None,) + arr.shape[1:], idx)

    def data4(m, b):
        return (m, b, 0, 0)

    in_specs = [
        pl.BlockSpec((None, None, T, E), data4),
        pl.BlockSpec((None, None, S, E), data4),
        per_modality(p["q_w"]), per_modality(p["q_b"]),
        per_modality(p["kv_w"]), per_modality(p["kv_b"]),
        per_modality(p["out_w"]), per_modality(p["out_b"]),
        per_modality(p["ln_g"]), per_modality(p["ln_b"]),
        per_modality(p["w1"]), per_modality(p["b1"]),
        per_modality(p["w2"]), per_modality(p["b2"]),
    ]
    out_specs = [
        pl.BlockSpec((None, None, T, E), data4),
        pl.BlockSpec((None, None, T, S), data4),
    ]
    flops = 2 * nm * B * (T * E * E + S * E * 2 * E + 2 * num_heads * T * S * hd
                          + T * E * E + 2 * T * E * 4 * E)
    cost = pl.CostEstimate(flops=flops,
                           transcendentals=nm * B * num_heads * T * S,
                           bytes_accessed=4 * nm * B * (2 * T * E + S * E + T * S)
                           + 2 * nm * (12 * E * E))

    attended, weights = pl.pallas_call(
        functools.partial(_branch_kernel, num_heads=num_heads, scale=scale),
        out_shape=(jax.ShapeDtypeStruct((nm, B, T, E), jnp.float32),
                   jax.ShapeDtypeStruct((nm, B, T, S), jnp.float32)),
        grid_spec=pl.GridSpec(grid=(nm, B), in_specs=in_specs, out_specs=out_specs),
        compiler_params=pltpu.CompilerParams(
            dimension_semantics=("parallel", "parallel")),   # shards over v7x's 2 TCs
        cost_estimate=cost,
    )(tokens, patches,
      p["q_w"], p["q_b"], p["kv_w"], p["kv_b"],
      p["out_w"], p["out_b"], p["ln_g"], p["ln_b"],
      p["w1"], p["b1"], p["w2"], p["b2"])
    return attended, weights


def fused_tail(vit_att, cnn_att, t, *, num_heads):
    """vit_att/cnn_att: (B, T, E) f32. Returns refined expert tokens (B, T, E) f32."""
    B, T, E = vit_att.shape
    hd = E // num_heads
    scale = 1.0 / math.sqrt(hd)

    def full_spec(arr):
        nd = arr.ndim

        def idx(b):
            return (0,) * nd

        return pl.BlockSpec(arr.shape, idx)

    data = pl.BlockSpec((None, T, E), lambda b: (b, 0, 0))
    in_specs = [data, data,
                full_spec(t["w1a"]), full_spec(t["w1b"]), full_spec(t["b1"]),
                full_spec(t["w2"]), full_spec(t["b2"]),
                full_spec(t["g_f"]), full_spec(t["b_f"]),
                full_spec(t["qkv_w"]), full_spec(t["qkv_b"]),
                full_spec(t["out_w"]), full_spec(t["out_b"]),
                full_spec(t["g_s"]), full_spec(t["b_s"])]
    flops = 2 * B * (2 * T * E * 4 * E + T * 4 * E * E + T * E * 3 * E
                     + 2 * num_heads * T * T * hd + T * E * E)
    cost = pl.CostEstimate(flops=flops,
                           transcendentals=B * num_heads * T * T,
                           bytes_accessed=4 * B * 3 * T * E + 2 * 17 * E * E)

    return pl.pallas_call(
        functools.partial(_tail_kernel, num_heads=num_heads, scale=scale),
        out_shape=jax.ShapeDtypeStruct((B, T, E), jnp.float32),
        grid_spec=pl.GridSpec(grid=(B,), in_specs=in_specs, out_specs=data),
        compiler_params=pltpu.CompilerParams(dimension_semantics=("parallel",)),
        cost_estimate=cost,
    )(vit_att, cnn_att,
      t["w1a"], t["w1b"], t["b1"], t["w2"], t["b2"], t["g_f"], t["b_f"],
      t["qkv_w"], t["qkv_b"], t["out_w"], t["out_b"], t["g_s"], t["b_s"])


# ----------------------------------------------------------------------------- module
class ExpertTokenCrossAttentionPallas:
    """Inference-mode JAX/Pallas port of ExpertTokenCrossAttention.forward."""

    def __init__(self, embed_dim, num_heads, num_abnormalities=14, dropout=0.1,
                 key=jax.random.PRNGKey(0)):
        assert embed_dim % num_heads == 0
        self.embed_dim = embed_dim
        self.num_heads = num_heads
        self.num_abnormalities = num_abnormalities
        E = embed_dim
        keys = iter(jax.random.split(key, 64))

        def linear(fan_in, fan_out):
            w = jax.random.normal(next(keys), (fan_in, fan_out), jnp.float32) * fan_in ** -0.5
            b = jax.random.normal(next(keys), (fan_out,), jnp.float32) * 0.01
            # matmul weights stored in bf16 (MXU operand dtype); biases stay f32.
            return w.astype(jnp.bfloat16), b.reshape(1, fan_out)

        def branch_params():
            q_w, q_b = linear(E, E)
            kv_w, kv_b = linear(E, 2 * E)        # key/value share the patch input
            out_w, out_b = linear(E, E)
            w1, b1 = linear(E, 4 * E)
            w2, b2 = linear(4 * E, E)
            return dict(q_w=q_w, q_b=q_b, kv_w=kv_w, kv_b=kv_b,
                        out_w=out_w, out_b=out_b,
                        ln_g=jnp.ones((1, E), jnp.float32),
                        ln_b=jnp.zeros((1, E), jnp.float32),
                        w1=w1, b1=b1, w2=w2, b2=b2)

        vit = branch_params()
        cnn = branch_params()
        # Stack vit (index 0) / cnn (index 1) so one fused kernel with grid
        # (modality, batch) handles both branches.
        self.branch = {k: jnp.stack([vit[k], cnn[k]]) for k in vit}

        # fusion_ffn consumes concat([vit, cnn]); W1 stored split in halves so
        # the concat is never materialized (two matmuls fused in one kernel).
        w1a, b1 = linear(E, 4 * E)
        w1b, _ = linear(E, 4 * E)
        w2, b2 = linear(4 * E, E)
        qkv_w, qkv_b = linear(E, 3 * E)          # packed QKV in-projection
        out_w, out_b = linear(E, E)
        self.tail = dict(w1a=w1a, w1b=w1b, b1=b1, w2=w2, b2=b2,
                         g_f=jnp.ones((1, E), jnp.float32),
                         b_f=jnp.zeros((1, E), jnp.float32),
                         qkv_w=qkv_w, qkv_b=qkv_b, out_w=out_w, out_b=out_b,
                         g_s=jnp.ones((1, E), jnp.float32),
                         b_s=jnp.zeros((1, E), jnp.float32))

    def __call__(self, cnn_expert_tokens, vit_expert_tokens, cnn_patches, vit_patches):
        tokens = jnp.stack([vit_expert_tokens, cnn_expert_tokens])    # (2, B, T, E)
        patches = jnp.stack([vit_patches, cnn_patches])               # (2, B, S, E)
        attended, weights = fused_branch(tokens, patches, self.branch,
                                         num_heads=self.num_heads)
        vit_attended, cnn_attended = attended[0], attended[1]
        vit_w, cnn_w = weights[0], weights[1]
        expert = fused_tail(vit_attended, cnn_attended, self.tail,
                            num_heads=self.num_heads)
        return expert, vit_attended, cnn_attended, vit_w, cnn_w


# ----------------------------------------------------------------------------- reference
def _reference_forward(m, cnn_expert, vit_expert, cnn_patches, vit_patches):
    """Pure-JAX f32 reference (same parameters) for correctness checking."""
    E, H = m.embed_dim, m.num_heads
    hd = E // H
    f32 = lambda a: a.astype(jnp.float32)

    def ln(x, g, b):
        mu = jnp.mean(x, -1, keepdims=True)
        var = jnp.mean((x - mu) ** 2, -1, keepdims=True)
        return (x - mu) / jnp.sqrt(var + LN_EPS) * g.reshape(-1) + b.reshape(-1)

    def heads(x, B, L):
        return x.reshape(B, L, H, hd).transpose(0, 2, 1, 3)

    def attn_core(q, k, v):
        s = jnp.einsum("bhtd,bhsd->bhts", q, k) / math.sqrt(hd)
        w = jax.nn.softmax(s, axis=-1)
        o = jnp.einsum("bhts,bhsd->bhtd", w, v)
        B, _, T, _ = q.shape
        return o.transpose(0, 2, 1, 3).reshape(B, T, E), jnp.mean(w, axis=1)

    p = m.branch

    def branch(mi, tokens, patches):
        B, T, _ = tokens.shape
        S = patches.shape[1]
        q = tokens @ f32(p["q_w"][mi]) + p["q_b"][mi]
        kv = patches @ f32(p["kv_w"][mi]) + p["kv_b"][mi]
        k, v = kv[..., :E], kv[..., E:]
        o, w = attn_core(heads(q, B, T), heads(k, B, S), heads(v, B, S))
        y = ln(o @ f32(p["out_w"][mi]) + p["out_b"][mi] + tokens,
               p["ln_g"][mi], p["ln_b"][mi])
        h1 = jnp.maximum(y @ f32(p["w1"][mi]) + p["b1"][mi], 0.0)
        return h1 @ f32(p["w2"][mi]) + p["b2"][mi], w

    vit_att, vit_w = branch(0, vit_expert, vit_patches)
    cnn_att, cnn_w = branch(1, cnn_expert, cnn_patches)

    t = m.tail
    fused_in = jnp.concatenate([vit_att, cnn_att], axis=-1)
    w1 = jnp.concatenate([f32(t["w1a"]), f32(t["w1b"])], axis=0)
    h1 = jnp.maximum(fused_in @ w1 + t["b1"], 0.0)
    fused = h1 @ f32(t["w2"]) + t["b2"]
    expert = ln(fused, t["g_f"], t["b_f"])

    B, T, _ = expert.shape
    qkv = expert @ f32(t["qkv_w"]) + t["qkv_b"]
    q, k, v = qkv[..., :E], qkv[..., E:2 * E], qkv[..., 2 * E:]
    refined, _ = attn_core(heads(q, B, T), heads(k, B, T), heads(v, B, T))
    refined = refined @ f32(t["out_w"]) + t["out_b"]
    expert_out = ln(refined + expert, t["g_s"], t["b_s"])
    return expert_out, vit_att, cnn_att, vit_w, cnn_w


# ----------------------------------------------------------------------------- demo
if __name__ == "__main__":
    key = jax.random.PRNGKey(0)
    k_ce, k_ve, k_cp, k_vp, k_param = jax.random.split(key, 5)

    # batch=2, expert tokens = num_abnormalities = 14, patch seq = 64, embed=128, heads=4
    B, T, S, E, H = 2, 14, 64, 128, 4
    cnn_expert = jax.random.normal(k_ce, (B, T, E), jnp.float32)
    vit_expert = jax.random.normal(k_ve, (B, T, E), jnp.float32)
    cnn_patches = jax.random.normal(k_cp, (B, S, E), jnp.float32)
    vit_patches = jax.random.normal(k_vp, (B, S, E), jnp.float32)

    module = ExpertTokenCrossAttentionPallas(E, H, num_abnormalities=T, key=k_param)
    fwd = jax.jit(module.__call__)     # both fused calls dispatched under one jit

    outs = jax.block_until_ready(fwd(cnn_expert, vit_expert, cnn_patches, vit_patches))
    expert_tokens, vit_attended, cnn_attended, vit_w, cnn_w = outs

    assert expert_tokens.shape == (B, T, E)
    assert vit_attended.shape == (B, T, E)
    assert cnn_attended.shape == (B, T, E)
    assert vit_w.shape == (B, T, S)
    assert cnn_w.shape == (B, T, S)

    refs = _reference_forward(module, cnn_expert, vit_expert, cnn_patches, vit_patches)
    # bf16 MXU operands (f32 accumulation) + approx reciprocal vs f32 reference
    # -> relaxed tolerance.
    for got, ref in zip(outs, refs):
        err = float(jnp.max(jnp.abs(got - ref)))
        assert jnp.allclose(got, ref, atol=5e-2, rtol=5e-2), err

    print("KERNEL_OK")
</pallas_src>

<mosaic_0001>
module attributes {stable_mosaic.version = 11 : i64} {
  func.func @_branch_kernel(%arg0: i32, %arg1: i32, %arg2: memref<1x1x14x128xf32, #tpu.memory_space<vmem>>, %arg3: memref<1x1x64x128xf32, #tpu.memory_space<vmem>>, %arg4: memref<1x128x128xbf16, #tpu.memory_space<vmem>>, %arg5: memref<1x1x128xf32, #tpu.memory_space<vmem>>, %arg6: memref<1x128x256xbf16, #tpu.memory_space<vmem>>, %arg7: memref<1x1x256xf32, #tpu.memory_space<vmem>>, %arg8: memref<1x128x128xbf16, #tpu.memory_space<vmem>>, %arg9: memref<1x1x128xf32, #tpu.memory_space<vmem>>, %arg10: memref<1x1x128xf32, #tpu.memory_space<vmem>>, %arg11: memref<1x1x128xf32, #tpu.memory_space<vmem>>, %arg12: memref<1x128x512xbf16, #tpu.memory_space<vmem>>, %arg13: memref<1x1x512xf32, #tpu.memory_space<vmem>>, %arg14: memref<1x512x128xbf16, #tpu.memory_space<vmem>>, %arg15: memref<1x1x128xf32, #tpu.memory_space<vmem>>, %arg16: memref<1x1x14x128xf32, #tpu.memory_space<vmem>>, %arg17: memref<1x1x14x64xf32, #tpu.memory_space<vmem>>) attributes {dimension_semantics = [#tpu.dimension_semantics<parallel>, #tpu.dimension_semantics<parallel>], iteration_bounds = array<i64: 2, 2>, scalar_prefetch = 0 : i64, scratch_operands = 0 : i64, tpu.core_type = #tpu.core_type<tc>, window_params = [{transform_indices = @transform_0, window_bounds = array<i64: 1, 1, 14, 128>}, {transform_indices = @transform_1, window_bounds = array<i64: 1, 1, 64, 128>}, {transform_indices = @transform_2, window_bounds = array<i64: 1, 128, 128>}, {transform_indices = @transform_3, window_bounds = array<i64: 1, 1, 128>}, {transform_indices = @transform_4, window_bounds = array<i64: 1, 128, 256>}, {transform_indices = @transform_5, window_bounds = array<i64: 1, 1, 256>}, {transform_indices = @transform_6, window_bounds = array<i64: 1, 128, 128>}, {transform_indices = @transform_7, window_bounds = array<i64: 1, 1, 128>}, {transform_indices = @transform_8, window_bounds = array<i64: 1, 1, 128>}, {transform_indices = @transform_9, window_bounds = array<i64: 1, 1, 128>}, {transform_indices = @transform_10, window_bounds = array<i64: 1, 128, 512>}, {transform_indices = @transform_11, window_bounds = array<i64: 1, 1, 512>}, {transform_indices = @transform_12, window_bounds = array<i64: 1, 512, 128>}, {transform_indices = @transform_13, window_bounds = array<i64: 1, 1, 128>}, {transform_indices = @transform_14, window_bounds = array<i64: 1, 1, 14, 128>}, {transform_indices = @transform_15, window_bounds = array<i64: 1, 1, 14, 64>}]} {
    %c0 = arith.constant 0 : index
    %c0_0 = arith.constant 0 : index
    %c0_1 = arith.constant 0 : index
    %c0_2 = arith.constant 0 : index
    %0 = vector.load %arg2[%c0, %c0_0, %c0_1, %c0_2] : memref<1x1x14x128xf32, #tpu.memory_space<vmem>>, vector<1x1x14x128xf32>
    %1 = vector.shape_cast %0 : vector<1x1x14x128xf32> to vector<14x128xf32>
    %c0_3 = arith.constant 0 : index
    %c0_4 = arith.constant 0 : index
    %c0_5 = arith.constant 0 : index
    %c0_6 = arith.constant 0 : index
    %2 = vector.load %arg3[%c0_3, %c0_4, %c0_5, %c0_6] : memref<1x1x64x128xf32, #tpu.memory_space<vmem>>, vector<1x1x64x128xf32>
    %3 = vector.shape_cast %2 : vector<1x1x64x128xf32> to vector<64x128xf32>
    %4 = arith.truncf %1 : vector<14x128xf32> to vector<14x128xbf16>
    %c0_7 = arith.constant 0 : index
    %c0_8 = arith.constant 0 : index
    %c0_9 = arith.constant 0 : index
    %5 = vector.load %arg4[%c0_7, %c0_8, %c0_9] : memref<1x128x128xbf16, #tpu.memory_space<vmem>>, vector<1x128x128xbf16>
    %6 = vector.shape_cast %5 : vector<1x128x128xbf16> to vector<128x128xbf16>
    %cst = arith.constant dense<0.000000e+00> : vector<14x128xf32>
    %7 = tpu.matmul %4, %6, %cst {dimension_numbers = #tpu.dot_dimension_numbers<[1], [0], [0], [1], [0, 0, 1, 1], [], []>} : vector<14x128xbf16>, vector<128x128xbf16>, vector<14x128xf32> -> vector<14x128xf32>
    %c0_10 = arith.constant 0 : index
    %c0_11 = arith.constant 0 : index
    %c0_12 = arith.constant 0 : index
    %8 = vector.load %arg5[%c0_10, %c0_11, %c0_12] : memref<1x1x128xf32, #tpu.memory_space<vmem>>, vector<1x1x128xf32>
    %9 = vector.shape_cast %8 : vector<1x1x128xf32> to vector<1x128xf32>
    %10 = vector.broadcast %9 : vector<1x128xf32> to vector<14x128xf32>
    %11 = arith.addf %7, %10 : vector<14x128xf32>
    %12 = arith.truncf %3 : vector<64x128xf32> to vector<64x128xbf16>
    %c0_13 = arith.constant 0 : index
    %c0_14 = arith.constant 0 : index
    %c0_15 = arith.constant 0 : index
    %13 = vector.load %arg6[%c0_13, %c0_14, %c0_15] : memref<1x128x256xbf16, #tpu.memory_space<vmem>>, vector<1x128x256xbf16>
    %14 = vector.shape_cast %13 : vector<1x128x256xbf16> to vector<128x256xbf16>
    %cst_16 = arith.constant dense<0.000000e+00> : vector<64x256xf32>
    %15 = tpu.matmul %12, %14, %cst_16 {dimension_numbers = #tpu.dot_dimension_numbers<[1], [0], [0], [1], [0, 0, 1, 1], [], []>} : vector<64x128xbf16>, vector<128x256xbf16>, vector<64x256xf32> -> vector<64x256xf32>
    %c0_17 = arith.constant 0 : index
    %c0_18 = arith.constant 0 : index
    %c0_19 = arith.constant 0 : index
    %16 = vector.load %arg7[%c0_17, %c0_18, %c0_19] : memref<1x1x256xf32, #tpu.memory_space<vmem>>, vector<1x1x256xf32>
    %17 = vector.shape_cast %16 : vector<1x1x256xf32> to vector<1x256xf32>
    %18 = vector.broadcast %17 : vector<1x256xf32> to vector<64x256xf32>
    %19 = arith.addf %15, %18 : vector<64x256xf32>
    %c0_20 = arith.constant 0 : index
    %c0_21 = arith.constant 0 : index
    %c0_22 = arith.constant 0 : index
    %20 = vector.load %arg9[%c0_20, %c0_21, %c0_22] : memref<1x1x128xf32, #tpu.memory_space<vmem>>, vector<1x1x128xf32>
    %21 = vector.shape_cast %20 : vector<1x1x128xf32> to vector<1x128xf32>
    %22 = vector.broadcast %21 : vector<1x128xf32> to vector<14x128xf32>
    %23 = arith.addf %22, %1 : vector<14x128xf32>
    %24 = vector.extract_strided_slice %19 {offsets = [0, 0], sizes = [64, 128], strides = [1, 1]} : vector<64x256xf32> to vector<64x128xf32>
    %25 = vector.extract_strided_slice %19 {offsets = [0, 128], sizes = [64, 128], strides = [1, 1]} : vector<64x256xf32> to vector<64x128xf32>
    %cst_23 = arith.constant 0.000000e+00 : f32
    %26 = vector.broadcast %cst_23 : f32 to vector<14x64xf32>
    %27 = vector.extract_strided_slice %11 {offsets = [0, 0], sizes = [14, 32], strides = [1, 1]} : vector<14x128xf32> to vector<14x32xf32>
    %28 = arith.truncf %27 : vector<14x32xf32> to vector<14x32xbf16>
    %29 = vector.extract_strided_slice %24 {offsets = [0, 0], sizes = [64, 32], strides = [1, 1]} : vector<64x128xf32> to vector<64x32xf32>
    %30 = arith.truncf %29 : vector<64x32xf32> to vector<64x32xbf16>
    %31 = vector.extract_strided_slice %25 {offsets = [0, 0], sizes = [64, 32], strides = [1, 1]} : vector<64x128xf32> to vector<64x32xf32>
    %32 = arith.truncf %31 : vector<64x32xf32> to vector<64x32xbf16>
    %33 = tpu.transpose %30, [1, 0] : vector<64x32xbf16> -> vector<32x64xbf16>
    %cst_24 = arith.constant dense<0.000000e+00> : vector<14x64xf32>
    %34 = tpu.matmul %28, %33, %cst_24 {dimension_numbers = #tpu.dot_dimension_numbers<[1], [0], [0], [1], [0, 0, 1, 1], [], []>} : vector<14x32xbf16>, vector<32x64xbf16>, vector<14x64xf32> -> vector<14x64xf32>
    %cst_25 = arith.constant 0.176776692 : f32
    %35 = vector.broadcast %cst_25 : f32 to vector<14x64xf32>
    %36 = arith.mulf %34, %35 : vector<14x64xf32>
    %cst_26 = arith.constant dense<0xFF800000> : vector<14xf32>
    %37 = vector.multi_reduction <maximumf>, %36, %cst_26 [1] : vector<14x64xf32> to vector<14xf32>
    %38 = vector.shape_cast %37 : vector<14xf32> to vector<14x1xf32>
    %39 = vector.broadcast %38 : vector<14x1xf32> to vector<14x64xf32>
    %40 = arith.subf %36, %39 : vector<14x64xf32>
    %41 = math.exp %40 : vector<14x64xf32>
    %cst_27 = arith.constant dense<0.000000e+00> : vector<14xf32>
    %42 = vector.multi_reduction <add>, %41, %cst_27 [1] : vector<14x64xf32> to vector<14xf32>
    %43 = vector.shape_cast %42 : vector<14xf32> to vector<14x1xf32>
    %44 = tpu.reciprocal %43 {approx = true} : vector<14x1xf32> -> vector<14x1xf32>
    %45 = vector.broadcast %44 : vector<14x1xf32> to vector<14x64xf32>
    %46 = arith.mulf %41, %45 : vector<14x64xf32>
    %47 = arith.truncf %46 : vector<14x64xf32> to vector<14x64xbf16>
    %cst_28 = arith.constant dense<0.000000e+00> : vector<14x32xf32>
    %48 = tpu.matmul %47, %32, %cst_28 {dimension_numbers = #tpu.dot_dimension_numbers<[1], [0], [0], [1], [0, 0, 1, 1], [], []>} : vector<14x64xbf16>, vector<64x32xbf16>, vector<14x32xf32> -> vector<14x32xf32>
    %49 = arith.truncf %48 : vector<14x32xf32> to vector<14x32xbf16>
    %c0_29 = arith.constant 0 : index
    %c0_30 = arith.constant 0 : index
    %c0_31 = arith.constant 0 : index
    %50 = vector.load %arg8[%c0_29, %c0_30, %c0_31] : memref<1x128x128xbf16, #tpu.memory_space<vmem>>, vector<1x32x128xbf16>
    %51 = vector.shape_cast %50 : vector<1x32x128xbf16> to vector<32x128xbf16>
    %cst_32 = arith.constant dense<0.000000e+00> : vector<14x128xf32>
    %52 = tpu.matmul %49, %51, %cst_32 {dimension_numbers = #tpu.dot_dimension_numbers<[1], [0], [0], [1], [0, 0, 1, 1], [], []>} : vector<14x32xbf16>, vector<32x128xbf16>, vector<14x128xf32> -> vector<14x128xf32>
    %53 = arith.addf %23, %52 : vector<14x128xf32>
    %54 = arith.addf %26, %46 : vector<14x64xf32>
    %55 = vector.extract_strided_slice %11 {offsets = [0, 32], sizes = [14, 32], strides = [1, 1]} : vector<14x128xf32> to vector<14x32xf32>
    %56 = arith.truncf %55 : vector<14x32xf32> to vector<14x32xbf16>
    %57 = vector.extract_strided_slice %24 {offsets = [0, 32], sizes = [64, 32], strides = [1, 1]} : vector<64x128xf32> to vector<64x32xf32>
    %58 = arith.truncf %57 : vector<64x32xf32> to vector<64x32xbf16>
    %59 = vector.extract_strided_slice %25 {offsets = [0, 32], sizes = [64, 32], strides = [1, 1]} : vector<64x128xf32> to vector<64x32xf32>
    %60 = arith.truncf %59 : vector<64x32xf32> to vector<64x32xbf16>
    %61 = tpu.transpose %58, [1, 0] : vector<64x32xbf16> -> vector<32x64xbf16>
    %cst_33 = arith.constant dense<0.000000e+00> : vector<14x64xf32>
    %62 = tpu.matmul %56, %61, %cst_33 {dimension_numbers = #tpu.dot_dimension_numbers<[1], [0], [0], [1], [0, 0, 1, 1], [], []>} : vector<14x32xbf16>, vector<32x64xbf16>, vector<14x64xf32> -> vector<14x64xf32>
    %cst_34 = arith.constant 0.176776692 : f32
    %63 = vector.broadcast %cst_34 : f32 to vector<14x64xf32>
    %64 = arith.mulf %62, %63 : vector<14x64xf32>
    %cst_35 = arith.constant dense<0xFF800000> : vector<14xf32>
    %65 = vector.multi_reduction <maximumf>, %64, %cst_35 [1] : vector<14x64xf32> to vector<14xf32>
    %66 = vector.shape_cast %65 : vector<14xf32> to vector<14x1xf32>
    %67 = vector.broadcast %66 : vector<14x1xf32> to vector<14x64xf32>
    %68 = arith.subf %64, %67 : vector<14x64xf32>
    %69 = math.exp %68 : vector<14x64xf32>
    %cst_36 = arith.constant dense<0.000000e+00> : vector<14xf32>
    %70 = vector.multi_reduction <add>, %69, %cst_36 [1] : vector<14x64xf32> to vector<14xf32>
    %71 = vector.shape_cast %70 : vector<14xf32> to vector<14x1xf32>
    %72 = tpu.reciprocal %71 {approx = true} : vector<14x1xf32> -> vector<14x1xf32>
    %73 = vector.broadcast %72 : vector<14x1xf32> to vector<14x64xf32>
    %74 = arith.mulf %69, %73 : vector<14x64xf32>
    %75 = arith.truncf %74 : vector<14x64xf32> to vector<14x64xbf16>
    %cst_37 = arith.constant dense<0.000000e+00> : vector<14x32xf32>
    %76 = tpu.matmul %75, %60, %cst_37 {dimension_numbers = #tpu.dot_dimension_numbers<[1], [0], [0], [1], [0, 0, 1, 1], [], []>} : vector<14x64xbf16>, vector<64x32xbf16>, vector<14x32xf32> -> vector<14x32xf32>
    %77 = arith.truncf %76 : vector<14x32xf32> to vector<14x32xbf16>
    %c0_38 = arith.constant 0 : index
    %c32 = arith.constant 32 : index
    %c0_39 = arith.constant 0 : index
    %78 = vector.load %arg8[%c0_38, %c32, %c0_39] : memref<1x128x128xbf16, #tpu.memory_space<vmem>>, vector<1x32x128xbf16>
    %79 = vector.shape_cast %78 : vector<1x32x128xbf16> to vector<32x128xbf16>
    %cst_40 = arith.constant dense<0.000000e+00> : vector<14x128xf32>
    %80 = tpu.matmul %77, %79, %cst_40 {dimension_numbers = #tpu.dot_dimension_numbers<[1], [0], [0], [1], [0, 0, 1, 1], [], []>} : vector<14x32xbf16>, vector<32x128xbf16>, vector<14x128xf32> -> vector<14x128xf32>
    %81 = arith.addf %53, %80 : vector<14x128xf32>
    %82 = arith.addf %54, %74 : vector<14x64xf32>
    %83 = vector.extract_strided_slice %11 {offsets = [0, 64], sizes = [14, 32], strides = [1, 1]} : vector<14x128xf32> to vector<14x32xf32>
    %84 = arith.truncf %83 : vector<14x32xf32> to vector<14x32xbf16>
    %85 = vector.extract_strided_slice %24 {offsets = [0, 64], sizes = [64, 32], strides = [1, 1]} : vector<64x128xf32> to vector<64x32xf32>
    %86 = arith.truncf %85 : vector<64x32xf32> to vector<64x32xbf16>
    %87 = vector.extract_strided_slice %25 {offsets = [0, 64], sizes = [64, 32], strides = [1, 1]} : vector<64x128xf32> to vector<64x32xf32>
    %88 = arith.truncf %87 : vector<64x32xf32> to vector<64x32xbf16>
    %89 = tpu.transpose %86, [1, 0] : vector<64x32xbf16> -> vector<32x64xbf16>
    %cst_41 = arith.constant dense<0.000000e+00> : vector<14x64xf32>
    %90 = tpu.matmul %84, %89, %cst_41 {dimension_numbers = #tpu.dot_dimension_numbers<[1], [0], [0], [1], [0, 0, 1, 1], [], []>} : vector<14x32xbf16>, vector<32x64xbf16>, vector<14x64xf32> -> vector<14x64xf32>
    %cst_42 = arith.constant 0.176776692 : f32
    %91 = vector.broadcast %cst_42 : f32 to vector<14x64xf32>
    %92 = arith.mulf %90, %91 : vector<14x64xf32>
    %cst_43 = arith.constant dense<0xFF800000> : vector<14xf32>
    %93 = vector.multi_reduction <maximumf>, %92, %cst_43 [1] : vector<14x64xf32> to vector<14xf32>
    %94 = vector.shape_cast %93 : vector<14xf32> to vector<14x1xf32>
    %95 = vector.broadcast %94 : vector<14x1xf32> to vector<14x64xf32>
    %96 = arith.subf %92, %95 : vector<14x64xf32>
    %97 = math.exp %96 : vector<14x64xf32>
    %cst_44 = arith.constant dense<0.000000e+00> : vector<14xf32>
    %98 = vector.multi_reduction <add>, %97, %cst_44 [1] : vector<14x64xf32> to vector<14xf32>
    %99 = vector.shape_cast %98 : vector<14xf32> to vector<14x1xf32>
    %100 = tpu.reciprocal %99 {approx = true} : vector<14x1xf32> -> vector<14x1xf32>
    %101 = vector.broadcast %100 : vector<14x1xf32> to vector<14x64xf32>
    %102 = arith.mulf %97, %101 : vector<14x64xf32>
    %103 = arith.truncf %102 : vector<14x64xf32> to vector<14x64xbf16>
    %cst_45 = arith.constant dense<0.000000e+00> : vector<14x32xf32>
    %104 = tpu.matmul %103, %88, %cst_45 {dimension_numbers = #tpu.dot_dimension_numbers<[1], [0], [0], [1], [0, 0, 1, 1], [], []>} : vector<14x64xbf16>, vector<64x32xbf16>, vector<14x32xf32> -> vector<14x32xf32>
    %105 = arith.truncf %104 : vector<14x32xf32> to vector<14x32xbf16>
    %c0_46 = arith.constant 0 : index
    %c64 = arith.constant 64 : index
    %c0_47 = arith.constant 0 : index
    %106 = vector.load %arg8[%c0_46, %c64, %c0_47] : memref<1x128x128xbf16, #tpu.memory_space<vmem>>, vector<1x32x128xbf16>
    %107 = vector.shape_cast %106 : vector<1x32x128xbf16> to vector<32x128xbf16>
    %cst_48 = arith.constant dense<0.000000e+00> : vector<14x128xf32>
    %108 = tpu.matmul %105, %107, %cst_48 {dimension_numbers = #tpu.dot_dimension_numbers<[1], [0], [0], [1], [0, 0, 1, 1], [], []>} : vector<14x32xbf16>, vector<32x128xbf16>, vector<14x128xf32> -> vector<14x128xf32>
    %109 = arith.addf %81, %108 : vector<14x128xf32>
    %110 = arith.addf %82, %102 : vector<14x64xf32>
    %111 = vector.extract_strided_slice %11 {offsets = [0, 96], sizes = [14, 32], strides = [1, 1]} : vector<14x128xf32> to vector<14x32xf32>
    %112 = arith.truncf %111 : vector<14x32xf32> to vector<14x32xbf16>
    %113 = vector.extract_strided_slice %24 {offsets = [0, 96], sizes = [64, 32], strides = [1, 1]} : vector<64x128xf32> to vector<64x32xf32>
    %114 = arith.truncf %113 : vector<64x32xf32> to vector<64x32xbf16>
    %115 = vector.extract_strided_slice %25 {offsets = [0, 96], sizes = [64, 32], strides = [1, 1]} : vector<64x128xf32> to vector<64x32xf32>
    %116 = arith.truncf %115 : vector<64x32xf32> to vector<64x32xbf16>
    %117 = tpu.transpose %114, [1, 0] : vector<64x32xbf16> -> vector<32x64xbf16>
    %cst_49 = arith.constant dense<0.000000e+00> : vector<14x64xf32>
    %118 = tpu.matmul %112, %117, %cst_49 {dimension_numbers = #tpu.dot_dimension_numbers<[1], [0], [0], [1], [0, 0, 1, 1], [], []>} : vector<14x32xbf16>, vector<32x64xbf16>, vector<14x64xf32> -> vector<14x64xf32>
    %cst_50 = arith.constant 0.176776692 : f32
    %119 = vector.broadcast %cst_50 : f32 to vector<14x64xf32>
    %120 = arith.mulf %118, %119 : vector<14x64xf32>
    %cst_51 = arith.constant dense<0xFF800000> : vector<14xf32>
    %121 = vector.multi_reduction <maximumf>, %120, %cst_51 [1] : vector<14x64xf32> to vector<14xf32>
    %122 = vector.shape_cast %121 : vector<14xf32> to vector<14x1xf32>
    %123 = vector.broadcast %122 : vector<14x1xf32> to vector<14x64xf32>
    %124 = arith.subf %120, %123 : vector<14x64xf32>
    %125 = math.exp %124 : vector<14x64xf32>
    %cst_52 = arith.constant dense<0.000000e+00> : vector<14xf32>
    %126 = vector.multi_reduction <add>, %125, %cst_52 [1] : vector<14x64xf32> to vector<14xf32>
    %127 = vector.shape_cast %126 : vector<14xf32> to vector<14x1xf32>
    %128 = tpu.reciprocal %127 {approx = true} : vector<14x1xf32> -> vector<14x1xf32>
    %129 = vector.broadcast %128 : vector<14x1xf32> to vector<14x64xf32>
    %130 = arith.mulf %125, %129 : vector<14x64xf32>
    %131 = arith.truncf %130 : vector<14x64xf32> to vector<14x64xbf16>
    %cst_53 = arith.constant dense<0.000000e+00> : vector<14x32xf32>
    %132 = tpu.matmul %131, %116, %cst_53 {dimension_numbers = #tpu.dot_dimension_numbers<[1], [0], [0], [1], [0, 0, 1, 1], [], []>} : vector<14x64xbf16>, vector<64x32xbf16>, vector<14x32xf32> -> vector<14x32xf32>
    %133 = arith.truncf %132 : vector<14x32xf32> to vector<14x32xbf16>
    %c0_54 = arith.constant 0 : index
    %c96 = arith.constant 96 : index
    %c0_55 = arith.constant 0 : index
    %134 = vector.load %arg8[%c0_54, %c96, %c0_55] : memref<1x128x128xbf16, #tpu.memory_space<vmem>>, vector<1x32x128xbf16>
    %135 = vector.shape_cast %134 : vector<1x32x128xbf16> to vector<32x128xbf16>
    %cst_56 = arith.constant dense<0.000000e+00> : vector<14x128xf32>
    %136 = tpu.matmul %133, %135, %cst_56 {dimension_numbers = #tpu.dot_dimension_numbers<[1], [0], [0], [1], [0, 0, 1, 1], [], []>} : vector<14x32xbf16>, vector<32x128xbf16>, vector<14x128xf32> -> vector<14x128xf32>
    %137 = arith.addf %109, %136 : vector<14x128xf32>
    %138 = arith.addf %110, %130 : vector<14x64xf32>
    %cst_57 = arith.constant 2.500000e-01 : f32
    %139 = vector.broadcast %cst_57 : f32 to vector<14x64xf32>
    %140 = arith.mulf %138, %139 : vector<14x64xf32>
    %c0_58 = arith.constant 0 : index
    %c0_59 = arith.constant 0 : index
    %c0_60 = arith.constant 0 : index
    %c0_61 = arith.constant 0 : index
    %141 = vector.load %arg17[%c0_58, %c0_59, %c0_60, %c0_61] : memref<1x1x14x64xf32, #tpu.memory_space<vmem>>, vector<1x1x14x64xf32>
    %142 = vector.shape_cast %141 : vector<1x1x14x64xf32> to vector<14x64xf32>
    %143 = vector.shape_cast %140 : vector<14x64xf32> to vector<1x1x14x64xf32>
    tpu.vector_store %arg17[%c0_58, %c0_59, %c0_60, %c0_61], %143 {strides = array<i32>} : memref<1x1x14x64xf32, #tpu.memory_space<vmem>>, vector<1x1x14x64xf32>,
    %c0_62 = arith.constant 0 : index
    %c0_63 = arith.constant 0 : index
    %c0_64 = arith.constant 0 : index
    %144 = vector.load %arg10[%c0_62, %c0_63, %c0_64] : memref<1x1x128xf32, #tpu.memory_space<vmem>>, vector<1x1x128xf32>
    %145 = vector.shape_cast %144 : vector<1x1x128xf32> to vector<1x128xf32>
    %c0_65 = arith.constant 0 : index
    %c0_66 = arith.constant 0 : index
    %c0_67 = arith.constant 0 : index
    %146 = vector.load %arg11[%c0_65, %c0_66, %c0_67] : memref<1x1x128xf32, #tpu.memory_space<vmem>>, vector<1x1x128xf32>
    %147 = vector.shape_cast %146 : vector<1x1x128xf32> to vector<1x128xf32>
    %cst_68 = arith.constant dense<0.000000e+00> : vector<14xf32>
    %148 = vector.multi_reduction <add>, %137, %cst_68 [1] : vector<14x128xf32> to vector<14xf32>
    %149 = vector.shape_cast %148 : vector<14xf32> to vector<14x1xf32>
    %cst_69 = arith.constant 1.280000e+02 : f32
    %150 = vector.broadcast %cst_69 : f32 to vector<14x1xf32>
    %151 = arith.divf %149, %150 : vector<14x1xf32>
    %152 = vector.broadcast %151 : vector<14x1xf32> to vector<14x128xf32>
    %153 = arith.subf %137, %152 : vector<14x128xf32>
    %154 = arith.mulf %153, %153 : vector<14x128xf32>
    %cst_70 = arith.constant dense<0.000000e+00> : vector<14xf32>
    %155 = vector.multi_reduction <add>, %154, %cst_70 [1] : vector<14x128xf32> to vector<14xf32>
    %156 = vector.shape_cast %155 : vector<14xf32> to vector<14x1xf32>
    %cst_71 = arith.constant 1.280000e+02 : f32
    %157 = vector.broadcast %cst_71 : f32 to vector<14x1xf32>
    %158 = arith.divf %156, %157 : vector<14x1xf32>
    %cst_72 = arith.constant 9.99999974E-6 : f32
    %159 = vector.broadcast %cst_72 : f32 to vector<14x1xf32>
    %160 = arith.addf %158, %159 : vector<14x1xf32>
    %161 = math.rsqrt %160 : vector<14x1xf32>
    %162 = vector.broadcast %161 : vector<14x1xf32> to vector<14x128xf32>
    %163 = arith.mulf %153, %162 : vector<14x128xf32>
    %164 = vector.broadcast %145 : vector<1x128xf32> to vector<14x128xf32>
    %165 = arith.mulf %163, %164 : vector<14x128xf32>
    %166 = vector.broadcast %147 : vector<1x128xf32> to vector<14x128xf32>
    %167 = arith.addf %165, %166 : vector<14x128xf32>
    %168 = arith.truncf %167 : vector<14x128xf32> to vector<14x128xbf16>
    %c0_73 = arith.constant 0 : index
    %c0_74 = arith.constant 0 : index
    %c0_75 = arith.constant 0 : index
    %169 = vector.load %arg12[%c0_73, %c0_74, %c0_75] : memref<1x128x512xbf16, #tpu.memory_space<vmem>>, vector<1x128x512xbf16>
    %170 = vector.shape_cast %169 : vector<1x128x512xbf16> to vector<128x512xbf16>
    %cst_76 = arith.constant dense<0.000000e+00> : vector<14x512xf32>
    %171 = tpu.matmul %168, %170, %cst_76 {dimension_numbers = #tpu.dot_dimension_numbers<[1], [0], [0], [1], [0, 0, 1, 1], [], []>} : vector<14x128xbf16>, vector<128x512xbf16>, vector<14x512xf32> -> vector<14x512xf32>
    %c0_77 = arith.constant 0 : index
    %c0_78 = arith.constant 0 : index
    %c0_79 = arith.constant 0 : index
    %172 = vector.load %arg13[%c0_77, %c0_78, %c0_79] : memref<1x1x512xf32, #tpu.memory_space<vmem>>, vector<1x1x512xf32>
    %173 = vector.shape_cast %172 : vector<1x1x512xf32> to vector<1x512xf32>
    %174 = vector.broadcast %173 : vector<1x512xf32> to vector<14x512xf32>
    %175 = arith.addf %171, %174 : vector<14x512xf32>
    %cst_80 = arith.constant 0.000000e+00 : f32
    %176 = vector.broadcast %cst_80 : f32 to vector<14x512xf32>
    %177 = arith.maximumf %175, %176 : vector<14x512xf32>
    %178 = arith.truncf %177 : vector<14x512xf32> to vector<14x512xbf16>
    %c0_81 = arith.constant 0 : index
    %c0_82 = arith.constant 0 : index
    %c0_83 = arith.constant 0 : index
    %179 = vector.load %arg14[%c0_81, %c0_82, %c0_83] : memref<1x512x128xbf16, #tpu.memory_space<vmem>>, vector<1x512x128xbf16>
    %180 = vector.shape_cast %179 : vector<1x512x128xbf16> to vector<512x128xbf16>
    %cst_84 = arith.constant dense<0.000000e+00> : vector<14x128xf32>
    %181 = tpu.matmul %178, %180, %cst_84 {dimension_numbers = #tpu.dot_dimension_numbers<[1], [0], [0], [1], [0, 0, 1, 1], [], []>} : vector<14x512xbf16>, vector<512x128xbf16>, vector<14x128xf32> -> vector<14x128xf32>
    %c0_85 = arith.constant 0 : index
    %c0_86 = arith.constant 0 : index
    %c0_87 = arith.constant 0 : index
    %182 = vector.load %arg15[%c0_85, %c0_86, %c0_87] : memref<1x1x128xf32, #tpu.memory_space<vmem>>, vector<1x1x128xf32>
    %183 = vector.shape_cast %182 : vector<1x1x128xf32> to vector<1x128xf32>
    %184 = vector.broadcast %183 : vector<1x128xf32> to vector<14x128xf32>
    %185 = arith.addf %181, %184 : vector<14x128xf32>
    %c0_88 = arith.constant 0 : index
    %c0_89 = arith.constant 0 : index
    %c0_90 = arith.constant 0 : index
    %c0_91 = arith.constant 0 : index
    %186 = vector.load %arg16[%c0_88, %c0_89, %c0_90, %c0_91] : memref<1x1x14x128xf32, #tpu.memory_space<vmem>>, vector<1x1x14x128xf32>
    %187 = vector.shape_cast %186 : vector<1x1x14x128xf32> to vector<14x128xf32>
    %188 = vector.shape_cast %185 : vector<14x128xf32> to vector<1x1x14x128xf32>
    tpu.vector_store %arg16[%c0_88, %c0_89, %c0_90, %c0_91], %188 {strides = array<i32>} : memref<1x1x14x128xf32, #tpu.memory_space<vmem>>, vector<1x1x14x128xf32>,
    return
  }
  func.func @transform_0(%arg0: i32, %arg1: i32) -> (i32, i32, i32, i32) {
    %c0_i32 = arith.constant 0 : i32
    %c0_i32_0 = arith.constant 0 : i32
    %c0_i32_1 = arith.constant 0 : i32
    return %arg0, %arg1, %c0_i32, %c0_i32_0 : i32, i32, i32, i32
  }
  func.func @transform_1(%arg0: i32, %arg1: i32) -> (i32, i32, i32, i32) {
    %c0_i32 = arith.constant 0 : i32
    %c0_i32_0 = arith.constant 0 : i32
    %c0_i32_1 = arith.constant 0 : i32
    return %arg0, %arg1, %c0_i32, %c0_i32_0 : i32, i32, i32, i32
  }
  func.func @transform_2(%arg0: i32, %arg1: i32) -> (i32, i32, i32) {
    %c0_i32 = arith.constant 0 : i32
    %c0_i32_0 = arith.constant 0 : i32
    %c0_i32_1 = arith.constant 0 : i32
    return %arg0, %c0_i32, %c0_i32_0 : i32, i32, i32
  }
  func.func @transform_3(%arg0: i32, %arg1: i32) -> (i32, i32, i32) {
    %c0_i32 = arith.constant 0 : i32
    %c0_i32_0 = arith.constant 0 : i32
    %c0_i32_1 = arith.constant 0 : i32
    return %arg0, %c0_i32, %c0_i32_0 : i32, i32, i32
  }
  func.func @transform_4(%arg0: i32, %arg1: i32) -> (i32, i32, i32) {
    %c0_i32 = arith.constant 0 : i32
    %c0_i32_0 = arith.constant 0 : i32
    %c0_i32_1 = arith.constant 0 : i32
    return %arg0, %c0_i32, %c0_i32_0 : i32, i32, i32
  }
  func.func @transform_5(%arg0: i32, %arg1: i32) -> (i32, i32, i32) {
    %c0_i32 = arith.constant 0 : i32
    %c0_i32_0 = arith.constant 0 : i32
    %c0_i32_1 = arith.constant 0 : i32
    return %arg0, %c0_i32, %c0_i32_0 : i32, i32, i32
  }
  func.func @transform_6(%arg0: i32, %arg1: i32) -> (i32, i32, i32) {
    %c0_i32 = arith.constant 0 : i32
    %c0_i32_0 = arith.constant 0 : i32
    %c0_i32_1 = arith.constant 0 : i32
    return %arg0, %c0_i32, %c0_i32_0 : i32, i32, i32
  }
  func.func @transform_7(%arg0: i32, %arg1: i32) -> (i32, i32, i32) {
    %c0_i32 = arith.constant 0 : i32
    %c0_i32_0 = arith.constant 0 : i32
    %c0_i32_1 = arith.constant 0 : i32
    return %arg0, %c0_i32, %c0_i32_0 : i32, i32, i32
  }
  func.func @transform_8(%arg0: i32, %arg1: i32) -> (i32, i32, i32) {
    %c0_i32 = arith.constant 0 : i32
    %c0_i32_0 = arith.constant 0 : i32
    %c0_i32_1 = arith.constant 0 : i32
    return %arg0, %c0_i32, %c0_i32_0 : i32, i32, i32
  }
  func.func @transform_9(%arg0: i32, %arg1: i32) -> (i32, i32, i32) {
    %c0_i32 = arith.constant 0 : i32
    %c0_i32_0 = arith.constant 0 : i32
    %c0_i32_1 = arith.constant 0 : i32
    return %arg0, %c0_i32, %c0_i32_0 : i32, i32, i32
  }
  func.func @transform_10(%arg0: i32, %arg1: i32) -> (i32, i32, i32) {
    %c0_i32 = arith.constant 0 : i32
    %c0_i32_0 = arith.constant 0 : i32
    %c0_i32_1 = arith.constant 0 : i32
    return %arg0, %c0_i32, %c0_i32_0 : i32, i32, i32
  }
  func.func @transform_11(%arg0: i32, %arg1: i32) -> (i32, i32, i32) {
    %c0_i32 = arith.constant 0 : i32
    %c0_i32_0 = arith.constant 0 : i32
    %c0_i32_1 = arith.constant 0 : i32
    return %arg0, %c0_i32, %c0_i32_0 : i32, i32, i32
  }
  func.func @transform_12(%arg0: i32, %arg1: i32) -> (i32, i32, i32) {
    %c0_i32 = arith.constant 0 : i32
    %c0_i32_0 = arith.constant 0 : i32
    %c0_i32_1 = arith.constant 0 : i32
    return %arg0, %c0_i32, %c0_i32_0 : i32, i32, i32
  }
  func.func @transform_13(%arg0: i32, %arg1: i32) -> (i32, i32, i32) {
    %c0_i32 = arith.constant 0 : i32
    %c0_i32_0 = arith.constant 0 : i32
    %c0_i32_1 = arith.constant 0 : i32
    return %arg0, %c0_i32, %c0_i32_0 : i32, i32, i32
  }
  func.func @transform_14(%arg0: i32, %arg1: i32) -> (i32, i32, i32, i32) {
    %c0_i32 = arith.constant 0 : i32
    %c0_i32_0 = arith.constant 0 : i32
    %c0_i32_1 = arith.constant 0 : i32
    return %arg0, %arg1, %c0_i32, %c0_i32_0 : i32, i32, i32, i32
  }
  func.func @transform_15(%arg0: i32, %arg1: i32) -> (i32, i32, i32, i32) {
    %c0_i32 = arith.constant 0 : i32
    %c0_i32_0 = arith.constant 0 : i32
    %c0_i32_1 = arith.constant 0 : i32
    return %arg0, %arg1, %c0_i32, %c0_i32_0 : i32, i32, i32, i32
  }
}

module attributes {stable_mosaic.version = 11 : i64} {
  func.func @_tail_kernel(%arg0: i32, %arg1: memref<1x14x128xf32, #tpu.memory_space<vmem>>, %arg2: memref<1x14x128xf32, #tpu.memory_space<vmem>>, %arg3: memref<128x512xbf16, #tpu.memory_space<vmem>>, %arg4: memref<128x512xbf16, #tpu.memory_space<vmem>>, %arg5: memref<1x512xf32, #tpu.memory_space<vmem>>, %arg6: memref<512x128xbf16, #tpu.memory_space<vmem>>, %arg7: memref<1x128xf32, #tpu.memory_space<vmem>>, %arg8: memref<1x128xf32, #tpu.memory_space<vmem>>, %arg9: memref<1x128xf32, #tpu.memory_space<vmem>>, %arg10: memref<128x384xbf16, #tpu.memory_space<vmem>>, %arg11: memref<1x384xf32, #tpu.memory_space<vmem>>, %arg12: memref<128x128xbf16, #tpu.memory_space<vmem>>, %arg13: memref<1x128xf32, #tpu.memory_space<vmem>>, %arg14: memref<1x128xf32, #tpu.memory_space<vmem>>, %arg15: memref<1x128xf32, #tpu.memory_space<vmem>>, %arg16: memref<1x14x128xf32, #tpu.memory_space<vmem>>) attributes {dimension_semantics = [#tpu.dimension_semantics<parallel>], iteration_bounds = array<i64: 2>, scalar_prefetch = 0 : i64, scratch_operands = 0 : i64, tpu.core_type = #tpu.core_type<tc>, window_params = [{transform_indices = @transform_0, window_bounds = array<i64: 1, 14, 128>}, {transform_indices = @transform_1, window_bounds = array<i64: 1, 14, 128>}, {pipeline_mode = #tpu.pipeline_mode<synchronous>, transform_indices = @transform_2, window_bounds = array<i64: 128, 512>}, {pipeline_mode = #tpu.pipeline_mode<synchronous>, transform_indices = @transform_3, window_bounds = array<i64: 128, 512>}, {pipeline_mode = #tpu.pipeline_mode<synchronous>, transform_indices = @transform_4, window_bounds = array<i64: 1, 512>}, {pipeline_mode = #tpu.pipeline_mode<synchronous>, transform_indices = @transform_5, window_bounds = array<i64: 512, 128>}, {pipeline_mode = #tpu.pipeline_mode<synchronous>, transform_indices = @transform_6, window_bounds = array<i64: 1, 128>}, {pipeline_mode = #tpu.pipeline_mode<synchronous>, transform_indices = @transform_7, window_bounds = array<i64: 1, 128>}, {pipeline_mode = #tpu.pipeline_mode<synchronous>, transform_indices = @transform_8, window_bounds = array<i64: 1, 128>}, {pipeline_mode = #tpu.pipeline_mode<synchronous>, transform_indices = @transform_9, window_bounds = array<i64: 128, 384>}, {pipeline_mode = #tpu.pipeline_mode<synchronous>, transform_indices = @transform_10, window_bounds = array<i64: 1, 384>}, {pipeline_mode = #tpu.pipeline_mode<synchronous>, transform_indices = @transform_11, window_bounds = array<i64: 128, 128>}, {pipeline_mode = #tpu.pipeline_mode<synchronous>, transform_indices = @transform_12, window_bounds = array<i64: 1, 128>}, {pipeline_mode = #tpu.pipeline_mode<synchronous>, transform_indices = @transform_13, window_bounds = array<i64: 1, 128>}, {pipeline_mode = #tpu.pipeline_mode<synchronous>, transform_indices = @transform_14, window_bounds = array<i64: 1, 128>}, {transform_indices = @transform_15, window_bounds = array<i64: 1, 14, 128>}]} {
    %c0 = arith.constant 0 : index
    %c0_0 = arith.constant 0 : index
    %c0_1 = arith.constant 0 : index
    %0 = vector.load %arg1[%c0, %c0_0, %c0_1] : memref<1x14x128xf32, #tpu.memory_space<vmem>>, vector<1x14x128xf32>
    %1 = vector.shape_cast %0 : vector<1x14x128xf32> to vector<14x128xf32>
    %2 = arith.truncf %1 : vector<14x128xf32> to vector<14x128xbf16>
    %c0_2 = arith.constant 0 : index
    %c0_3 = arith.constant 0 : index
    %c0_4 = arith.constant 0 : index
    %3 = vector.load %arg2[%c0_2, %c0_3, %c0_4] : memref<1x14x128xf32, #tpu.memory_space<vmem>>, vector<1x14x128xf32>
    %4 = vector.shape_cast %3 : vector<1x14x128xf32> to vector<14x128xf32>
    %5 = arith.truncf %4 : vector<14x128xf32> to vector<14x128xbf16>
    %c0_5 = arith.constant 0 : index
    %c0_6 = arith.constant 0 : index
    %6 = vector.load %arg3[%c0_5, %c0_6] : memref<128x512xbf16, #tpu.memory_space<vmem>>, vector<128x512xbf16>
    %cst = arith.constant dense<0.000000e+00> : vector<14x512xf32>
    %7 = tpu.matmul %2, %6, %cst {dimension_numbers = #tpu.dot_dimension_numbers<[1], [0], [0], [1], [0, 0, 1, 1], [], []>} : vector<14x128xbf16>, vector<128x512xbf16>, vector<14x512xf32> -> vector<14x512xf32>
    %c0_7 = arith.constant 0 : index
    %c0_8 = arith.constant 0 : index
    %8 = vector.load %arg4[%c0_7, %c0_8] : memref<128x512xbf16, #tpu.memory_space<vmem>>, vector<128x512xbf16>
    %cst_9 = arith.constant dense<0.000000e+00> : vector<14x512xf32>
    %9 = tpu.matmul %5, %8, %cst_9 {dimension_numbers = #tpu.dot_dimension_numbers<[1], [0], [0], [1], [0, 0, 1, 1], [], []>} : vector<14x128xbf16>, vector<128x512xbf16>, vector<14x512xf32> -> vector<14x512xf32>
    %10 = arith.addf %7, %9 : vector<14x512xf32>
    %c0_10 = arith.constant 0 : index
    %c0_11 = arith.constant 0 : index
    %11 = vector.load %arg5[%c0_10, %c0_11] : memref<1x512xf32, #tpu.memory_space<vmem>>, vector<1x512xf32>
    %12 = vector.broadcast %11 : vector<1x512xf32> to vector<14x512xf32>
    %13 = arith.addf %10, %12 : vector<14x512xf32>
    %cst_12 = arith.constant 0.000000e+00 : f32
    %14 = vector.broadcast %cst_12 : f32 to vector<14x512xf32>
    %15 = arith.maximumf %13, %14 : vector<14x512xf32>
    %16 = arith.truncf %15 : vector<14x512xf32> to vector<14x512xbf16>
    %c0_13 = arith.constant 0 : index
    %c0_14 = arith.constant 0 : index
    %17 = vector.load %arg6[%c0_13, %c0_14] : memref<512x128xbf16, #tpu.memory_space<vmem>>, vector<512x128xbf16>
    %cst_15 = arith.constant dense<0.000000e+00> : vector<14x128xf32>
    %18 = tpu.matmul %16, %17, %cst_15 {dimension_numbers = #tpu.dot_dimension_numbers<[1], [0], [0], [1], [0, 0, 1, 1], [], []>} : vector<14x512xbf16>, vector<512x128xbf16>, vector<14x128xf32> -> vector<14x128xf32>
    %c0_16 = arith.constant 0 : index
    %c0_17 = arith.constant 0 : index
    %19 = vector.load %arg7[%c0_16, %c0_17] : memref<1x128xf32, #tpu.memory_space<vmem>>, vector<1x128xf32>
    %20 = vector.broadcast %19 : vector<1x128xf32> to vector<14x128xf32>
    %21 = arith.addf %18, %20 : vector<14x128xf32>
    %c0_18 = arith.constant 0 : index
    %c0_19 = arith.constant 0 : index
    %22 = vector.load %arg8[%c0_18, %c0_19] : memref<1x128xf32, #tpu.memory_space<vmem>>, vector<1x128xf32>
    %c0_20 = arith.constant 0 : index
    %c0_21 = arith.constant 0 : index
    %23 = vector.load %arg9[%c0_20, %c0_21] : memref<1x128xf32, #tpu.memory_space<vmem>>, vector<1x128xf32>
    %cst_22 = arith.constant dense<0.000000e+00> : vector<14xf32>
    %24 = vector.multi_reduction <add>, %21, %cst_22 [1] : vector<14x128xf32> to vector<14xf32>
    %25 = vector.shape_cast %24 : vector<14xf32> to vector<14x1xf32>
    %cst_23 = arith.constant 1.280000e+02 : f32
    %26 = vector.broadcast %cst_23 : f32 to vector<14x1xf32>
    %27 = arith.divf %25, %26 : vector<14x1xf32>
    %28 = vector.broadcast %27 : vector<14x1xf32> to vector<14x128xf32>
    %29 = arith.subf %21, %28 : vector<14x128xf32>
    %30 = arith.mulf %29, %29 : vector<14x128xf32>
    %cst_24 = arith.constant dense<0.000000e+00> : vector<14xf32>
    %31 = vector.multi_reduction <add>, %30, %cst_24 [1] : vector<14x128xf32> to vector<14xf32>
    %32 = vector.shape_cast %31 : vector<14xf32> to vector<14x1xf32>
    %cst_25 = arith.constant 1.280000e+02 : f32
    %33 = vector.broadcast %cst_25 : f32 to vector<14x1xf32>
    %34 = arith.divf %32, %33 : vector<14x1xf32>
    %cst_26 = arith.constant 9.99999974E-6 : f32
    %35 = vector.broadcast %cst_26 : f32 to vector<14x1xf32>
    %36 = arith.addf %34, %35 : vector<14x1xf32>
    %37 = math.rsqrt %36 : vector<14x1xf32>
    %38 = vector.broadcast %37 : vector<14x1xf32> to vector<14x128xf32>
    %39 = arith.mulf %29, %38 : vector<14x128xf32>
    %40 = vector.broadcast %22 : vector<1x128xf32> to vector<14x128xf32>
    %41 = arith.mulf %39, %40 : vector<14x128xf32>
    %42 = vector.broadcast %23 : vector<1x128xf32> to vector<14x128xf32>
    %43 = arith.addf %41, %42 : vector<14x128xf32>
    %44 = arith.truncf %43 : vector<14x128xf32> to vector<14x128xbf16>
    %c0_27 = arith.constant 0 : index
    %c0_28 = arith.constant 0 : index
    %45 = vector.load %arg10[%c0_27, %c0_28] : memref<128x384xbf16, #tpu.memory_space<vmem>>, vector<128x384xbf16>
    %cst_29 = arith.constant dense<0.000000e+00> : vector<14x384xf32>
    %46 = tpu.matmul %44, %45, %cst_29 {dimension_numbers = #tpu.dot_dimension_numbers<[1], [0], [0], [1], [0, 0, 1, 1], [], []>} : vector<14x128xbf16>, vector<128x384xbf16>, vector<14x384xf32> -> vector<14x384xf32>
    %c0_30 = arith.constant 0 : index
    %c0_31 = arith.constant 0 : index
    %47 = vector.load %arg11[%c0_30, %c0_31] : memref<1x384xf32, #tpu.memory_space<vmem>>, vector<1x384xf32>
    %48 = vector.broadcast %47 : vector<1x384xf32> to vector<14x384xf32>
    %49 = arith.addf %46, %48 : vector<14x384xf32>
    %c0_32 = arith.constant 0 : index
    %c0_33 = arith.constant 0 : index
    %50 = vector.load %arg13[%c0_32, %c0_33] : memref<1x128xf32, #tpu.memory_space<vmem>>, vector<1x128xf32>
    %51 = vector.broadcast %50 : vector<1x128xf32> to vector<14x128xf32>
    %52 = arith.addf %51, %43 : vector<14x128xf32>
    %53 = vector.extract_strided_slice %49 {offsets = [0, 0], sizes = [14, 128], strides = [1, 1]} : vector<14x384xf32> to vector<14x128xf32>
    %54 = vector.extract_strided_slice %49 {offsets = [0, 128], sizes = [14, 128], strides = [1, 1]} : vector<14x384xf32> to vector<14x128xf32>
    %55 = vector.extract_strided_slice %49 {offsets = [0, 256], sizes = [14, 128], strides = [1, 1]} : vector<14x384xf32> to vector<14x128xf32>
    %56 = vector.extract_strided_slice %53 {offsets = [0, 0], sizes = [14, 32], strides = [1, 1]} : vector<14x128xf32> to vector<14x32xf32>
    %57 = arith.truncf %56 : vector<14x32xf32> to vector<14x32xbf16>
    %58 = vector.extract_strided_slice %54 {offsets = [0, 0], sizes = [14, 32], strides = [1, 1]} : vector<14x128xf32> to vector<14x32xf32>
    %59 = arith.truncf %58 : vector<14x32xf32> to vector<14x32xbf16>
    %60 = vector.extract_strided_slice %55 {offsets = [0, 0], sizes = [14, 32], strides = [1, 1]} : vector<14x128xf32> to vector<14x32xf32>
    %61 = arith.truncf %60 : vector<14x32xf32> to vector<14x32xbf16>
    %62 = tpu.transpose %59, [1, 0] : vector<14x32xbf16> -> vector<32x14xbf16>
    %cst_34 = arith.constant dense<0.000000e+00> : vector<14x14xf32>
    %63 = tpu.matmul %57, %62, %cst_34 {dimension_numbers = #tpu.dot_dimension_numbers<[1], [0], [0], [1], [0, 0, 1, 1], [], []>} : vector<14x32xbf16>, vector<32x14xbf16>, vector<14x14xf32> -> vector<14x14xf32>
    %cst_35 = arith.constant 0.176776692 : f32
    %64 = vector.broadcast %cst_35 : f32 to vector<14x14xf32>
    %65 = arith.mulf %63, %64 : vector<14x14xf32>
    %cst_36 = arith.constant dense<0xFF800000> : vector<14xf32>
    %66 = vector.multi_reduction <maximumf>, %65, %cst_36 [1] : vector<14x14xf32> to vector<14xf32>
    %67 = vector.shape_cast %66 : vector<14xf32> to vector<14x1xf32>
    %68 = vector.broadcast %67 : vector<14x1xf32> to vector<14x14xf32>
    %69 = arith.subf %65, %68 : vector<14x14xf32>
    %70 = math.exp %69 : vector<14x14xf32>
    %cst_37 = arith.constant dense<0.000000e+00> : vector<14xf32>
    %71 = vector.multi_reduction <add>, %70, %cst_37 [1] : vector<14x14xf32> to vector<14xf32>
    %72 = vector.shape_cast %71 : vector<14xf32> to vector<14x1xf32>
    %73 = tpu.reciprocal %72 {approx = true} : vector<14x1xf32> -> vector<14x1xf32>
    %74 = vector.broadcast %73 : vector<14x1xf32> to vector<14x14xf32>
    %75 = arith.mulf %70, %74 : vector<14x14xf32>
    %76 = arith.truncf %75 : vector<14x14xf32> to vector<14x14xbf16>
    %cst_38 = arith.constant dense<0.000000e+00> : vector<14x32xf32>
    %77 = tpu.matmul %76, %61, %cst_38 {dimension_numbers = #tpu.dot_dimension_numbers<[1], [0], [0], [1], [0, 0, 1, 1], [], []>} : vector<14x14xbf16>, vector<14x32xbf16>, vector<14x32xf32> -> vector<14x32xf32>
    %78 = arith.truncf %77 : vector<14x32xf32> to vector<14x32xbf16>
    %c0_39 = arith.constant 0 : index
    %c0_40 = arith.constant 0 : index
    %79 = vector.load %arg12[%c0_39, %c0_40] : memref<128x128xbf16, #tpu.memory_space<vmem>>, vector<32x128xbf16>
    %cst_41 = arith.constant dense<0.000000e+00> : vector<14x128xf32>
    %80 = tpu.matmul %78, %79, %cst_41 {dimension_numbers = #tpu.dot_dimension_numbers<[1], [0], [0], [1], [0, 0, 1, 1], [], []>} : vector<14x32xbf16>, vector<32x128xbf16>, vector<14x128xf32> -> vector<14x128xf32>
    %81 = arith.addf %52, %80 : vector<14x128xf32>
    %82 = vector.extract_strided_slice %53 {offsets = [0, 32], sizes = [14, 32], strides = [1, 1]} : vector<14x128xf32> to vector<14x32xf32>
    %83 = arith.truncf %82 : vector<14x32xf32> to vector<14x32xbf16>
    %84 = vector.extract_strided_slice %54 {offsets = [0, 32], sizes = [14, 32], strides = [1, 1]} : vector<14x128xf32> to vector<14x32xf32>
    %85 = arith.truncf %84 : vector<14x32xf32> to vector<14x32xbf16>
    %86 = vector.extract_strided_slice %55 {offsets = [0, 32], sizes = [14, 32], strides = [1, 1]} : vector<14x128xf32> to vector<14x32xf32>
    %87 = arith.truncf %86 : vector<14x32xf32> to vector<14x32xbf16>
    %88 = tpu.transpose %85, [1, 0] : vector<14x32xbf16> -> vector<32x14xbf16>
    %cst_42 = arith.constant dense<0.000000e+00> : vector<14x14xf32>
    %89 = tpu.matmul %83, %88, %cst_42 {dimension_numbers = #tpu.dot_dimension_numbers<[1], [0], [0], [1], [0, 0, 1, 1], [], []>} : vector<14x32xbf16>, vector<32x14xbf16>, vector<14x14xf32> -> vector<14x14xf32>
    %cst_43 = arith.constant 0.176776692 : f32
    %90 = vector.broadcast %cst_43 : f32 to vector<14x14xf32>
    %91 = arith.mulf %89, %90 : vector<14x14xf32>
    %cst_44 = arith.constant dense<0xFF800000> : vector<14xf32>
    %92 = vector.multi_reduction <maximumf>, %91, %cst_44 [1] : vector<14x14xf32> to vector<14xf32>
    %93 = vector.shape_cast %92 : vector<14xf32> to vector<14x1xf32>
    %94 = vector.broadcast %93 : vector<14x1xf32> to vector<14x14xf32>
    %95 = arith.subf %91, %94 : vector<14x14xf32>
    %96 = math.exp %95 : vector<14x14xf32>
    %cst_45 = arith.constant dense<0.000000e+00> : vector<14xf32>
    %97 = vector.multi_reduction <add>, %96, %cst_45 [1] : vector<14x14xf32> to vector<14xf32>
    %98 = vector.shape_cast %97 : vector<14xf32> to vector<14x1xf32>
    %99 = tpu.reciprocal %98 {approx = true} : vector<14x1xf32> -> vector<14x1xf32>
    %100 = vector.broadcast %99 : vector<14x1xf32> to vector<14x14xf32>
    %101 = arith.mulf %96, %100 : vector<14x14xf32>
    %102 = arith.truncf %101 : vector<14x14xf32> to vector<14x14xbf16>
    %cst_46 = arith.constant dense<0.000000e+00> : vector<14x32xf32>
    %103 = tpu.matmul %102, %87, %cst_46 {dimension_numbers = #tpu.dot_dimension_numbers<[1], [0], [0], [1], [0, 0, 1, 1], [], []>} : vector<14x14xbf16>, vector<14x32xbf16>, vector<14x32xf32> -> vector<14x32xf32>
    %104 = arith.truncf %103 : vector<14x32xf32> to vector<14x32xbf16>
    %c32 = arith.constant 32 : index
    %c0_47 = arith.constant 0 : index
    %105 = vector.load %arg12[%c32, %c0_47] : memref<128x128xbf16, #tpu.memory_space<vmem>>, vector<32x128xbf16>
    %cst_48 = arith.constant dense<0.000000e+00> : vector<14x128xf32>
    %106 = tpu.matmul %104, %105, %cst_48 {dimension_numbers = #tpu.dot_dimension_numbers<[1], [0], [0], [1], [0, 0, 1, 1], [], []>} : vector<14x32xbf16>, vector<32x128xbf16>, vector<14x128xf32> -> vector<14x128xf32>
    %107 = arith.addf %81, %106 : vector<14x128xf32>
    %108 = vector.extract_strided_slice %53 {offsets = [0, 64], sizes = [14, 32], strides = [1, 1]} : vector<14x128xf32> to vector<14x32xf32>
    %109 = arith.truncf %108 : vector<14x32xf32> to vector<14x32xbf16>
    %110 = vector.extract_strided_slice %54 {offsets = [0, 64], sizes = [14, 32], strides = [1, 1]} : vector<14x128xf32> to vector<14x32xf32>
    %111 = arith.truncf %110 : vector<14x32xf32> to vector<14x32xbf16>
    %112 = vector.extract_strided_slice %55 {offsets = [0, 64], sizes = [14, 32], strides = [1, 1]} : vector<14x128xf32> to vector<14x32xf32>
    %113 = arith.truncf %112 : vector<14x32xf32> to vector<14x32xbf16>
    %114 = tpu.transpose %111, [1, 0] : vector<14x32xbf16> -> vector<32x14xbf16>
    %cst_49 = arith.constant dense<0.000000e+00> : vector<14x14xf32>
    %115 = tpu.matmul %109, %114, %cst_49 {dimension_numbers = #tpu.dot_dimension_numbers<[1], [0], [0], [1], [0, 0, 1, 1], [], []>} : vector<14x32xbf16>, vector<32x14xbf16>, vector<14x14xf32> -> vector<14x14xf32>
    %cst_50 = arith.constant 0.176776692 : f32
    %116 = vector.broadcast %cst_50 : f32 to vector<14x14xf32>
    %117 = arith.mulf %115, %116 : vector<14x14xf32>
    %cst_51 = arith.constant dense<0xFF800000> : vector<14xf32>
    %118 = vector.multi_reduction <maximumf>, %117, %cst_51 [1] : vector<14x14xf32> to vector<14xf32>
    %119 = vector.shape_cast %118 : vector<14xf32> to vector<14x1xf32>
    %120 = vector.broadcast %119 : vector<14x1xf32> to vector<14x14xf32>
    %121 = arith.subf %117, %120 : vector<14x14xf32>
    %122 = math.exp %121 : vector<14x14xf32>
    %cst_52 = arith.constant dense<0.000000e+00> : vector<14xf32>
    %123 = vector.multi_reduction <add>, %122, %cst_52 [1] : vector<14x14xf32> to vector<14xf32>
    %124 = vector.shape_cast %123 : vector<14xf32> to vector<14x1xf32>
    %125 = tpu.reciprocal %124 {approx = true} : vector<14x1xf32> -> vector<14x1xf32>
    %126 = vector.broadcast %125 : vector<14x1xf32> to vector<14x14xf32>
    %127 = arith.mulf %122, %126 : vector<14x14xf32>
    %128 = arith.truncf %127 : vector<14x14xf32> to vector<14x14xbf16>
    %cst_53 = arith.constant dense<0.000000e+00> : vector<14x32xf32>
    %129 = tpu.matmul %128, %113, %cst_53 {dimension_numbers = #tpu.dot_dimension_numbers<[1], [0], [0], [1], [0, 0, 1, 1], [], []>} : vector<14x14xbf16>, vector<14x32xbf16>, vector<14x32xf32> -> vector<14x32xf32>
    %130 = arith.truncf %129 : vector<14x32xf32> to vector<14x32xbf16>
    %c64 = arith.constant 64 : index
    %c0_54 = arith.constant 0 : index
    %131 = vector.load %arg12[%c64, %c0_54] : memref<128x128xbf16, #tpu.memory_space<vmem>>, vector<32x128xbf16>
    %cst_55 = arith.constant dense<0.000000e+00> : vector<14x128xf32>
    %132 = tpu.matmul %130, %131, %cst_55 {dimension_numbers = #tpu.dot_dimension_numbers<[1], [0], [0], [1], [0, 0, 1, 1], [], []>} : vector<14x32xbf16>, vector<32x128xbf16>, vector<14x128xf32> -> vector<14x128xf32>
    %133 = arith.addf %107, %132 : vector<14x128xf32>
    %134 = vector.extract_strided_slice %53 {offsets = [0, 96], sizes = [14, 32], strides = [1, 1]} : vector<14x128xf32> to vector<14x32xf32>
    %135 = arith.truncf %134 : vector<14x32xf32> to vector<14x32xbf16>
    %136 = vector.extract_strided_slice %54 {offsets = [0, 96], sizes = [14, 32], strides = [1, 1]} : vector<14x128xf32> to vector<14x32xf32>
    %137 = arith.truncf %136 : vector<14x32xf32> to vector<14x32xbf16>
    %138 = vector.extract_strided_slice %55 {offsets = [0, 96], sizes = [14, 32], strides = [1, 1]} : vector<14x128xf32> to vector<14x32xf32>
    %139 = arith.truncf %138 : vector<14x32xf32> to vector<14x32xbf16>
    %140 = tpu.transpose %137, [1, 0] : vector<14x32xbf16> -> vector<32x14xbf16>
    %cst_56 = arith.constant dense<0.000000e+00> : vector<14x14xf32>
    %141 = tpu.matmul %135, %140, %cst_56 {dimension_numbers = #tpu.dot_dimension_numbers<[1], [0], [0], [1], [0, 0, 1, 1], [], []>} : vector<14x32xbf16>, vector<32x14xbf16>, vector<14x14xf32> -> vector<14x14xf32>
    %cst_57 = arith.constant 0.176776692 : f32
    %142 = vector.broadcast %cst_57 : f32 to vector<14x14xf32>
    %143 = arith.mulf %141, %142 : vector<14x14xf32>
    %cst_58 = arith.constant dense<0xFF800000> : vector<14xf32>
    %144 = vector.multi_reduction <maximumf>, %143, %cst_58 [1] : vector<14x14xf32> to vector<14xf32>
    %145 = vector.shape_cast %144 : vector<14xf32> to vector<14x1xf32>
    %146 = vector.broadcast %145 : vector<14x1xf32> to vector<14x14xf32>
    %147 = arith.subf %143, %146 : vector<14x14xf32>
    %148 = math.exp %147 : vector<14x14xf32>
    %cst_59 = arith.constant dense<0.000000e+00> : vector<14xf32>
    %149 = vector.multi_reduction <add>, %148, %cst_59 [1] : vector<14x14xf32> to vector<14xf32>
    %150 = vector.shape_cast %149 : vector<14xf32> to vector<14x1xf32>
    %151 = tpu.reciprocal %150 {approx = true} : vector<14x1xf32> -> vector<14x1xf32>
    %152 = vector.broadcast %151 : vector<14x1xf32> to vector<14x14xf32>
    %153 = arith.mulf %148, %152 : vector<14x14xf32>
    %154 = arith.truncf %153 : vector<14x14xf32> to vector<14x14xbf16>
    %cst_60 = arith.constant dense<0.000000e+00> : vector<14x32xf32>
    %155 = tpu.matmul %154, %139, %cst_60 {dimension_numbers = #tpu.dot_dimension_numbers<[1], [0], [0], [1], [0, 0, 1, 1], [], []>} : vector<14x14xbf16>, vector<14x32xbf16>, vector<14x32xf32> -> vector<14x32xf32>
    %156 = arith.truncf %155 : vector<14x32xf32> to vector<14x32xbf16>
    %c96 = arith.constant 96 : index
    %c0_61 = arith.constant 0 : index
    %157 = vector.load %arg12[%c96, %c0_61] : memref<128x128xbf16, #tpu.memory_space<vmem>>, vector<32x128xbf16>
    %cst_62 = arith.constant dense<0.000000e+00> : vector<14x128xf32>
    %158 = tpu.matmul %156, %157, %cst_62 {dimension_numbers = #tpu.dot_dimension_numbers<[1], [0], [0], [1], [0, 0, 1, 1], [], []>} : vector<14x32xbf16>, vector<32x128xbf16>, vector<14x128xf32> -> vector<14x128xf32>
    %159 = arith.addf %133, %158 : vector<14x128xf32>
    %c0_63 = arith.constant 0 : index
    %c0_64 = arith.constant 0 : index
    %160 = vector.load %arg14[%c0_63, %c0_64] : memref<1x128xf32, #tpu.memory_space<vmem>>, vector<1x128xf32>
    %c0_65 = arith.constant 0 : index
    %c0_66 = arith.constant 0 : index
    %161 = vector.load %arg15[%c0_65, %c0_66] : memref<1x128xf32, #tpu.memory_space<vmem>>, vector<1x128xf32>
    %cst_67 = arith.constant dense<0.000000e+00> : vector<14xf32>
    %162 = vector.multi_reduction <add>, %159, %cst_67 [1] : vector<14x128xf32> to vector<14xf32>
    %163 = vector.shape_cast %162 : vector<14xf32> to vector<14x1xf32>
    %cst_68 = arith.constant 1.280000e+02 : f32
    %164 = vector.broadcast %cst_68 : f32 to vector<14x1xf32>
    %165 = arith.divf %163, %164 : vector<14x1xf32>
    %166 = vector.broadcast %165 : vector<14x1xf32> to vector<14x128xf32>
    %167 = arith.subf %159, %166 : vector<14x128xf32>
    %168 = arith.mulf %167, %167 : vector<14x128xf32>
    %cst_69 = arith.constant dense<0.000000e+00> : vector<14xf32>
    %169 = vector.multi_reduction <add>, %168, %cst_69 [1] : vector<14x128xf32> to vector<14xf32>
    %170 = vector.shape_cast %169 : vector<14xf32> to vector<14x1xf32>
    %cst_70 = arith.constant 1.280000e+02 : f32
    %171 = vector.broadcast %cst_70 : f32 to vector<14x1xf32>
    %172 = arith.divf %170, %171 : vector<14x1xf32>
    %cst_71 = arith.constant 9.99999974E-6 : f32
    %173 = vector.broadcast %cst_71 : f32 to vector<14x1xf32>
    %174 = arith.addf %172, %173 : vector<14x1xf32>
    %175 = math.rsqrt %174 : vector<14x1xf32>
    %176 = vector.broadcast %175 : vector<14x1xf32> to vector<14x128xf32>
    %177 = arith.mulf %167, %176 : vector<14x128xf32>
    %178 = vector.broadcast %160 : vector<1x128xf32> to vector<14x128xf32>
    %179 = arith.mulf %177, %178 : vector<14x128xf32>
    %180 = vector.broadcast %161 : vector<1x128xf32> to vector<14x128xf32>
    %181 = arith.addf %179, %180 : vector<14x128xf32>
    %c0_72 = arith.constant 0 : index
    %c0_73 = arith.constant 0 : index
    %c0_74 = arith.constant 0 : index
    %182 = vector.load %arg16[%c0_72, %c0_73, %c0_74] : memref<1x14x128xf32, #tpu.memory_space<vmem>>, vector<1x14x128xf32>
    %183 = vector.shape_cast %182 : vector<1x14x128xf32> to vector<14x128xf32>
    %184 = vector.shape_cast %181 : vector<14x128xf32> to vector<1x14x128xf32>
    tpu.vector_store %arg16[%c0_72, %c0_73, %c0_74], %184 {strides = array<i32>} : memref<1x14x128xf32, #tpu.memory_space<vmem>>, vector<1x14x128xf32>,
    return
  }
  func.func @transform_0(%arg0: i32) -> (i32, i32, i32) {
    %c0_i32 = arith.constant 0 : i32
    %c0_i32_0 = arith.constant 0 : i32
    %c0_i32_1 = arith.constant 0 : i32
    return %arg0, %c0_i32, %c0_i32_0 : i32, i32, i32
  }
  func.func @transform_1(%arg0: i32) -> (i32, i32, i32) {
    %c0_i32 = arith.constant 0 : i32
    %c0_i32_0 = arith.constant 0 : i32
    %c0_i32_1 = arith.constant 0 : i32
    return %arg0, %c0_i32, %c0_i32_0 : i32, i32, i32
  }
  func.func @transform_2(%arg0: i32) -> (i32, i32) {
    %c0_i32 = arith.constant 0 : i32
    %c0_i32_0 = arith.constant 0 : i32
    %c0_i32_1 = arith.constant 0 : i32
    return %c0_i32, %c0_i32_0 : i32, i32
  }
  func.func @transform_3(%arg0: i32) -> (i32, i32) {
    %c0_i32 = arith.constant 0 : i32
    %c0_i32_0 = arith.constant 0 : i32
    %c0_i32_1 = arith.constant 0 : i32
    return %c0_i32, %c0_i32_0 : i32, i32
  }
  func.func @transform_4(%arg0: i32) -> (i32, i32) {
    %c0_i32 = arith.constant 0 : i32
    %c0_i32_0 = arith.constant 0 : i32
    %c0_i32_1 = arith.constant 0 : i32
    return %c0_i32, %c0_i32_0 : i32, i32
  }
  func.func @transform_5(%arg0: i32) -> (i32, i32) {
    %c0_i32 = arith.constant 0 : i32
    %c0_i32_0 = arith.constant 0 : i32
    %c0_i32_1 = arith.constant 0 : i32
    return %c0_i32, %c0_i32_0 : i32, i32
  }
  func.func @transform_6(%arg0: i32) -> (i32, i32) {
    %c0_i32 = arith.constant 0 : i32
    %c0_i32_0 = arith.constant 0 : i32
    %c0_i32_1 = arith.constant 0 : i32
    return %c0_i32, %c0_i32_0 : i32, i32
  }
  func.func @transform_7(%arg0: i32) -> (i32, i32) {
    %c0_i32 = arith.constant 0 : i32
    %c0_i32_0 = arith.constant 0 : i32
    %c0_i32_1 = arith.constant 0 : i32
    return %c0_i32, %c0_i32_0 : i32, i32
  }
  func.func @transform_8(%arg0: i32) -> (i32, i32) {
    %c0_i32 = arith.constant 0 : i32
    %c0_i32_0 = arith.constant 0 : i32
    %c0_i32_1 = arith.constant 0 : i32
    return %c0_i32, %c0_i32_0 : i32, i32
  }
  func.func @transform_9(%arg0: i32) -> (i32, i32) {
    %c0_i32 = arith.constant 0 : i32
    %c0_i32_0 = arith.constant 0 : i32
    %c0_i32_1 = arith.constant 0 : i32
    return %c0_i32, %c0_i32_0 : i32, i32
  }
  func.func @transform_10(%arg0: i32) -> (i32, i32) {
    %c0_i32 = arith.constant 0 : i32
    %c0_i32_0 = arith.constant 0 : i32
    %c0_i32_1 = arith.constant 0 : i32
    return %c0_i32, %c0_i32_0 : i32, i32
  }
  func.func @transform_11(%arg0: i32) -> (i32, i32) {
    %c0_i32 = arith.constant 0 : i32
    %c0_i32_0 = arith.constant 0 : i32
    %c0_i32_1 = arith.constant 0 : i32
    return %c0_i32, %c0_i32_0 : i32, i32
  }
  func.func @transform_12(%arg0: i32) -> (i32, i32) {
    %c0_i32 = arith.constant 0 : i32
    %c0_i32_0 = arith.constant 0 : i32
    %c0_i32_1 = arith.constant 0 : i32
    return %c0_i32, %c0_i32_0 : i32, i32
  }
  func.func @transform_13(%arg0: i32) -> (i32, i32) {
    %c0_i32 = arith.constant 0 : i32
    %c0_i32_0 = arith.constant 0 : i32
    %c0_i32_1 = arith.constant 0 : i32
    return %c0_i32, %c0_i32_0 : i32, i32
  }
  func.func @transform_14(%arg0: i32) -> (i32, i32) {
    %c0_i32 = arith.constant 0 : i32
    %c0_i32_0 = arith.constant 0 : i32
    %c0_i32_1 = arith.constant 0 : i32
    return %c0_i32, %c0_i32_0 : i32, i32
  }
  func.func @transform_15(%arg0: i32) -> (i32, i32, i32) {
    %c0_i32 = arith.constant 0 : i32
    %c0_i32_0 = arith.constant 0 : i32
    %c0_i32_1 = arith.constant 0 : i32
    return %arg0, %c0_i32, %c0_i32_0 : i32, i32, i32
  }
}

</mosaic_0001>

<bundles_post_ra>
// kernel: a_call__.2
= control target key start
LH: loop header
LB: loop body
LE: loop exit
PB: predicated region body
PF: predicated region fallthrough
CT: control target
= control target key end

     0   :  { %s3705_s18 = smov 0   ;;  %s3707_s19 = smov 0   ;;  %s4221_s0 = inlined_call_operand.vmem [shape: f32[2,2,14,128], index: 0, kind: input, shape index: {}]   ;;  %s4222_s1 = inlined_call_operand.vmem [shape: f32[2,2,64,128], index: 1, kind: input, shape index: {}]   ;;  %s4223_s2 = inlined_call_operand.vmem [shape: bf16[2,128,128], index: 2, kind: input, shape index: {}]   ;;  %s4224_s3 = inlined_call_operand.vmem [shape: f32[2,1,128], index: 3, kind: input, shape index: {}]   ;;  %s4225_s4 = inlined_call_operand.vmem [shape: bf16[2,128,256], index: 4, kind: input, shape index: {}]   ;;  %s4226_s5 = inlined_call_operand.vmem [shape: f32[2,1,256], index: 5, kind: input, shape index: {}]   ;;  %s4227_s6 = inlined_call_operand.vmem [shape: bf16[2,128,128], index: 6, kind: input, shape index: {}]   ;;  %s4228_s7 = inlined_call_operand.vmem [shape: f32[2,1,128], index: 7, kind: input, shape index: {}]   ;;  %s4229_s8 = inlined_call_operand.vmem [shape: f32[2,1,128], index: 8, kind: input, shape index: {}]   ;;  %s4230_s9 = inlined_call_operand.vmem [shape: f32[2,1,128], index: 9, kind: input, shape index: {}]   ;;  %s4231_s10 = inlined_call_operand.vmem [shape: bf16[2,128,512], index: 10, kind: input, shape index: {}]   ;;  %s4232_s11 = inlined_call_operand.vmem [shape: f32[2,1,512], index: 11, kind: input, shape index: {}]   ;;  %s4233_s12 = inlined_call_operand.vmem [shape: bf16[2,512,128], index: 12, kind: input, shape index: {}]   ;;  %s4234_s13 = inlined_call_operand.vmem [shape: f32[2,1,128], index: 13, kind: input, shape index: {}]   ;;  %s4235_s14 = inlined_call_operand.vmem [shape: f32[2,2,14,128], index: 14, kind: output, shape index: {0}]   ;;  %s4236_s15 = inlined_call_operand.vmem [shape: f32[2,2,14,64], index: 15, kind: output, shape index: {1}]  }
   0x1   :  { %4237 = sst [smem:[#allocation4_spill]] %s4223_s2  ;;  %s3709_s20 = smov 0  }
   0x2   :  { %4238 = sst [smem:[#allocation5_spill]] %s4225_s4  ;;  %s3711_s21 = smov 0  }
   0x3   :  { %s3713_s22 = smov 0  }
   0x4 LB: > { %s35_s23 = sadd.s32 1, %s3609_s20  ;;  %s38_s24 = sadd.s32 1, %s3613_s21  ;;  %s3617_s22 = sphi %s3713_s22, %s26_s22   ;;  %s3613_s21 = sphi %s3711_s21, %s4250_s21   ;;  %s3609_s20 = sphi %s3709_s20, %s4249_s20   ;;  %s3605_s19 = sphi %s3707_s19, %s4248_s19   ;;  %s3601_s18 = sphi %s3705_s18, %s4247_s18  }
   0x5   : > { %p36_p0 = scmp.ge.s32.totalorder %s35_s23, 2  ;;  %p2967_p1 = scmp.ge.s32.totalorder %s3617_s22, 1 }
   0x6   : > { %p586_p2 = scmp.lt.s32.totalorder %s3617_s22, 5 }
   0x7   : > { %s4252_s23 = smov (%p36_p0, %s35_s23), 0  ;;  %s4254_s24 = smov (!%p36_p0, %s38_s24), %s3613_s21 }
   0x8   : > { %4239 = sst [smem:[#allocation2_spill]] %s4252_s23  ;;  %p587_p3 = pnand %p2967_p1, %p586_p2 }
   0x9   : > { %p40_p4 = scmp.ge.s32.totalorder %s4254_s24, 2  ;;  %p708_p5 = scmp.lt.s32.totalorder (!%p587_p3), %s3605_s19, 1  ;;  %v3619_v0 = vmov (!%p587_p3), 0.0   ;;  %v3620_v1 = vmov (!%p587_p3), 0   ;;  %vm3621_vm0 = vmmov (!%p587_p3), 0   ;;  %v938_v41 = vlaneseq (!%p587_p3) }
   0xa   : > { %590 = sbr.rel (%p587_p3) target bundleno = 4158 (0x103e), region = 76  ;;  %3217 = vmatprep.subr.bf16.mxu0 (!%p587_p3), %v3619_v0  ;;  %1060 = vmatprep.mubr.bf16.mxu1 (!%p587_p3), %v3620_v1  ;;  %s4241_s4 = sld [smem:[#allocation5_spill]] (!%p587_p3)  ;;  %vm1119_vm1 = vcmask (!%p587_p3), 261120   ;;  %vm1178_vm2 = vcmask (!%p587_p3), 523264   ;;  %vm1182_vm3 = vcmask (!%p587_p3), 521216   ;;  %vm1965_vm4 = vcmask (!%p587_p3), 1045504  }
   0xb   : > { %s4256_s24 = smov (%p40_p4, %s4254_s24), 0  ;;  %3233 = vmatprep.mubr.msk.bf16.mxu0 (!%p587_p3), %vm3621_vm0, %v3619_v0  ;;  %p710_p6 = scmp.lt.s32.totalorder (!%p587_p3), %s3601_s18, 1  ;;  %v3855_v42 = vshrl.u32 (!%p587_p3), %v938_v41, 7 }
   0xc   : > { %4240 = sst [smem:[#allocation3_spill]] %s4256_s24  ;;  %s4242_s2 = sld [smem:[#allocation4_spill]] (!%p587_p3) }
   0xd   : > { %v940_v43 = vsub.s32 (!%p587_p3), 0, %v3855_v42  ;;  %v944_v45 = vsub.s32 (!%p587_p3), 1, %v3855_v42  ;;  %s3624_s30 = smov (!%p587_p3), 32  }
  0x11   : > { %s4258_s19 = smov (!%p708_p5, %s3605_s19), 1  ;;  %s4260_s18 = smov (!%p710_p6, %s3601_s18), 1 }
  0x12   : > { %s3108_s25 = sshll.u32 %s4258_s19, 7  ;;  %s3107_s29 = sshll.u32 %s4258_s19, 6 }
  0x13   : > { %s3747_s28 = scalar_lea.vmem %s4241_s4, %s3108_s25  ;;  %s3766_s17 = scalar_lea.vmem %s4242_s2, %s3107_s29 }
  0x14   : > { %v3423_v2 = vld [vmem:[%s3747_s28 + $0x4] ss:$8 sps:$4 sm:$0xff]   ;;  %v3425_v3 = vld [vmem:[%s3747_s28] ss:$8 sps:$4 sm:$0xff]   ;;  %v3426_v4 = vld [vmem:[%s3747_s28 + $0x14] ss:$8 sps:$4 sm:$0xff]   ;;  %s3787_s24 = scalar_lea.vmem %s4227_s6, %s3107_s29  ;;  %s733_s4 = scalar_lea.vmem %s4224_s3, %s4258_s19 }
  0x15   : > { %1028 = vmatprep.subr.bf16.mxu1 %v3423_v2  ;;  %v3428_v5 = vld [vmem:[%s3747_s28 + $0x10] ss:$8 sps:$4 sm:$0xff]   ;;  %v3429_v6 = vld [vmem:[%s3747_s28 + $0x24] ss:$8 sps:$4 sm:$0xff]   ;;  %v3431_v7 = vld [vmem:[%s3747_s28 + $0x20] ss:$8 sps:$4 sm:$0xff]  }
  0x16   : > { %1029 = vmatpush1.bf16.msra.mxu1 %v3425_v3  ;;  %v3432_v8 = vld [vmem:[%s3747_s28 + $0x34] ss:$8 sps:$4 sm:$0xff]   ;;  %v3434_v9 = vld [vmem:[%s3747_s28 + $0x30] ss:$8 sps:$4 sm:$0xff]   ;;  %v3447_v10 = vld [vmem:[%s3766_s17] sm:$0xff]   ;;  %s2971_s25 = sshll.u32 %s4260_s18, 3 }
  0x17   : > { %1030 = vmatprep.subr.bf16.mxu1 %v3426_v4  ;;  %v3435_v11 = vld [vmem:[%s3747_s28 + $0x44] ss:$8 sps:$4 sm:$0xff]   ;;  %3218 = vmatpush3.bf16.msra.mxu0 %v3447_v10  ;;  %s2972_s26 = sshll.u32 %s4258_s19, 4  ;;  %v3437_v13 = vld [vmem:[%s3747_s28 + $0x40] ss:$8 sps:$4 sm:$0xff]   ;;  %v3449_v15 = vld [vmem:[%s3766_s17 + $0x10] sm:$0xff]  }
  0x18   : > { %v3448_v12 = vld [vmem:[%s3766_s17 + $0x8] sm:$0xff]   ;;  %3219 = vmatprep.subr.bf16.mxu0 %v3619_v0  ;;  %v3438_v14 = vld [vmem:[%s3747_s28 + $0x54] ss:$8 sps:$4 sm:$0xff]   ;;  %s723_s27 = sadd.s32 %s2972_s26, %s2971_s25  ;;  %v3440_v16 = vld [vmem:[%s3747_s28 + $0x50] ss:$8 sps:$4 sm:$0xff]   ;;  %s2968_s25 = sshll.u32 %s4260_s18, 1 }
  0x19   : > { %s2973_s16 = sshll.u32 %s723_s27, 3  ;;  %v3441_v17 = vld [vmem:[%s3747_s28 + $0x64] ss:$8 sps:$4 sm:$0xff]   ;;  %v3443_v18 = vld [vmem:[%s3747_s28 + $0x60] ss:$8 sps:$4 sm:$0xff]   ;;  %v3450_v19 = vld [vmem:[%s3766_s17 + $0x18] sm:$0xff]  }
  0x1a   : > { %1031 = vmatpush1.bf16.msra.mxu1 %v3428_v5  ;;  %s2969_s26 = sshll.u32 %s4258_s19, 2  ;;  %v3444_v20 = vld [vmem:[%s3747_s28 + $0x74] ss:$8 sps:$4 sm:$0xff]   ;;  %s3797_s27 = scalar_lea.vmem %s4222_s1, %s2973_s16  ;;  %v3451_v21 = vld [vmem:[%s3766_s17 + $0x20] sm:$0xff]   ;;  %v3446_v22 = vld [vmem:[%s3747_s28 + $0x70] ss:$8 sps:$4 sm:$0xff]  }
  0x1b   : > { %1032 = vmatprep.subr.bf16.mxu1 %v3429_v6  ;;  %3220 = vmatpush3.bf16.msra.mxu0 %v3448_v12  ;;  %v795_v23 = vld [vmem:[%s3797_s27] sm:$0xff]  ;;  %v796_v24 = vld [vmem:[%s3797_s27 + $0x8] sm:$0xff]  ;;  %s4243_s2 = sshll.u32 %s4258_s19, 8  ;;  %s714_s29 = sadd.s32 %s2969_s26, %s2968_s25  ;;  %v3453_v27 = vld [vmem:[%s3766_s17 + $0x30] sm:$0xff]  }
  0x1c   : > { %3221 = vmatprep.subr.bf16.mxu0 %v3619_v0  ;;  %s3809_s23 = scalar_lea.vmem %s4231_s10, %s4243_s2  ;;  %v3452_v25 = vld [vmem:[%s3766_s17 + $0x28] sm:$0xff]   ;;  %s3815_s28 = sshll.u32 %s714_s29, 3  ;;  %v916_v26 = vpack.c.bf16 %v796_v24, %v795_v23  ;;  %v797_v28 = vld [vmem:[%s3797_s27 + $0x10] sm:$0xff]  ;;  %v798_v29 = vld [vmem:[%s3797_s27 + $0x18] sm:$0xff] }
  0x1d   : > { %s716_s2 = scalar_lea.vmem %s4221_s0, %s3815_s28  ;;  %v3454_v30 = vld [vmem:[%s3766_s17 + $0x38] sm:$0xff]   ;;  %s4244_s25 = sshll.u32 %s4258_s19, 8  ;;  %v917_v33 = vpack.c.bf16 %v798_v29, %v797_v28  ;;  %v799_v35 = vld [vmem:[%s3797_s27 + $0x20] sm:$0xff]  ;;  %v800_v36 = vld [vmem:[%s3797_s27 + $0x28] sm:$0xff] }
  0x1e   : > { %1033 = vmatpush1.bf16.msra.mxu1 %v3431_v7  ;;  %v3829_v31 = vld [vmem:[%s716_s2] sm:$0xff]  ;;  %v3831_v32 = vld [vmem:[%s716_s2 + $0x8] sm:$0x3f]  ;;  %s3838_s29 = scalar_lea.vmem %s4233_s12, %s4244_s25  ;;  %v918_v37 = vpack.c.bf16 %v800_v36, %v799_v35  ;;  %v801_v38 = vld [vmem:[%s3797_s27 + $0x30] sm:$0xff]  ;;  %s2978_s17 = sshll.u32 %s4258_s19, 1 }
  0x1f   : > { %1034 = vmatprep.subr.bf16.mxu1 %v3432_v8  ;;  %3222 = vmatpush3.bf16.msra.mxu0 %v3449_v15  ;;  %v803_v34 = vpack.c.bf16 %v3831_v32, %v3829_v31  ;;  %v802_v39 = vld [vmem:[%s3797_s27 + $0x38] sm:$0xff]  ;;  %s742_s2 = scalar_lea.vmem %s4226_s5, %s2978_s17  ;;  %v2992_v60 = vld [vmem:[%s733_s4] ss:$0 sm:$0xff]  ;;  %s3622_s18 = smov 96  }
  0x20   : > { %3223 = vmatprep.subr.bf16.mxu0 %v3619_v0  ;;  %v919_v40 = vpack.c.bf16 %v802_v39, %v801_v38  ;;  %v936_v44 = vld [vmem:[%s742_s2] sm:$0x3]  ;;  %s3623_s17 = smov 64   ;;  %s791_s27 = scalar_lea.vmem %s4236_s15, %s3815_s28 }
  0x21   : > { %v941_v46 = vrot.slane %v936_v44, %v940_v43  ;;  %v945_v48 = vrot.slane %v936_v44, %v944_v45  ;;  %s756_s2 = scalar_lea.vmem %s4230_s9, %s4258_s19  ;;  %s765_s4 = scalar_lea.vmem %s4232_s11, %s2969_s26 }
  0x22   : > { %1035 = vmatpush1.bf16.msra.mxu1 %v3434_v9 }
  0x23   : > { %1036 = vmatprep.subr.bf16.mxu1 %v3435_v11  ;;  %3224 = vmatpush3.bf16.msra.mxu0 %v3450_v19 }
  0x24   : > { %3225 = vmatprep.subr.bf16.mxu0 %v3619_v0 }
  0x26   : > { %1037 = vmatpush1.bf16.msra.mxu1 %v3437_v13 }
  0x27   : > { %1038 = vmatprep.subr.bf16.mxu1 %v3438_v14  ;;  %3226 = vmatpush3.bf16.msra.mxu0 %v3451_v21 }
  0x28   : > { %3227 = vmatprep.subr.bf16.mxu0 %v3619_v0 }
  0x2a   : > { %1039 = vmatpush1.bf16.msra.mxu1 %v3440_v16 }
  0x2b   : > { %1040 = vmatprep.subr.bf16.mxu1 %v3441_v17  ;;  %3228 = vmatpush3.bf16.msra.mxu0 %v3452_v25 }
  0x2c   : > { %3229 = vmatprep.subr.bf16.mxu0 %v3619_v0 }
  0x2e   : > { %1041 = vmatpush1.bf16.msra.mxu1 %v3443_v18 }
  0x2f   : > { %1042 = vmatprep.subr.bf16.mxu1 %v3444_v20  ;;  %3230 = vmatpush3.bf16.msra.mxu0 %v3453_v27 }
  0x30   : > { %3231 = vmatprep.subr.bf16.mxu0 %v3619_v0 }
  0x32   : > { %1043 = vmatpush1.bf16.msra.mxu1 %v3446_v22 }
  0x33   : > { %3249 = vmatprep.subr.bf16.mxu1 %v3619_v0  ;;  %3232 = vmatpush3.bf16.msra.mxu0 %v3454_v30 }
  0x34   : > { %3237 = vmatprep.subr.bf16.mxu0 %v3619_v0 }
  0x35   : > { %1061 = vmatmul.mubr.bf16.vlgmr.msra.gmra.mrb[0].mxu1 %v916_v26 }
  0x36   : > { %1070 = vmatprep.mubr.bf16.mxu1 %v3620_v1  ;;  %3234 = vmatmul.mubr.bf16.vlgmr.msra.gmra.mrb[0].mxu0 %v803_v34 }
  0x37   : > { %3245 = vmatprep.mubr.msk.bf16.mxu0 %vm3621_vm0, %v3619_v0 }
  0x3d   : > { %1071 = vmatmul.mubr.bf16.gmra.mrb[4].mxu1 %v917_v33 }
  0x3e   : > { %1080 = vmatprep.mubr.bf16.mxu1 %v3620_v1 }
  0x45   : > { %1081 = vmatmul.mubr.bf16.gmra.mrb[8].mxu1 %v918_v37 }
  0x46   : > { %1090 = vmatprep.mubr.bf16.mxu1 %v3620_v1 }
  0x4d   : > { %1091 = vmatmul.mubr.bf16.gmra.mrb[12].mxu1 %v919_v40 }
  0x4e   : > { %3257 = vmatprep.mubr.msk.bf16.mxu1 %vm3621_vm0, %v3619_v0 }
 0x108   : > { %v1062_v47 = vpop.f32.mrb[0].mxu1 }
 0x109   : > { %v1064_v49 = vpop.f32.mrb[1].mxu1  ;;  %v1063_v51 = vadd.f32 %v1062_v47, %v941_v46  ;;  %v909_v63 = vpop.f32.mrb[0].mxu0 }
 0x10a   : > { %v1066_v50 = vpop.f32.mrb[2].mxu1  ;;  %v1065_v54 = vadd.f32 %v1064_v49, %v945_v48  ;;  %v910_v5 = vadd.f32 %v2992_v60, %v909_v63  ;;  %v3235_v6 = vpop.f32.mrb[1].mxu0 }
 0x10b   : > { %v1067_v52 = vadd.f32 %v1066_v50, %v941_v46  ;;  %v1068_v53 = vpop.f32.mrb[3].mxu1  ;;  %v912_v9 = vpop.f32.mrb[2].mxu0 }
 0x10c   : > { %v1069_v55 = vadd.f32 %v1068_v53, %v945_v48  ;;  %v913_v11 = vadd.f32 %v2992_v60, %v912_v9  ;;  %v3236_v12 = vpop.f32.mrb[3].mxu0  ;;  %v3456_v9 = vld [vmem:[%s3787_s24 + $0x8] sm:$0xff]  }
 0x10d   : > { %v3866_v56 = vpack.c.bf16 %v1067_v52, %v1063_v51 }
 0x10e   : > { %v3872_v57 = vpack.c.bf16 %v1069_v55, %v1065_v54  ;;  %v3885_v15 = vpack.c.bf16 %v913_v11, %v910_v5 }
 0x10f   : > { %v1124_v58 = vsel %vm1119_vm1, %v3866_v56, 0 }
 0x110   : > { %v1072_v59 = vpop.f32.mrb[4].mxu1  ;;  %3238 = vmatpush3.bf16.xpose.msra.mxu0 %v1124_v58  ;;  %3250 = vmatpush3.bf16.msra.mxu1 %v3872_v57 }
 0x111   : > { %v1074_v61 = vpop.f32.mrb[5].mxu1  ;;  %3239 = vmatprep.subr.bf16.mxu0 %v3619_v0  ;;  %3251 = vmatprep.subr.bf16.mxu1 %v3619_v0  ;;  %v1073_v2 = vadd.f32 %v1072_v59, %v941_v46 }
 0x112   : > { %v1076_v62 = vpop.f32.mrb[6].mxu1  ;;  %v1075_v7 = vadd.f32 %v1074_v61, %v945_v48 }
 0x113   : > { %v1077_v3 = vadd.f32 %v1076_v62, %v941_v46  ;;  %v1078_v4 = vpop.f32.mrb[7].mxu1 }
 0x114   : > { %v1079_v8 = vadd.f32 %v1078_v4, %v945_v48 }
 0x115   : > { %v3879_v10 = vpack.c.bf16 %v1077_v3, %v1073_v2 }
 0x116   : > { %v3881_v13 = vpack.c.bf16 %v1079_v8, %v1075_v7  ;;  %v3455_v7 = vld [vmem:[%s3787_s24] sm:$0xff]  }
 0x117   : > { %v1127_v14 = vsel %vm1119_vm1, %v3879_v10, 0 }
 0x118   : > { %v1082_v16 = vpop.f32.mrb[8].mxu1  ;;  %3240 = vmatpush3.bf16.xpose.msra.mxu0 %v1127_v14  ;;  %3252 = vmatpush3.bf16.msra.mxu1 %v3881_v13 }
 0x119   : > { %v1084_v17 = vpop.f32.mrb[9].mxu1  ;;  %3241 = vmatprep.subr.bf16.mxu0 %v3619_v0  ;;  %3253 = vmatprep.subr.bf16.mxu1 %v3619_v0  ;;  %v1083_v19 = vadd.f32 %v1082_v16, %v941_v46 }
 0x11a   : > { %v1086_v18 = vpop.f32.mrb[10].mxu1  ;;  %v1085_v22 = vadd.f32 %v1084_v17, %v945_v48 }
 0x11b   : > { %v1087_v20 = vadd.f32 %v1086_v18, %v941_v46  ;;  %v1088_v21 = vpop.f32.mrb[11].mxu1 }
 0x11c   : > { %v1089_v23 = vadd.f32 %v1088_v21, %v945_v48 }
 0x11d   : > { %v3890_v24 = vpack.c.bf16 %v1087_v20, %v1083_v19 }
 0x11e   : > { %v3892_v25 = vpack.c.bf16 %v1089_v23, %v1085_v22 }
 0x11f   : > { %v1130_v26 = vsel %vm1119_vm1, %v3890_v24, 0 }
 0x120   : > { %v1092_v27 = vpop.f32.mrb[12].mxu1  ;;  %3242 = vmatpush3.bf16.xpose.msra.mxu0 %v1130_v26  ;;  %3254 = vmatpush3.bf16.msra.mxu1 %v3892_v25 }
 0x121   : > { %v1094_v28 = vpop.f32.mrb[13].mxu1  ;;  %3243 = vmatprep.subr.bf16.mxu0 %v3619_v0  ;;  %3255 = vmatprep.subr.bf16.mxu1 %v3619_v0  ;;  %v1093_v30 = vadd.f32 %v1092_v27, %v941_v46 }
 0x122   : > { %v1096_v29 = vpop.f32.mrb[14].mxu1  ;;  %v1095_v35 = vadd.f32 %v1094_v28, %v945_v48 }
 0x123   : > { %v1097_v33 = vadd.f32 %v1096_v29, %v941_v46  ;;  %v1098_v34 = vpop.f32.mrb[15].mxu1 }
 0x124   : > { %v1099_v36 = vadd.f32 %v1098_v34, %v945_v48 }
 0x125   : > { %v3899_v37 = vpack.c.bf16 %v1097_v33, %v1093_v30 }
 0x126   : > { %v3901_v38 = vpack.c.bf16 %v1099_v36, %v1095_v35 }
 0x127   : > { %v1133_v39 = vsel %vm1119_vm1, %v3899_v37, 0 }
 0x128   : > { %3244 = vmatpush3.bf16.xpose.msra.mxu0 %v1133_v39  ;;  %3256 = vmatpush3.bf16.msra.mxu1 %v3901_v38 }
 0x129   : > { %3261 = vmatprep.subr.bf16.mxu1 %v3619_v0  ;;  %3281 = vmatprep.subr.bf16.mxu0 %v3619_v0 }
 0x12f   : > { %3246 = vmatmul.mubr.msk.bf16.vlgmr.msra.gmra.mrb[4].mxu0 %vm1119_vm1, %v3885_v15 }
 0x130   : > { %3289 = vmatprep.mubr.msk.bf16.mxu0 %vm3621_vm0, %v3619_v0 }
 0x202   : > { %v1169_v40 = vpop.f32.mrb[4].mxu0 }
 0x203   : > { %v1176_v41 = vmul.f32 0.17677669, %v1169_v40  ;;  %v3247_v44 = vpop.f32.mrb[5].mxu0 }
 0x204   : > { %v1172_v46 = vpop.f32.mrb[6].mxu0 }
 0x205   : > { %v1177_v47 = vmul.f32 0.17677669, %v1172_v46  ;;  %v3248_v48 = vpop.f32.mrb[7].mxu0  ;;  %v1179_v49 = vsel %vm1178_vm2, %v1176_v41, -inf }
 0x206   : > { %1180 = vmax.xlane.f32.xlu0 %v1179_v49 }
 0x207   : > { %v1183_v50 = vsel %vm1182_vm3, %v1177_v47, -inf }
 0x20a   : > { %1184 = vmax.xlane.f32.xlu0 %v1183_v50 }
 0x220   : > { %1319 = vrot.lane.b32.xlu0 %v3866_v56, %s3622_s18 }
 0x224   : > { %1313 = vrot.lane.b32.xlu0 %v3885_v15, %s3622_s18 }
 0x293   : > { %v1181_v51 = vpop.xlane.xlu0 %1180 }
 0x294   : > { %v1186_v52 = vsub.f32 %v1176_v41, %v1181_v51 }
 0x296   : > { %v1188_v53 = vmul.f32 1.442695, %v1186_v52 }
 0x297   : > { %v1185_v54 = vpop.xlane.xlu0 %1184 }
 0x298   : > { %3543 = vpow2.f32 %v1188_v53  ;;  %v1187_v55 = vsub.f32 %v1177_v47, %v1185_v54 }
 0x29a   : > { %v1190_v58 = vmul.f32 1.442695, %v1187_v55 }
 0x29b   : > { %v1320_v14 = vpop.permute.xlu0 %1319 }
 0x29c   : > { %3545 = vpow2.f32 %v1190_v58  ;;  %v1331_v19 = vsel %vm1119_vm1, %v1320_v14, 0  ;;  %v3458_v14 = vld [vmem:[%s3787_s24 + $0x18] sm:$0xff]  }
 0x29f   : > { %v1314_v28 = vpop.permute.xlu0 %1313 }
 0x2a2   : > { %v3544_v59 = vpop.eup %3543 }
 0x2a3   : > { %v1192_v60 = vsel %vm1178_vm2, %v3544_v59, 0.0 }
 0x2a4   : > { %1193 = vadd.xlane.f32.xlu1 %v1192_v60 }
 0x2a6   : > { %v3546_v61 = vpop.eup %3545 }
 0x2a7   : > { %v1195_v62 = vsel %vm1182_vm3, %v3546_v61, 0.0 }
 0x2a8   : > { %1196 = vadd.xlane.f32.xlu1 %v1195_v62 }
 0x2b9   : > { %1321 = vrot.lane.b32.xlu1 %v3879_v10, %s3622_s18 }
 0x2bd   : > { %1323 = vrot.lane.b32.xlu1 %v3890_v24, %s3622_s18 }
 0x2c1   : > { %1325 = vrot.lane.b32.xlu1 %v3899_v37, %s3622_s18 }
 0x331   : > { %v1194_v63 = vpop.xlane.xlu1 %1193 }
 0x332   : > { %3547 = vrcp.f32 %v1194_v63 }
 0x335   : > { %v1197_v2 = vpop.xlane.xlu1 %1196 }
 0x336   : > { %3549 = vrcp.f32 %v1197_v2 }
 0x339   : > { %v1322_v20 = vpop.permute.xlu1 %1321 }
 0x33a   : > { %v1334_v21 = vsel %vm1119_vm1, %v1322_v20, 0 }
 0x33c   : > { %v3548_v3 = vpop.eup %3547 }
 0x33d   : > { %v3926_v5 = vmul.f32 %v3548_v3, %v3544_v59  ;;  %v1324_v22 = vpop.permute.xlu1 %1323 }
 0x33e   : > { %v1337_v23 = vsel %vm1119_vm1, %v1324_v22, 0 }
 0x340   : > { %v3550_v4 = vpop.eup %3549 }
 0x341   : > { %v3928_v6 = vmul.f32 %v3550_v4, %v3546_v61  ;;  %v1326_v26 = vpop.permute.xlu1 %1325 }
 0x342   : > { %v1340_v27 = vsel %vm1119_vm1, %v1326_v26, 0 }
 0x343   : > { %v1202_v8 = vpack.c.bf16 %v3928_v6, %v3926_v5 }
 0x345   : > { %3258 = vmatmul.mubr.msk.bf16.vlgmr.msra.gmra.mrb[16].mxu1 %vm1178_vm2, %v1202_v8 }
 0x346   : > { %3262 = vmatpush3.bf16.msra.mxu1 %v3455_v7  ;;  %3265 = vmatprep.mubr.msk.bf16.mxu1 %vm3621_vm0, %v3619_v0 }
 0x347   : > { %3263 = vmatprep.subr.bf16.mxu1 %v3619_v0 }
 0x34a   : > { %3264 = vmatpush3.bf16.msra.mxu1 %v3456_v9 }
 0x34b   : > { %3269 = vmatprep.subr.bf16.mxu1 %v3619_v0 }
 0x418   : > { %v1240_v11 = vpop.f32.mrb[16].mxu1 }
 0x419   : > { %v3259_v12 = vpop.f32.mrb[17].mxu1 }
 0x41a   : > { %v1243_v16 = vpop.f32.mrb[18].mxu1 }
 0x41b   : > { %v1247_v17 = vpack.c.bf16 %v1243_v16, %v1240_v11  ;;  %v3260_v18 = vpop.f32.mrb[19].mxu1  ;;  %v3457_v11 = vld [vmem:[%s3787_s24 + $0x10] sm:$0xff]  }
 0x41d   : > { %3266 = vmatmul.mubr.msk.bf16.vlgmr.msra.gmra.mrb[20].mxu1 %vm1119_vm1, %v1247_v17 }
 0x41e   : > { %3270 = vmatpush3.bf16.xpose.msra.mxu1 %v1331_v19  ;;  %3277 = vmatprep.mubr.msk.bf16.mxu1 %vm3621_vm0, %v3619_v0 }
 0x41f   : > { %3271 = vmatprep.subr.bf16.mxu1 %v3619_v0 }
 0x426   : > { %3272 = vmatpush3.bf16.xpose.msra.mxu1 %v1334_v21 }
 0x427   : > { %3273 = vmatprep.subr.bf16.mxu1 %v3619_v0 }
 0x42e   : > { %3274 = vmatpush3.bf16.xpose.msra.mxu1 %v1337_v23 }
 0x42f   : > { %3275 = vmatprep.subr.bf16.mxu1 %v3619_v0 }
 0x436   : > { %3276 = vmatpush3.bf16.xpose.msra.mxu1 %v1340_v27 }
 0x437   : > { %3313 = vmatprep.subr.bf16.mxu1 %v3619_v0 }
 0x43d   : > { %3278 = vmatmul.mubr.msk.bf16.vlgmr.msra.gmra.mrb[24].mxu1 %vm1119_vm1, %v1314_v28 }
 0x43e   : > { %3321 = vmatprep.mubr.msk.bf16.mxu1 %vm3621_vm0, %v3619_v0 }
 0x4f0   : > { %v3953_v29 = vpop.f32.mrb[20].mxu1 }
 0x4f1   : > { %v3267_v30 = vpop.f32.mrb[21].mxu1 }
 0x4f2   : > { %v3955_v33 = vpop.f32.mrb[22].mxu1 }
 0x4f3   : > { %v3268_v34 = vpop.f32.mrb[23].mxu1 }
 0x510   : > { %v1376_v35 = vpop.f32.mrb[24].mxu1 }
 0x511   : > { %v1383_v36 = vmul.f32 0.17677669, %v1376_v35  ;;  %v3279_v39 = vpop.f32.mrb[25].mxu1 }
 0x512   : > { %v1379_v40 = vpop.f32.mrb[26].mxu1 }
 0x513   : > { %v1384_v41 = vmul.f32 0.17677669, %v1379_v40  ;;  %v3280_v44 = vpop.f32.mrb[27].mxu1  ;;  %v1385_v46 = vsel %vm1178_vm2, %v1383_v36, -inf }
 0x514   : > { %1386 = vmax.xlane.f32.xlu1 %v1385_v46 }
 0x515   : > { %v1388_v47 = vsel %vm1182_vm3, %v1384_v41, -inf }
 0x516   : > { %1389 = vmax.xlane.f32.xlu0 %v1388_v47 }
 0x525   : > { %1412 = vrot.lane.b32.xlu1 %v3872_v57, %s3622_s18 }
 0x529   : > { %1416 = vrot.lane.b32.xlu1 %v3892_v25, %s3622_s18 }
 0x52d   : > { %1418 = vrot.lane.b32.xlu1 %v3901_v38, %s3622_s18 }
 0x531   : > { %1535 = vrot.lane.b32.xlu1 %v3866_v56, %s3623_s17 }
 0x535   : > { %1539 = vrot.lane.b32.xlu1 %v3890_v24, %s3623_s17 }
 0x539   : > { %1533 = vrot.lane.b32.xlu1 %v3885_v15, %s3623_s17 }
 0x5a1   : > { %v1387_v48 = vpop.xlane.xlu1 %1386 }
 0x5a2   : > { %v1391_v49 = vsub.f32 %v1383_v36, %v1387_v48 }
 0x5a3   : > { %v1390_v50 = vpop.xlane.xlu0 %1389 }
 0x5a4   : > { %v1393_v51 = vmul.f32 1.442695, %v1391_v49  ;;  %v1392_v52 = vsub.f32 %v1384_v41, %v1390_v50 }
 0x5a5   : > { %v1413_v53 = vpop.permute.xlu1 %1412 }
 0x5a6   : > { %3551 = vpow2.f32 %v1393_v51  ;;  %v1395_v54 = vmul.f32 1.442695, %v1392_v52  ;;  %3282 = vmatpush3.bf16.msra.mxu0 %v1413_v53 }
 0x5a7   : > { %3283 = vmatprep.subr.bf16.mxu0 %v3619_v0 }
 0x5a8   : > { %3553 = vpow2.f32 %v1395_v54 }
 0x5a9   : > { %v1417_v2 = vpop.permute.xlu1 %1416 }
 0x5ad   : > { %v1419_v7 = vpop.permute.xlu1 %1418 }
 0x5b0   : > { %v3552_v55 = vpop.eup %3551 }
 0x5b1   : > { %v1397_v58 = vsel %vm1178_vm2, %v3552_v55, 0.0  ;;  %v1536_v18 = vpop.permute.xlu1 %1535 }
 0x5b2   : > { %v3554_v59 = vpop.eup %3553  ;;  %1398 = vadd.xlane.f32.xlu0 %v1397_v58  ;;  %v1547_v22 = vsel %vm1119_vm1, %v1536_v18, 0 }
 0x5b3   : > { %v1400_v60 = vsel %vm1182_vm3, %v3554_v59, 0.0 }
 0x5b5   : > { %v1540_v27 = vpop.permute.xlu1 %1539 }
 0x5b6   : > { %1401 = vadd.xlane.f32.xlu0 %v1400_v60  ;;  %v1553_v28 = vsel %vm1119_vm1, %v1540_v27, 0 }
 0x5b9   : > { %v1534_v35 = vpop.permute.xlu1 %1533 }
 0x5cc   : > { %1414 = vrot.lane.b32.xlu0 %v3881_v13, %s3622_s18  ;;  %s750_s18 = scalar_lea.vmem %s4228_s7, %s4258_s19 }
 0x5d0   : > { %1537 = vrot.lane.b32.xlu0 %v3879_v10, %s3623_s17 }
 0x5d4   : > { %1541 = vrot.lane.b32.xlu0 %v3899_v37, %s3623_s17 }
 0x63f   : > { %v1399_v61 = vpop.xlane.xlu0 %1398 }
 0x640   : > { %3555 = vrcp.f32 %v1399_v61 }
 0x643   : > { %v1402_v62 = vpop.xlane.xlu0 %1401 }
 0x644   : > { %3557 = vrcp.f32 %v1402_v62 }
 0x647   : > { %v1415_v63 = vpop.permute.xlu0 %1414 }
 0x648   : > { %3284 = vmatpush3.bf16.msra.mxu0 %v1415_v63  ;;  %v3459_v63 = vld [vmem:[%s3787_s24 + $0x20] sm:$0xff]  }
 0x649   : > { %3285 = vmatprep.subr.bf16.mxu0 %v3619_v0 }
 0x64a   : > { %v3556_v3 = vpop.eup %3555 }
 0x64b   : > { %v3982_v8 = vmul.f32 %v3556_v3, %v3552_v55  ;;  %v1538_v23 = vpop.permute.xlu0 %1537 }
 0x64c   : > { %3286 = vmatpush3.bf16.msra.mxu0 %v1417_v2  ;;  %v1550_v26 = vsel %vm1119_vm1, %v1538_v23, 0 }
 0x64d   : > { %3287 = vmatprep.subr.bf16.mxu0 %v3619_v0 }
 0x64e   : > { %v3558_v4 = vpop.eup %3557 }
 0x64f   : > { %v3984_v9 = vmul.f32 %v3558_v4, %v3554_v59  ;;  %v1542_v30 = vpop.permute.xlu0 %1541 }
 0x650   : > { %3288 = vmatpush3.bf16.msra.mxu0 %v1419_v7  ;;  %v1556_v34 = vsel %vm1119_vm1, %v1542_v30, 0  ;;  %v1531_v7 = vadd.f32 %v3982_v8, %v3926_v5 }
 0x651   : > { %v1407_v12 = vpack.c.bf16 %v3984_v9, %v3982_v8  ;;  %3293 = vmatprep.subr.bf16.mxu0 %v3619_v0 }
 0x653   : > { %3290 = vmatmul.mubr.msk.bf16.vlgmr.msra.gmra.mrb[8].mxu0 %vm1178_vm2, %v1407_v12 }
 0x654   : > { %3294 = vmatpush3.bf16.msra.mxu0 %v3457_v11  ;;  %3297 = vmatprep.mubr.msk.bf16.mxu0 %vm3621_vm0, %v3619_v0 }
 0x655   : > { %3295 = vmatprep.subr.bf16.mxu0 %v3619_v0 }
 0x658   : > { %3296 = vmatpush3.bf16.msra.mxu0 %v3458_v14 }
 0x659   : > { %3301 = vmatprep.subr.bf16.mxu0 %v3619_v0 }
 0x726   : > { %v1461_v16 = vpop.f32.mrb[8].mxu0 }
 0x727   : > { %v3291_v17 = vpop.f32.mrb[9].mxu0 }
 0x728   : > { %v1464_v19 = vpop.f32.mrb[10].mxu0 }
 0x729   : > { %v1468_v20 = vpack.c.bf16 %v1464_v19, %v1461_v16  ;;  %v3292_v21 = vpop.f32.mrb[11].mxu0 }
 0x72b   : > { %3298 = vmatmul.mubr.msk.bf16.vlgmr.msra.gmra.mrb[12].mxu0 %vm1119_vm1, %v1468_v20 }
 0x72c   : > { %3302 = vmatpush3.bf16.xpose.msra.mxu0 %v1547_v22  ;;  %3309 = vmatprep.mubr.msk.bf16.mxu0 %vm3621_vm0, %v3619_v0  ;;  %v3460_v22 = vld [vmem:[%s3787_s24 + $0x28] sm:$0xff]  }
 0x72d   : > { %3303 = vmatprep.subr.bf16.mxu0 %v3619_v0 }
 0x734   : > { %3304 = vmatpush3.bf16.xpose.msra.mxu0 %v1550_v26 }
 0x735   : > { %3305 = vmatprep.subr.bf16.mxu0 %v3619_v0 }
 0x73c   : > { %3306 = vmatpush3.bf16.xpose.msra.mxu0 %v1553_v28 }
 0x73d   : > { %3307 = vmatprep.subr.bf16.mxu0 %v3619_v0 }
 0x744   : > { %3308 = vmatpush3.bf16.xpose.msra.mxu0 %v1556_v34 }
 0x745   : > { %3325 = vmatprep.subr.bf16.mxu0 %v3619_v0 }
 0x74b   : > { %3310 = vmatmul.mubr.msk.bf16.vlgmr.msra.gmra.mrb[16].mxu0 %vm1119_vm1, %v1534_v35 }
 0x74c   : > { %3329 = vmatprep.mubr.msk.bf16.mxu0 %vm3621_vm0, %v3619_v0  ;;  %3326 = vmatpush3.bf16.msra.mxu0 %v3459_v63 }
 0x74d   : > { %3327 = vmatprep.subr.bf16.mxu0 %v3619_v0 }
 0x750   : > { %3328 = vmatpush3.bf16.msra.mxu0 %v3460_v22  ;;  %v3465_v22 = vld [vmem:[%s3809_s23 + $0x4] ss:$16 sps:$4 sm:$0xff]  }
 0x751   : > { %3345 = vmatprep.subr.bf16.mxu0 %v3619_v0 }
 0x81e   : > { %v1592_v36 = vpop.f32.mrb[16].mxu0 }
 0x81f   : > { %v1599_v39 = vmul.f32 0.17677669, %v1592_v36  ;;  %v3311_v40 = vpop.f32.mrb[17].mxu0 }
 0x820   : > { %v1595_v41 = vpop.f32.mrb[18].mxu0 }
 0x821   : > { %v1600_v44 = vmul.f32 0.17677669, %v1595_v41  ;;  %v3312_v46 = vpop.f32.mrb[19].mxu0  ;;  %v1601_v47 = vsel %vm1178_vm2, %v1599_v39, -inf }
 0x822   : > { %1602 = vmax.xlane.f32.xlu0 %v1601_v47 }
 0x823   : > { %v1604_v48 = vsel %vm1182_vm3, %v1600_v44, -inf }
 0x824   : > { %1605 = vmax.xlane.f32.xlu1 %v1604_v48 }
 0x835   : > { %1626 = vrot.lane.b32.xlu1 %v3881_v13, %s3623_s17 }
 0x838   : > { %1624 = vrot.lane.b32.xlu0 %v3872_v57, %s3623_s17 }
 0x839   : > { %1628 = vrot.lane.b32.xlu1 %v3892_v25, %s3623_s17 }
 0x83d   : > { %1630 = vrot.lane.b32.xlu1 %v3901_v38, %s3623_s17  ;;  %s753_s17 = scalar_lea.vmem %s4229_s8, %s4258_s19 }
 0x841   : > { %1749 = vrot.lane.b32.xlu1 %v3879_v10, %s3624_s30 }
 0x845   : > { %1753 = vrot.lane.b32.xlu1 %v3899_v37, %s3624_s30 }
 0x8af   : > { %v1603_v49 = vpop.xlane.xlu0 %1602 }
 0x8b0   : > { %v1607_v50 = vsub.f32 %v1599_v39, %v1603_v49 }
 0x8b1   : > { %v1606_v51 = vpop.xlane.xlu1 %1605 }
 0x8b2   : > { %v1609_v52 = vmul.f32 1.442695, %v1607_v50  ;;  %v1608_v53 = vsub.f32 %v1600_v44, %v1606_v51 }
 0x8b3   : > { %v1625_v54 = vpop.permute.xlu0 %1624 }
 0x8b4   : > { %3559 = vpow2.f32 %v1609_v52  ;;  %v1611_v55 = vmul.f32 1.442695, %v1608_v53  ;;  %3314 = vmatpush3.bf16.msra.mxu1 %v1625_v54 }
 0x8b5   : > { %v1627_v58 = vpop.permute.xlu1 %1626  ;;  %3315 = vmatprep.subr.bf16.mxu1 %v3619_v0 }
 0x8b6   : > { %3561 = vpow2.f32 %v1611_v55 }
 0x8b8   : > { %3316 = vmatpush3.bf16.msra.mxu1 %v1627_v58 }
 0x8b9   : > { %v1629_v59 = vpop.permute.xlu1 %1628  ;;  %3317 = vmatprep.subr.bf16.mxu1 %v3619_v0 }
 0x8bc   : > { %3318 = vmatpush3.bf16.msra.mxu1 %v1629_v59 }
 0x8bd   : > { %3319 = vmatprep.subr.bf16.mxu1 %v3619_v0  ;;  %v1631_v37 = vpop.permute.xlu1 %1630 }
 0x8be   : > { %v3560_v10 = vpop.eup %3559 }
 0x8bf   : > { %v1613_v60 = vsel %vm1178_vm2, %v3560_v10, 0.0 }
 0x8c0   : > { %v3562_v61 = vpop.eup %3561  ;;  %1614 = vadd.xlane.f32.xlu0 %v1613_v60  ;;  %3320 = vmatpush3.bf16.msra.mxu1 %v1631_v37 }
 0x8c1   : > { %3333 = vmatprep.subr.bf16.mxu1 %v3619_v0  ;;  %v1616_v62 = vsel %vm1182_vm3, %v3562_v61, 0.0  ;;  %v1750_v5 = vpop.permute.xlu1 %1749 }
 0x8c2   : > { %v1762_v8 = vsel %vm1119_vm1, %v1750_v5, 0 }
 0x8c4   : > { %1617 = vadd.xlane.f32.xlu0 %v1616_v62 }
 0x8c5   : > { %v1754_v19 = vpop.permute.xlu1 %1753 }
 0x8c6   : > { %v1768_v20 = vsel %vm1119_vm1, %v1754_v19, 0 }
 0x8da   : > { %1747 = vrot.lane.b32.xlu0 %v3866_v56, %s3624_s30 }
 0x8de   : > { %1751 = vrot.lane.b32.xlu0 %v3890_v24, %s3624_s30  ;;  %v1532_v24 = vadd.f32 %v3984_v9, %v3928_v6 }
 0x8e2   : > { %1745 = vrot.lane.b32.xlu0 %v3885_v15, %s3624_s30 }
 0x94d   : > { %v1615_v2 = vpop.xlane.xlu0 %1614 }
 0x94e   : > { %3563 = vrcp.f32 %v1615_v2 }
 0x951   : > { %v1618_v3 = vpop.xlane.xlu0 %1617 }
 0x952   : > { %3565 = vrcp.f32 %v1618_v3  ;;  %v3461_v3 = vld [vmem:[%s3787_s24 + $0x30] sm:$0xff]  }
 0x955   : > { %v1748_v14 = vpop.permute.xlu0 %1747 }
 0x956   : > { %v1759_v18 = vsel %vm1119_vm1, %v1748_v14, 0 }
 0x958   : > { %v3564_v4 = vpop.eup %3563 }
 0x959   : > { %v1621_v11 = vmul.f32 %v3564_v4, %v3560_v10  ;;  %v1752_v6 = vpop.permute.xlu0 %1751 }
 0x95a   : > { %v1765_v9 = vsel %vm1119_vm1, %v1752_v6, 0 }
 0x95b   : > { %v4040_v56 = vadd.f32 %v1621_v11, %v1531_v7 }
 0x95c   : > { %v3566_v12 = vpop.eup %3565 }
 0x95d   : > { %v1622_v15 = vmul.f32 %v3566_v12, %v3562_v61  ;;  %v1746_v21 = vpop.permute.xlu0 %1745 }
 0x95f   : > { %v4044_v16 = vadd.f32 %v1622_v15, %v1532_v24  ;;  %v1623_v17 = vpack.c.bf16 %v1622_v15, %v1621_v11 }
 0x961   : > { %3322 = vmatmul.mubr.msk.bf16.vlgmr.msra.gmra.mrb[28].mxu1 %vm1178_vm2, %v1623_v17  ;;  %v3017_v17 = vld [vmem:[%s750_s18] ss:$0 sm:$0xff]  ;;  %s773_s18 = scalar_lea.vmem %s4234_s13, %s4258_s19 }
 0x962   : > { %3334 = vmatpush3.bf16.xpose.msra.mxu1 %v1759_v18  ;;  %3341 = vmatprep.mubr.msk.bf16.mxu1 %vm3621_vm0, %v3619_v0  ;;  %v1109_v18 = vadd.f32 %v3017_v17, %v3831_v32  ;;  %v3463_v32 = vld [vmem:[%s3809_s23] ss:$16 sps:$4 sm:$0xff]  }
 0x963   : > { %3335 = vmatprep.subr.bf16.mxu1 %v3619_v0 }
 0x964   : > { %v1309_v6 = vadd.f32 %v3955_v33, %v1109_v18  ;;  %v3474_v33 = vld [vmem:[%s3809_s23 + $0x2c] ss:$16 sps:$4 sm:$0xff]   ;;  %v3038_v18 = vld [vmem:[%s753_s17] ss:$0 sm:$0xff]  ;;  %s782_s17 = scalar_lea.vmem %s4235_s14, %s3815_s28 }
 0x96a   : > { %3336 = vmatpush3.bf16.xpose.msra.mxu1 %v1762_v8 }
 0x96b   : > { %3337 = vmatprep.subr.bf16.mxu1 %v3619_v0 }
 0x972   : > { %3338 = vmatpush3.bf16.xpose.msra.mxu1 %v1765_v9 }
 0x973   : > { %3339 = vmatprep.subr.bf16.mxu1 %v3619_v0 }
 0x97a   : > { %3340 = vmatpush3.bf16.xpose.msra.mxu1 %v1768_v20 }
 0x97b   : > { %2220 = vmatprep.subr.bf16.mxu1 %v3465_v22  ;;  %v3515_v22 = vld [vmem:[%s3838_s29 + $0x48] sm:$0xff]  }
 0x981   : > { %3342 = vmatmul.mubr.msk.bf16.vlgmr.msra.gmra.mrb[32].mxu1 %vm1119_vm1, %v1746_v21 }
 0x982   : > { %2252 = vmatprep.mubr.bf16.mxu1 %v3620_v1  ;;  %2221 = vmatpush1.bf16.msra.mxu1 %v3463_v32 }
 0xa34   : > { %v1673_v23 = vpop.f32.mrb[28].mxu1 }
 0xa35   : > { %v3323_v26 = vpop.f32.mrb[29].mxu1 }
 0xa36   : > { %v1676_v27 = vpop.f32.mrb[30].mxu1  ;;  %v3471_v26 = vld [vmem:[%s3809_s23 + $0x24] ss:$16 sps:$4 sm:$0xff]  }
 0xa37   : > { %v1680_v28 = vpack.c.bf16 %v1676_v27, %v1673_v23  ;;  %v3324_v30 = vpop.f32.mrb[31].mxu1  ;;  %v3468_v23 = vld [vmem:[%s3809_s23 + $0xc] ss:$16 sps:$4 sm:$0xff]   ;;  %v3469_v27 = vld [vmem:[%s3809_s23 + $0x20] ss:$16 sps:$4 sm:$0xff]   ;;  %2222 = vmatprep.subr.bf16.mxu1 %v3471_v26 }
 0xa38   : > { %2223 = vmatpush1.bf16.msra.mxu1 %v3469_v27  ;;  %v3518_v26 = vld [vmem:[%s3838_s29 + $0x88] sm:$0xff]   ;;  %v3520_v27 = vld [vmem:[%s3838_s29 + $0xd0] sm:$0xff]  }
 0xa39   : > { %3330 = vmatmul.mubr.msk.bf16.vlgmr.msra.gmra.mrb[12].mxu0 %vm1119_vm1, %v1680_v28  ;;  %v3472_v28 = vld [vmem:[%s3809_s23 + $0x28] ss:$16 sps:$4 sm:$0xff]  }
 0xa3a   : > { %3353 = vmatprep.mubr.msk.bf16.mxu0 %vm3621_vm0, %v3619_v0 }
 0xa54   : > { %v1804_v34 = vpop.f32.mrb[32].mxu1 }
 0xa55   : > { %v1811_v35 = vmul.f32 0.17677669, %v1804_v34  ;;  %v3343_v36 = vpop.f32.mrb[33].mxu1 }
 0xa56   : > { %v1807_v39 = vpop.f32.mrb[34].mxu1 }
 0xa57   : > { %v1812_v40 = vmul.f32 0.17677669, %v1807_v39  ;;  %v3344_v41 = vpop.f32.mrb[35].mxu1  ;;  %v1813_v44 = vsel %vm1178_vm2, %v1811_v35, -inf }
 0xa58   : > { %1814 = vmax.xlane.f32.xlu1 %v1813_v44 }
 0xa59   : > { %v1816_v46 = vsel %vm1182_vm3, %v1812_v40, -inf }
 0xa5a   : > { %1817 = vmax.xlane.f32.xlu0 %v1816_v46 }
 0xa69   : > { %1836 = vrot.lane.b32.xlu1 %v3872_v57, %s3624_s30 }
 0xa6d   : > { %1840 = vrot.lane.b32.xlu1 %v3892_v25, %s3624_s30 }
 0xa71   : > { %1842 = vrot.lane.b32.xlu1 %v3901_v38, %s3624_s30 }
 0xae5   : > { %v1815_v47 = vpop.xlane.xlu1 %1814 }
 0xae6   : > { %v1819_v48 = vsub.f32 %v1811_v35, %v1815_v47  ;;  %v3477_v47 = vld [vmem:[%s3809_s23 + $0x44] ss:$16 sps:$4 sm:$0xff]  }
 0xae7   : > { %v1818_v49 = vpop.xlane.xlu0 %1817  ;;  %2224 = vmatprep.subr.bf16.mxu1 %v3477_v47  ;;  %v3531_v47 = vld [vmem:[%s3838_s29 + $0x68] sm:$0xff]  }
 0xae8   : > { %v1821_v50 = vmul.f32 1.442695, %v1819_v48  ;;  %v1820_v51 = vsub.f32 %v1812_v40, %v1818_v49  ;;  %v3480_v48 = vld [vmem:[%s3809_s23 + $0x4c] ss:$16 sps:$4 sm:$0xff]   ;;  %v3475_v49 = vld [vmem:[%s3809_s23 + $0x40] ss:$16 sps:$4 sm:$0xff]  }
 0xae9   : > { %v1837_v52 = vpop.permute.xlu1 %1836  ;;  %2225 = vmatpush1.bf16.msra.mxu1 %v3475_v49  ;;  %v3533_v49 = vld [vmem:[%s3838_s29 + $0x28] sm:$0xff]  }
 0xaea   : > { %3567 = vpow2.f32 %v1821_v50  ;;  %v1823_v53 = vmul.f32 1.442695, %v1820_v51  ;;  %3346 = vmatpush3.bf16.msra.mxu0 %v1837_v52  ;;  %v3478_v50 = vld [vmem:[%s3809_s23 + $0x48] ss:$16 sps:$4 sm:$0xff]   ;;  %v3483_v51 = vld [vmem:[%s3809_s23 + $0x64] ss:$16 sps:$4 sm:$0xff]  }
 0xaeb   : > { %3347 = vmatprep.subr.bf16.mxu0 %v3619_v0  ;;  %v3486_v52 = vld [vmem:[%s3809_s23 + $0x6c] ss:$16 sps:$4 sm:$0xff]   ;;  %2226 = vmatprep.subr.bf16.mxu1 %v3483_v51  ;;  %v3535_v51 = vld [vmem:[%s3838_s29 + $0x70] sm:$0xff]  }
 0xaec   : > { %3569 = vpow2.f32 %v1823_v53  ;;  %v3481_v53 = vld [vmem:[%s3809_s23 + $0x60] ss:$16 sps:$4 sm:$0xff]  }
 0xaed   : > { %v1841_v10 = vpop.permute.xlu1 %1840  ;;  %2227 = vmatpush1.bf16.msra.mxu1 %v3481_v53  ;;  %v3537_v53 = vld [vmem:[%s3838_s29 + $0x30] sm:$0xff]  }
 0xaf4   : > { %v3568_v54 = vpop.eup %3567 }
 0xaf5   : > { %v1825_v57 = vsel %vm1178_vm2, %v3568_v54, 0.0 }
 0xaf6   : > { %v3570_v55 = vpop.eup %3569  ;;  %1826 = vadd.xlane.f32.xlu0 %v1825_v57  ;;  %v3489_v57 = vld [vmem:[%s3809_s23 + $0x84] ss:$16 sps:$4 sm:$0xff]  }
 0xaf7   : > { %v1828_v25 = vsel %vm1182_vm3, %v3570_v55, 0.0  ;;  %2228 = vmatprep.subr.bf16.mxu1 %v3489_v57  ;;  %v3539_v57 = vld [vmem:[%s3838_s29 + $0x78] sm:$0xff]  }
 0xafa   : > { %1829 = vadd.xlane.f32.xlu0 %v1828_v25  ;;  %v3487_v25 = vld [vmem:[%s3809_s23 + $0x80] ss:$16 sps:$4 sm:$0xff]  }
 0xafb   : > { %2229 = vmatpush1.bf16.msra.mxu1 %v3487_v25  ;;  %v3541_v25 = vld [vmem:[%s3838_s29 + $0x38] sm:$0xff]  }
 0xb10   : > { %1838 = vrot.lane.b32.xlu0 %v3881_v13, %s3624_s30  ;;  %v1843_v13 = vpop.permute.xlu1 %1842 }
 0xb83   : > { %v1827_v38 = vpop.xlane.xlu0 %1826 }
 0xb84   : > { %3571 = vrcp.f32 %v1827_v38  ;;  %v3490_v38 = vld [vmem:[%s3809_s23 + $0x88] ss:$16 sps:$4 sm:$0xff]  }
 0xb87   : > { %v1830_v58 = vpop.xlane.xlu0 %1829 }
 0xb88   : > { %3573 = vrcp.f32 %v1830_v58  ;;  %v3495_v58 = vld [vmem:[%s3809_s23 + $0xa4] ss:$16 sps:$4 sm:$0xff]  }
 0xb89   : > { %2230 = vmatprep.subr.bf16.mxu1 %v3495_v58  ;;  %v2050_v58 = vsub.s32 2, %v3855_v42 }
 0xb8b   : > { %v1839_v59 = vpop.permute.xlu0 %1838 }
 0xb8c   : > { %3348 = vmatpush3.bf16.msra.mxu0 %v1839_v59  ;;  %v3498_v59 = vld [vmem:[%s3809_s23 + $0xac] ss:$16 sps:$4 sm:$0xff]  }
 0xb8d   : > { %3349 = vmatprep.subr.bf16.mxu0 %v3619_v0 }
 0xb8e   : > { %v3572_v37 = vpop.eup %3571 }
 0xb8f   : > { %v1833_v60 = vmul.f32 %v3572_v37, %v3568_v54  ;;  %v3484_v54 = vld [vmem:[%s3809_s23 + $0x68] ss:$16 sps:$4 sm:$0xff]  }
 0xb90   : > { %3350 = vmatpush3.bf16.msra.mxu0 %v1841_v10  ;;  %v3493_v10 = vld [vmem:[%s3809_s23 + $0xa0] ss:$16 sps:$4 sm:$0xff]   ;;  %v3496_v37 = vld [vmem:[%s3809_s23 + $0xa8] ss:$16 sps:$4 sm:$0xff]  }
 0xb91   : > { %v1955_v61 = vadd.f32 %v1833_v60, %v4040_v56  ;;  %3351 = vmatprep.subr.bf16.mxu0 %v3619_v0  ;;  %v3462_v56 = vld [vmem:[%s3787_s24 + $0x38] sm:$0xff]   ;;  %2231 = vmatpush1.bf16.msra.mxu1 %v3493_v10  ;;  %v2054_v10 = vsub.s32 3, %v3855_v42 }
 0xb92   : > { %v3574_v62 = vpop.eup %3573 }
 0xb93   : > { %v1957_v63 = vmul.f32 0.25, %v1955_v61  ;;  %v1834_v2 = vmul.f32 %v3574_v62, %v3570_v55  ;;  %v3492_v55 = vld [vmem:[%s3809_s23 + $0x8c] ss:$16 sps:$4 sm:$0xff]   ;;  %v3499_v62 = vld [vmem:[%s3809_s23 + $0xc0] ss:$16 sps:$4 sm:$0xff]  }
 0xb94   : > { %3352 = vmatpush3.bf16.msra.mxu0 %v1843_v13  ;;  %v3504_v61 = vld [vmem:[%s3809_s23 + $0xcc] ss:$16 sps:$4 sm:$0xff]   ;;  %v3502_v13 = vld [vmem:[%s3809_s23 + $0xc8] ss:$16 sps:$4 sm:$0xff]  }
 0xb95   : > { %1959 = vst.msk [vmem:[%s791_s27] sm:$0xff] %vm1178_vm2, %v1957_v63  ;;  %v1956_v4 = vadd.f32 %v1834_v2, %v4044_v16  ;;  %v1835_v7 = vpack.c.bf16 %v1834_v2, %v1833_v60  ;;  %3357 = vmatprep.subr.bf16.mxu0 %v3619_v0  ;;  %v3501_v60 = vld [vmem:[%s3809_s23 + $0xc4] ss:$16 sps:$4 sm:$0xff]   ;;  %v3505_v2 = vld [vmem:[%s3809_s23 + $0xe0] ss:$16 sps:$4 sm:$0xff]  }
 0xb96   : > { %2232 = vmatprep.subr.bf16.mxu1 %v3501_v60  ;;  %v3507_v63 = vld [vmem:[%s3809_s23 + $0xe4] ss:$16 sps:$4 sm:$0xff]  }
 0xb97   : > { %v1958_v11 = vmul.f32 0.25, %v1956_v4  ;;  %3354 = vmatmul.mubr.msk.bf16.vlgmr.msra.gmra.mrb[20].mxu0 %vm1178_vm2, %v1835_v7  ;;  %2233 = vmatpush1.bf16.msra.mxu1 %v3499_v62  ;;  %v3510_v4 = vld [vmem:[%s3809_s23 + $0xec] ss:$16 sps:$4 sm:$0xff]   ;;  %v3511_v7 = vld [vmem:[%s3838_s29 + $0x40] sm:$0xff]  }
 0xb98   : > { %3358 = vmatpush3.bf16.msra.mxu0 %v3461_v3  ;;  %3361 = vmatprep.mubr.msk.bf16.mxu0 %vm3621_vm0, %v3619_v0  ;;  %v3508_v3 = vld [vmem:[%s3809_s23 + $0xe8] ss:$16 sps:$4 sm:$0xff]  }
 0xb99   : > { %1960 = vst.msk [vmem:[%s791_s27 + $0x8] sm:$0x3f] %vm1182_vm3, %v1958_v11  ;;  %3359 = vmatprep.subr.bf16.mxu0 %v3619_v0  ;;  %v1108_v0 = vadd.f32 %v3017_v17, %v3829_v31  ;;  %2234 = vmatprep.subr.bf16.mxu1 %v3507_v63  ;;  %v3512_v11 = vld [vmem:[%s3838_s29 + $0xc0] sm:$0xff]  }
 0xb9b   : > { %v1308_v5 = vadd.f32 %v3953_v29, %v1108_v0  ;;  %v3466_v29 = vld [vmem:[%s3809_s23 + $0x8] ss:$16 sps:$4 sm:$0xff]   ;;  %2235 = vmatpush1.bf16.msra.mxu1 %v3505_v2 }
 0xb9c   : > { %3360 = vmatpush3.bf16.msra.mxu0 %v3462_v56  ;;  %3173 = vmatprep.subr.bf16.mxu1 %v3511_v7 }
 0xb9d   : > { %2263 = vmatprep.subr.bf16.mxu0 %v3468_v23  ;;  %v3517_v23 = vld [vmem:[%s3838_s29 + $0x8] sm:$0xff]  }
 0xc6a   : > { %v1885_v12 = vpop.f32.mrb[20].mxu0 }
 0xc6b   : > { %v3355_v24 = vpop.f32.mrb[21].mxu0 }
 0xc6c   : > { %v1888_v15 = vpop.f32.mrb[22].mxu0 }
 0xc6d   : > { %v1892_v14 = vpack.c.bf16 %v1888_v15, %v1885_v12  ;;  %v3356_v16 = vpop.f32.mrb[23].mxu0 }
 0xc6f   : > { %3362 = vmatmul.mubr.msk.bf16.vlgmr.msra.gmra.mrb[12].mxu0 %vm1119_vm1, %v1892_v14 }
 0xc70   : > { %2295 = vmatprep.mubr.bf16.mxu0 %v3620_v1  ;;  %2264 = vmatpush1.bf16.msra.mxu0 %v3466_v29  ;;  %v3516_v29 = vld [vmem:[%s3838_s29 + $0xc8] sm:$0xff]  }
 0xc71   : > { %2265 = vmatprep.subr.bf16.mxu0 %v3474_v33  ;;  %v3519_v33 = vld [vmem:[%s3838_s29 + $0x50] sm:$0xff]  }
 0xc74   : > { %2266 = vmatpush1.bf16.msra.mxu0 %v3472_v28  ;;  %v3521_v28 = vld [vmem:[%s3838_s29 + $0x10] sm:$0xff]  }
 0xc75   : > { %2267 = vmatprep.subr.bf16.mxu0 %v3480_v48  ;;  %v3532_v48 = vld [vmem:[%s3838_s29 + $0xe8] sm:$0xff]  }
 0xc78   : > { %2268 = vmatpush1.bf16.msra.mxu0 %v3478_v50  ;;  %v3534_v50 = vld [vmem:[%s3838_s29 + $0xa8] sm:$0xff]  }
 0xc79   : > { %2269 = vmatprep.subr.bf16.mxu0 %v3486_v52  ;;  %v3536_v52 = vld [vmem:[%s3838_s29 + $0xf0] sm:$0xff]  }
 0xc7c   : > { %2270 = vmatpush1.bf16.msra.mxu0 %v3484_v54  ;;  %v3538_v54 = vld [vmem:[%s3838_s29 + $0xb0] sm:$0xff]  }
 0xc7d   : > { %2271 = vmatprep.subr.bf16.mxu0 %v3492_v55  ;;  %v3540_v55 = vld [vmem:[%s3838_s29 + $0xf8] sm:$0xff]  }
 0xc80   : > { %2272 = vmatpush1.bf16.msra.mxu0 %v3490_v38  ;;  %v3542_v38 = vld [vmem:[%s3838_s29 + $0xb8] sm:$0xff]  }
 0xc81   : > { %2273 = vmatprep.subr.bf16.mxu0 %v3498_v59  ;;  %v2038_v59 = vld [vmem:[%s765_s4] sm:$0xf] }
 0xc82   : > { %v2051_v60 = vrot.slane %v2038_v59, %v2050_v58  ;;  %v2055_v62 = vrot.slane %v2038_v59, %v2054_v10 }
 0xc84   : > { %2274 = vmatpush1.bf16.msra.mxu0 %v3496_v37  ;;  %v2043_v37 = vrot.slane %v2038_v59, %v940_v43 }
 0xc85   : > { %2275 = vmatprep.subr.bf16.mxu0 %v3504_v61  ;;  %v2047_v61 = vrot.slane %v2038_v59, %v944_v45 }
 0xc88   : > { %2276 = vmatpush1.bf16.msra.mxu0 %v3502_v13 }
 0xc89   : > { %2277 = vmatprep.subr.bf16.mxu0 %v3510_v4 }
 0xc8c   : > { %2278 = vmatpush1.bf16.msra.mxu0 %v3508_v3 }
 0xc8d   : > { %3195 = vmatprep.subr.bf16.mxu0 %v3512_v11 }
 0xd42   : > { %v1946_v8 = vpop.f32.mrb[12].mxu0 }
 0xd43   : > { %v3366_v1 = vadd.f32 %v1946_v8, %v1308_v5  ;;  %v3363_v9 = vpop.f32.mrb[13].mxu0 }
 0xd44   : > { %v1949_v19 = vpop.f32.mrb[14].mxu0 }
 0xd45   : > { %v3368_v20 = vadd.f32 %v1949_v19, %v1309_v6  ;;  %1963 = vadd.xlane.f32.xlu0 %v3366_v1  ;;  %v3364_v31 = vpop.f32.mrb[15].mxu0 }
 0xd46   : > { %v3513_v31 = vld [vmem:[%s3838_s29] sm:$0xff]  }
 0xd47   : > { %v1966_v21 = vsel %vm1965_vm4, %v3368_v20, 0.0 }
 0xd48   : > { %1967 = vadd.xlane.f32.xlu1 %v1966_v21  ;;  %v3514_v21 = vld [vmem:[%s3838_s29 + $0x80] sm:$0xff]  }
 0xdd2   : > { %v1964_v30 = vpop.xlane.xlu0 %1963 }
 0xdd3   : > { %v1970_v34 = vmul.f32 0.0078125, %v1964_v30  ;;  %v3522_v30 = vld [vmem:[%s3838_s29 + $0x90] sm:$0xff]  }
 0xdd5   : > { %v4112_v35 = vsub.f32 %v3366_v1, %v1970_v34  ;;  %v1968_v36 = vpop.xlane.xlu1 %1967  ;;  %v3039_v1 = vld [vmem:[%s756_s2] ss:$0 sm:$0xff]  ;;  %v3523_v34 = vld [vmem:[%s3838_s29 + $0x58] sm:$0xff]  }
 0xdd6   : > { %v1971_v39 = vmul.f32 0.0078125, %v1968_v36  ;;  %v3525_v36 = vld [vmem:[%s3838_s29 + $0x18] sm:$0xff]  }
 0xdd7   : > { %v1974_v40 = vmul.f32 %v4112_v35, %v4112_v35 }
 0xdd8   : > { %v4116_v41 = vsub.f32 %v3368_v20, %v1971_v39  ;;  %v3526_v39 = vld [vmem:[%s3838_s29 + $0x98] sm:$0xff]  }
 0xdd9   : > { %1976 = vadd.xlane.f32.xlu0 %v1974_v40  ;;  %v3527_v40 = vld [vmem:[%s3838_s29 + $0x60] sm:$0xff]  }
 0xdda   : > { %v1975_v44 = vmul.f32 %v4116_v41, %v4116_v41 }
 0xddc   : > { %v1978_v46 = vsel %vm1965_vm4, %v1975_v44, 0.0  ;;  %v3529_v44 = vld [vmem:[%s3838_s29 + $0x20] sm:$0xff]  }
 0xddd   : > { %1979 = vadd.xlane.f32.xlu0 %v1978_v46  ;;  %v3530_v46 = vld [vmem:[%s3838_s29 + $0xa0] sm:$0xff]  }
 0xe66   : > { %v1977_v56 = vpop.xlane.xlu0 %1976 }
 0xe67   : > { %v1981_v12 = vmul.f32 0.0078125, %v1977_v56 }
 0xe69   : > { %v1983_v24 = vadd.f32 1e-05, %v1981_v12 }
 0xe6a   : > { %v1980_v15 = vpop.xlane.xlu0 %1979 }
 0xe6b   : > { %3575 = vrsqrt.f32 %v1983_v24  ;;  %v1982_v14 = vmul.f32 0.0078125, %v1980_v15 }
 0xe6d   : > { %v1984_v16 = vadd.f32 1e-05, %v1982_v14 }
 0xe6f   : > { %3577 = vrsqrt.f32 %v1984_v16 }
 0xe75   : > { %v3576_v17 = vpop.eup %3575 }
 0xe76   : > { %v1987_v0 = vmul.f32 %v3576_v17, %v4112_v35  ;;  %v3524_v35 = vld [vmem:[%s3838_s29 + $0xd8] sm:$0xff]  }
 0xe78   : > { %v1995_v6 = vmul.f32 %v3038_v18, %v1987_v0 }
 0xe79   : > { %v3578_v5 = vpop.eup %3577 }
 0xe7a   : > { %v1988_v8 = vmul.f32 %v3578_v5, %v4116_v41  ;;  %v2003_v19 = vadd.f32 %v3039_v1, %v1995_v6  ;;  %v3528_v41 = vld [vmem:[%s3838_s29 + $0xe0] sm:$0xff]  }
 0xe7c   : > { %v1996_v9 = vmul.f32 %v3038_v18, %v1988_v8 }
 0xe7e   : > { %v2004_v20 = vadd.f32 %v3039_v1, %v1996_v9 }
 0xe80   : > { %v2005_v32 = vpack.c.bf16 %v2004_v20, %v2003_v19 }
 0xe82   : > { %2253 = vmatmul.mubr.bf16.vlgmr.msra.gmra.mrb[36].mxu1 %v2005_v32  ;;  %2296 = vmatmul.mubr.bf16.vlgmr.msra.gmra.mrb[24].mxu0 %v2005_v32 }
 0xe83   : > { %3174 = vmatpush3.bf16.msra.mxu1 %v3513_v31  ;;  %3196 = vmatpush3.bf16.msra.mxu0 %v3514_v21 }
 0xe84   : > { %3175 = vmatprep.subr.bf16.mxu1 %v3515_v22  ;;  %3197 = vmatprep.subr.bf16.mxu0 %v3516_v29  ;;  %v3072_v29 = vld [vmem:[%s773_s18] ss:$0 sm:$0xff] }
 0xe87   : > { %3176 = vmatpush3.bf16.msra.mxu1 %v3517_v23  ;;  %3198 = vmatpush3.bf16.msra.mxu0 %v3518_v26 }
 0xe88   : > { %3177 = vmatprep.subr.bf16.mxu1 %v3519_v33  ;;  %3199 = vmatprep.subr.bf16.mxu0 %v3520_v27 }
 0xe8b   : > { %3178 = vmatpush3.bf16.msra.mxu1 %v3521_v28  ;;  %3200 = vmatpush3.bf16.msra.mxu0 %v3522_v30 }
 0xe8c   : > { %3179 = vmatprep.subr.bf16.mxu1 %v3523_v34  ;;  %3201 = vmatprep.subr.bf16.mxu0 %v3524_v35 }
 0xe8f   : > { %3180 = vmatpush3.bf16.msra.mxu1 %v3525_v36  ;;  %3202 = vmatpush3.bf16.msra.mxu0 %v3526_v39 }
 0xe90   : > { %3181 = vmatprep.subr.bf16.mxu1 %v3527_v40  ;;  %3203 = vmatprep.subr.bf16.mxu0 %v3528_v41 }
 0xe93   : > { %3182 = vmatpush3.bf16.msra.mxu1 %v3529_v44  ;;  %3204 = vmatpush3.bf16.msra.mxu0 %v3530_v46 }
 0xe94   : > { %3183 = vmatprep.subr.bf16.mxu1 %v3531_v47  ;;  %3205 = vmatprep.subr.bf16.mxu0 %v3532_v48 }
 0xe97   : > { %3184 = vmatpush3.bf16.msra.mxu1 %v3533_v49  ;;  %3206 = vmatpush3.bf16.msra.mxu0 %v3534_v50 }
 0xe98   : > { %3185 = vmatprep.subr.bf16.mxu1 %v3535_v51  ;;  %3207 = vmatprep.subr.bf16.mxu0 %v3536_v52 }
 0xe9b   : > { %3186 = vmatpush3.bf16.msra.mxu1 %v3537_v53  ;;  %3208 = vmatpush3.bf16.msra.mxu0 %v3538_v54 }
 0xe9c   : > { %3187 = vmatprep.subr.bf16.mxu1 %v3539_v57  ;;  %3209 = vmatprep.subr.bf16.mxu0 %v3540_v55 }
 0xe9f   : > { %3188 = vmatpush3.bf16.msra.mxu1 %v3541_v25  ;;  %3210 = vmatpush3.bf16.msra.mxu0 %v3542_v38 }
 0xf55   : > { %v2254_v13 = vpop.f32.mrb[36].mxu1  ;;  %v2297_v63 = vpop.f32.mrb[24].mxu0 }
 0xf56   : > { %v2255_v2 = vadd.f32 %v2254_v13, %v2043_v37  ;;  %v2298_v3 = vadd.f32 %v2297_v63, %v2051_v60  ;;  %v2256_v4 = vpop.f32.mrb[37].mxu1  ;;  %v2299_v7 = vpop.f32.mrb[25].mxu0 }
 0xf57   : > { %v2257_v11 = vadd.f32 %v2256_v4, %v2047_v61  ;;  %v2300_v56 = vadd.f32 %v2299_v7, %v2055_v62  ;;  %v2258_v12 = vpop.f32.mrb[38].mxu1  ;;  %v2301_v24 = vpop.f32.mrb[26].mxu0 }
 0xf58   : > { %v2259_v15 = vadd.f32 %v2258_v12, %v2043_v37  ;;  %v2302_v14 = vadd.f32 %v2301_v24, %v2051_v60  ;;  %v2260_v16 = vpop.f32.mrb[39].mxu1  ;;  %v2303_v17 = vpop.f32.mrb[27].mxu0  ;;  %v2306_v18 = vmax.f32 %v2255_v2, 0.0  ;;  %v2308_v42 = vmax.f32 %v2298_v3, 0.0 }
 0xf59   : > { %v2261_v43 = vadd.f32 %v2260_v16, %v2047_v61  ;;  %v2304_v0 = vadd.f32 %v2303_v17, %v2055_v62  ;;  %v2307_v8 = vmax.f32 %v2257_v11, 0.0  ;;  %v2309_v6 = vmax.f32 %v2300_v56, 0.0 }
 0xf5a   : > { %v2310_v45 = vmax.f32 %v2259_v15, 0.0  ;;  %v2312_v5 = vmax.f32 %v2302_v14, 0.0 }
 0xf5b   : > { %v2311_v1 = vmax.f32 %v2261_v43, 0.0  ;;  %v2313_v9 = vmax.f32 %v2304_v0, 0.0 }
 0xf5c   : > { %v2314_v19 = vpack.c.bf16 %v2310_v45, %v2306_v18  ;;  %v2316_v20 = vpack.c.bf16 %v2312_v5, %v2308_v42 }
 0xf5d   : > { %v2315_v31 = vpack.c.bf16 %v2311_v1, %v2307_v8  ;;  %v2317_v21 = vpack.c.bf16 %v2313_v9, %v2309_v6 }
 0xf5f   : > { %2613 = vmatprep.mubr.bf16.mxu1 %v2315_v31  ;;  %2654 = vmatprep.mubr.bf16.mxu0 %v2317_v21 }
 0xf60   : > { %2614 = vmatmul.mubr.bf16.vlgmr.msra.gmra.mrb[40].mxu1 %v2314_v19  ;;  %2655 = vmatmul.mubr.bf16.vlgmr.msra.gmra.mrb[28].mxu0 %v2316_v20 }
0x1033   : > { %v3189_v32 = vpop.f32.mrb[40].mxu1  ;;  %v3211_v22 = vpop.f32.mrb[28].mxu0 }
0x1034   : > { %v3190_v23 = vpop.f32.mrb[41].mxu1  ;;  %v3212_v26 = vpop.f32.mrb[29].mxu0 }
0x1035   : > { %v3191_v33 = vadd.f32 %v3190_v23, %v3189_v32  ;;  %v3213_v27 = vadd.f32 %v3212_v26, %v3211_v22  ;;  %v3192_v28 = vpop.f32.mrb[42].mxu1  ;;  %v3214_v30 = vpop.f32.mrb[30].mxu0 }
0x1036   : > { %v3193_v34 = vpop.f32.mrb[43].mxu1  ;;  %v3215_v35 = vpop.f32.mrb[31].mxu0 }
0x1037   : > { %v2616_v36 = vadd.f32 %v3191_v33, %v3072_v29  ;;  %v3194_v39 = vadd.f32 %v3193_v34, %v3192_v28  ;;  %v3216_v40 = vadd.f32 %v3215_v35, %v3214_v30 }
0x1039   : > { %v2657_v41 = vadd.f32 %v3213_v27, %v2616_v36  ;;  %v2619_v44 = vadd.f32 %v3194_v39, %v3072_v29 }
0x103b   : > { %2663 = vst [vmem:[%s782_s17] sm:$0xff] %v2657_v41  ;;  %v2660_v46 = vadd.f32 %v3216_v40, %v2619_v44 }
0x103d   : > { %2664 = vst [vmem:[%s782_s17 + $0x8] sm:$0x3f] %v2660_v46 }
0x103e PF: > { %s26_s22 = sadd.s32 1, %s3617_s22   ;;  %s4245_s30 = sld [smem:[#allocation2_spill]] }
0x103f   : > { %p23_p7 = scmp.ge.s32.totalorder %s26_s22, 6   ;;  %s4246_s16 = sld [smem:[#allocation3_spill]] }
0x1040   : > { %s4247_s18 = smov %s3609_s20  ;;  %s4248_s19 = smov %s3613_s21 }
0x1041   :  { %25 = sbr.rel (!%p23_p7) target bundleno = 4 (0x4), region = 157 }
0x1044   : > { %s4249_s20 = smov %s4245_s30 }
0x1045   : > { %s4250_s21 = smov %s4246_s16 }

// kernel: a_call__.3
= control target key start
LH: loop header
LB: loop body
LE: loop exit
PB: predicated region body
PF: predicated region fallthrough
CT: control target
= control target key end

     0   :  { %s3328_s18 = smov 0   ;;  %s3920_s0 = inlined_call_operand.vmem [shape: f32[2,14,128], index: 0, kind: input, shape index: {}]   ;;  %s3921_s1 = inlined_call_operand.vmem [shape: f32[2,14,128], index: 1, kind: input, shape index: {}]   ;;  %s3922_s2 = inlined_call_operand.vmem [shape: bf16[128,512], index: 2, kind: input, shape index: {}]   ;;  %s3923_s3 = inlined_call_operand.vmem [shape: bf16[128,512], index: 3, kind: input, shape index: {}]   ;;  %s3924_s4 = inlined_call_operand.vmem [shape: f32[1,512], index: 4, kind: input, shape index: {}]   ;;  %s3925_s5 = inlined_call_operand.vmem [shape: bf16[512,128], index: 5, kind: input, shape index: {}]   ;;  %s3926_s6 = inlined_call_operand.vmem [shape: f32[1,128], index: 6, kind: input, shape index: {}]   ;;  %s3927_s7 = inlined_call_operand.vmem [shape: f32[1,128], index: 7, kind: input, shape index: {}, may-alias: {7,13}]   ;;  %s3928_s8 = inlined_call_operand.vmem [shape: f32[1,128], index: 8, kind: input, shape index: {}, may-alias: {8,14}]   ;;  %s3929_s9 = inlined_call_operand.vmem [shape: bf16[128,384], index: 9, kind: input, shape index: {}]   ;;  %s3930_s10 = inlined_call_operand.vmem [shape: f32[1,384], index: 10, kind: input, shape index: {}]   ;;  %s3931_s11 = inlined_call_operand.vmem [shape: bf16[128,128], index: 11, kind: input, shape index: {}]   ;;  %s3932_s12 = inlined_call_operand.vmem [shape: f32[1,128], index: 12, kind: input, shape index: {}]   ;;  %s3933_s13 = inlined_call_operand.vmem [shape: f32[1,128], index: 13, kind: input, shape index: {}, may-alias: {7,13}]   ;;  %s3934_s14 = inlined_call_operand.vmem [shape: f32[1,128], index: 14, kind: input, shape index: {}, may-alias: {8,14}]   ;;  %s3935_s15 = inlined_call_operand.vmem [shape: f32[2,14,128], index: 15, kind: output, shape index: {}]  }
   0x1 LB: > { %s2647_s19 = sadd.s32 4294967295, %s3240_s18   ;;  %p2651_p0 = scmp.ge.s32.totalorder %s3240_s18, 1  ;;  %s3240_s18 = sphi %s3328_s18, %s25_s18  }
   0x2   : > { %p447_p1 = scmp.lt.s32.totalorder %s3240_s18, 3 }
   0x4   : > { %p448_p2 = pnand %p2651_p0, %p447_p1 }
   0x5   : > { %v3026_v0 = vld [vmem:[%s3923_s3 + $0x4] ss:$16 sps:$4 sm:$0xff] (!%p448_p2)   ;;  %v3028_v1 = vld [vmem:[%s3923_s3 + $0xc] ss:$16 sps:$4 sm:$0xff] (!%p448_p2)   ;;  %v3242_v2 = vmov (!%p448_p2), 0   ;;  %p500_p3 = scmp.lt.s32.totalorder (!%p448_p2), %s2647_s19, 1 }
   0x6   : > { %451 = sbr.rel (%p448_p2) target bundleno = 3433 (0xd69), region = 80  ;;  %778 = vmatprep.mubr.bf16.mxu0 (!%p448_p2), %v3242_v2  ;;  %821 = vmatprep.mubr.bf16.mxu1 (!%p448_p2), %v3242_v2  ;;  %v3030_v3 = vld [vmem:[%s3923_s3] ss:$16 sps:$4 sm:$0xff] (!%p448_p2)   ;;  %v3031_v4 = vld [vmem:[%s3923_s3 + $0x8] ss:$16 sps:$4 sm:$0xff] (!%p448_p2)   ;;  %vm1469_vm0 = vcmask (!%p448_p2), 1045504  }
   0x7   : > { %746 = vmatprep.subr.bf16.mxu0 (!%p448_p2), %v3026_v0  ;;  %789 = vmatprep.subr.bf16.mxu1 (!%p448_p2), %v3028_v1  ;;  %v3032_v5 = vld [vmem:[%s3923_s3 + $0x24] ss:$16 sps:$4 sm:$0xff] (!%p448_p2)   ;;  %v3034_v6 = vld [vmem:[%s3923_s3 + $0x2c] ss:$16 sps:$4 sm:$0xff] (!%p448_p2)   ;;  %v3036_v7 = vld [vmem:[%s3923_s3 + $0x20] ss:$16 sps:$4 sm:$0xff] (!%p448_p2)  }
   0x8   : > { %747 = vmatpush1.bf16.msra.mxu0 (!%p448_p2), %v3030_v3  ;;  %790 = vmatpush1.bf16.msra.mxu1 (!%p448_p2), %v3031_v4  ;;  %v3037_v8 = vld [vmem:[%s3923_s3 + $0x28] ss:$16 sps:$4 sm:$0xff] (!%p448_p2)   ;;  %v3038_v9 = vld [vmem:[%s3923_s3 + $0x44] ss:$16 sps:$4 sm:$0xff] (!%p448_p2)   ;;  %v3040_v10 = vld [vmem:[%s3923_s3 + $0x4c] ss:$16 sps:$4 sm:$0xff] (!%p448_p2)  }
   0x9   : > { %748 = vmatprep.subr.bf16.mxu0 (!%p448_p2), %v3032_v5  ;;  %791 = vmatprep.subr.bf16.mxu1 (!%p448_p2), %v3034_v6  ;;  %v3042_v11 = vld [vmem:[%s3923_s3 + $0x40] ss:$16 sps:$4 sm:$0xff] (!%p448_p2)   ;;  %v3043_v12 = vld [vmem:[%s3923_s3 + $0x48] ss:$16 sps:$4 sm:$0xff] (!%p448_p2)   ;;  %v3044_v13 = vld [vmem:[%s3923_s3 + $0x64] ss:$16 sps:$4 sm:$0xff] (!%p448_p2)  }
   0xa   : > { %v3046_v14 = vld [vmem:[%s3923_s3 + $0x6c] ss:$16 sps:$4 sm:$0xff] (!%p448_p2)   ;;  %v3048_v15 = vld [vmem:[%s3923_s3 + $0x60] ss:$16 sps:$4 sm:$0xff] (!%p448_p2)   ;;  %v3049_v16 = vld [vmem:[%s3923_s3 + $0x68] ss:$16 sps:$4 sm:$0xff] (!%p448_p2)  }
   0xb   : > { %v3050_v17 = vld [vmem:[%s3923_s3 + $0x84] ss:$16 sps:$4 sm:$0xff] (!%p448_p2)   ;;  %v3052_v18 = vld [vmem:[%s3923_s3 + $0x8c] ss:$16 sps:$4 sm:$0xff] (!%p448_p2)   ;;  %v3054_v19 = vld [vmem:[%s3923_s3 + $0x80] ss:$16 sps:$4 sm:$0xff] (!%p448_p2)  }
   0xc   : > { %749 = vmatpush1.bf16.msra.mxu0 (!%p448_p2), %v3036_v7  ;;  %792 = vmatpush1.bf16.msra.mxu1 (!%p448_p2), %v3037_v8  ;;  %v3055_v20 = vld [vmem:[%s3923_s3 + $0x88] ss:$16 sps:$4 sm:$0xff] (!%p448_p2)   ;;  %v3056_v21 = vld [vmem:[%s3923_s3 + $0xa4] ss:$16 sps:$4 sm:$0xff] (!%p448_p2)   ;;  %v3058_v22 = vld [vmem:[%s3923_s3 + $0xac] ss:$16 sps:$4 sm:$0xff] (!%p448_p2)  }
   0xd   : > { %750 = vmatprep.subr.bf16.mxu0 %v3038_v9  ;;  %793 = vmatprep.subr.bf16.mxu1 %v3040_v10  ;;  %s3937_s19 = smov (!%p500_p3, %s2647_s19), 1  ;;  %v3060_v23 = vld [vmem:[%s3923_s3 + $0xa0] ss:$16 sps:$4 sm:$0xff]   ;;  %v3061_v24 = vld [vmem:[%s3923_s3 + $0xa8] ss:$16 sps:$4 sm:$0xff]   ;;  %vm3244_vm1 = vmmov 0  }
   0xe   : > { %v3062_v25 = vld [vmem:[%s3923_s3 + $0xc4] ss:$16 sps:$4 sm:$0xff]   ;;  %v3064_v26 = vld [vmem:[%s3923_s3 + $0xcc] ss:$16 sps:$4 sm:$0xff]   ;;  %s3420_s20 = sshll.u32 %s3937_s19, 4  ;;  %vm1783_vm2 = vcmask 261120  }
   0xf   : > { %v3066_v27 = vld [vmem:[%s3923_s3 + $0xc0] ss:$16 sps:$4 sm:$0xff]   ;;  %v3067_v28 = vld [vmem:[%s3923_s3 + $0xc8] ss:$16 sps:$4 sm:$0xff]   ;;  %v3068_v29 = vld [vmem:[%s3923_s3 + $0xe4] ss:$16 sps:$4 sm:$0xff]   ;;  %s509_s30 = scalar_lea.vmem %s3921_s1, %s3420_s20  ;;  %s504_s28 = scalar_lea.vmem %s3920_s0, %s3420_s20 }
  0x10   : > { %751 = vmatpush1.bf16.msra.mxu0 %v3042_v11  ;;  %794 = vmatpush1.bf16.msra.mxu1 %v3043_v12  ;;  %v3070_v30 = vld [vmem:[%s3923_s3 + $0xec] ss:$16 sps:$4 sm:$0xff]   ;;  %v3072_v31 = vld [vmem:[%s3923_s3 + $0xe0] ss:$16 sps:$4 sm:$0xff]   ;;  %v3073_v32 = vld [vmem:[%s3923_s3 + $0xe8] ss:$16 sps:$4 sm:$0xff]  }
  0x11   : > { %752 = vmatprep.subr.bf16.mxu0 %v3044_v13  ;;  %795 = vmatprep.subr.bf16.mxu1 %v3046_v14  ;;  %v519_v33 = vld [vmem:[%s509_s30] sm:$0xff]  ;;  %v520_v34 = vld [vmem:[%s509_s30 + $0x8] sm:$0x3f]  ;;  %vm1861_vm3 = vcmask 1046528   ;;  %vm1833_vm4 = vcmask 113664   ;;  %vm1837_vm5 = vcmask 111616  }
  0x12   : > { %v3076_v35 = vld [vmem:[%s3922_s2 + $0x4] ss:$16 sps:$4 sm:$0xff]   ;;  %v3079_v36 = vld [vmem:[%s3922_s2 + $0xc] ss:$16 sps:$4 sm:$0xff]   ;;  %v521_v37 = vpack.c.bf16 %v520_v34, %v519_v33  ;;  %v3074_v38 = vld [vmem:[%s3922_s2] ss:$16 sps:$4 sm:$0xff]  }
  0x13   : > { %v3077_v39 = vld [vmem:[%s3922_s2 + $0x8] ss:$16 sps:$4 sm:$0xff]   ;;  %v3082_v40 = vld [vmem:[%s3922_s2 + $0x24] ss:$16 sps:$4 sm:$0xff]   ;;  %v3085_v41 = vld [vmem:[%s3922_s2 + $0x2c] ss:$16 sps:$4 sm:$0xff]  }
  0x14   : > { %753 = vmatpush1.bf16.msra.mxu0 %v3048_v15  ;;  %796 = vmatpush1.bf16.msra.mxu1 %v3049_v16  ;;  %v3080_v42 = vld [vmem:[%s3922_s2 + $0x20] ss:$16 sps:$4 sm:$0xff]   ;;  %v3083_v43 = vld [vmem:[%s3922_s2 + $0x28] ss:$16 sps:$4 sm:$0xff]   ;;  %v3088_v44 = vld [vmem:[%s3922_s2 + $0x44] ss:$16 sps:$4 sm:$0xff]  }
  0x15   : > { %754 = vmatprep.subr.bf16.mxu0 %v3050_v17  ;;  %797 = vmatprep.subr.bf16.mxu1 %v3052_v18  ;;  %v3091_v45 = vld [vmem:[%s3922_s2 + $0x4c] ss:$16 sps:$4 sm:$0xff]   ;;  %v3086_v46 = vld [vmem:[%s3922_s2 + $0x40] ss:$16 sps:$4 sm:$0xff]   ;;  %v3089_v47 = vld [vmem:[%s3922_s2 + $0x48] ss:$16 sps:$4 sm:$0xff]  }
  0x16   : > { %v3094_v48 = vld [vmem:[%s3922_s2 + $0x64] ss:$16 sps:$4 sm:$0xff]   ;;  %v3097_v49 = vld [vmem:[%s3922_s2 + $0x6c] ss:$16 sps:$4 sm:$0xff]   ;;  %v3092_v50 = vld [vmem:[%s3922_s2 + $0x60] ss:$16 sps:$4 sm:$0xff]  }
  0x17   : > { %v3095_v51 = vld [vmem:[%s3922_s2 + $0x68] ss:$16 sps:$4 sm:$0xff]   ;;  %v3100_v52 = vld [vmem:[%s3922_s2 + $0x84] ss:$16 sps:$4 sm:$0xff]   ;;  %v3103_v53 = vld [vmem:[%s3922_s2 + $0x8c] ss:$16 sps:$4 sm:$0xff]  }
  0x18   : > { %755 = vmatpush1.bf16.msra.mxu0 %v3054_v19  ;;  %798 = vmatpush1.bf16.msra.mxu1 %v3055_v20  ;;  %v3098_v54 = vld [vmem:[%s3922_s2 + $0x80] ss:$16 sps:$4 sm:$0xff]   ;;  %v3101_v55 = vld [vmem:[%s3922_s2 + $0x88] ss:$16 sps:$4 sm:$0xff]   ;;  %v3106_v56 = vld [vmem:[%s3922_s2 + $0xa4] ss:$16 sps:$4 sm:$0xff]  }
  0x19   : > { %756 = vmatprep.subr.bf16.mxu0 %v3056_v21  ;;  %799 = vmatprep.subr.bf16.mxu1 %v3058_v22  ;;  %v3109_v57 = vld [vmem:[%s3922_s2 + $0xac] ss:$16 sps:$4 sm:$0xff]   ;;  %v3104_v58 = vld [vmem:[%s3922_s2 + $0xa0] ss:$16 sps:$4 sm:$0xff]   ;;  %v3107_v59 = vld [vmem:[%s3922_s2 + $0xa8] ss:$16 sps:$4 sm:$0xff]  }
  0x1a   : > { %v3112_v60 = vld [vmem:[%s3922_s2 + $0xc4] ss:$16 sps:$4 sm:$0xff]   ;;  %v3115_v61 = vld [vmem:[%s3922_s2 + $0xcc] ss:$16 sps:$4 sm:$0xff]   ;;  %v3110_v62 = vld [vmem:[%s3922_s2 + $0xc0] ss:$16 sps:$4 sm:$0xff]  }
  0x1b   : > { %v3113_v63 = vld [vmem:[%s3922_s2 + $0xc8] ss:$16 sps:$4 sm:$0xff]   ;;  %v3118_v0 = vld [vmem:[%s3922_s2 + $0xe4] ss:$16 sps:$4 sm:$0xff]   ;;  %v3121_v1 = vld [vmem:[%s3922_s2 + $0xec] ss:$16 sps:$4 sm:$0xff]  }
  0x1c   : > { %757 = vmatpush1.bf16.msra.mxu0 %v3060_v23  ;;  %800 = vmatpush1.bf16.msra.mxu1 %v3061_v24  ;;  %v3116_v3 = vld [vmem:[%s3922_s2 + $0xe0] ss:$16 sps:$4 sm:$0xff]   ;;  %v3119_v4 = vld [vmem:[%s3922_s2 + $0xe8] ss:$16 sps:$4 sm:$0xff]   ;;  %s3245_s30 = smov 96   ;;  %s3246_s16 = smov 64  }
  0x1d   : > { %758 = vmatprep.subr.bf16.mxu0 %v3062_v25  ;;  %801 = vmatprep.subr.bf16.mxu1 %v3064_v26  ;;  %v516_v5 = vld [vmem:[%s504_s28] sm:$0xff]  ;;  %v517_v6 = vld [vmem:[%s504_s28 + $0x8] sm:$0x3f]  ;;  %v3130_v16 = vld [vmem:[%s3925_s5 + $0x50] sm:$0xff]   ;;  %s3247_s23 = smov 32  }
  0x1e   : > { %v3122_v7 = vld [vmem:[%s3925_s5 + $0x40] sm:$0xff]   ;;  %v518_v10 = vpack.c.bf16 %v517_v6, %v516_v5  ;;  %v3126_v12 = vld [vmem:[%s3925_s5 + $0x48] sm:$0xff]   ;;  %v3131_v17 = vld [vmem:[%s3925_s5 + $0xd0] sm:$0xff]  }
  0x1f   : > { %v3123_v8 = vld [vmem:[%s3925_s5 + $0xc0] sm:$0xff]   ;;  %v3127_v13 = vld [vmem:[%s3925_s5 + $0xc8] sm:$0xff]   ;;  %v3132_v18 = vld [vmem:[%s3925_s5 + $0x10] sm:$0xff]  }
  0x20   : > { %759 = vmatpush1.bf16.msra.mxu0 %v3066_v27  ;;  %802 = vmatpush1.bf16.msra.mxu1 %v3067_v28  ;;  %v3124_v9 = vld [vmem:[%s3925_s5] sm:$0xff]   ;;  %v3128_v14 = vld [vmem:[%s3925_s5 + $0x8] sm:$0xff]   ;;  %v3133_v19 = vld [vmem:[%s3925_s5 + $0x90] sm:$0xff]  }
  0x21   : > { %760 = vmatprep.subr.bf16.mxu0 %v3068_v29  ;;  %803 = vmatprep.subr.bf16.mxu1 %v3070_v30  ;;  %v3125_v11 = vld [vmem:[%s3925_s5 + $0x80] sm:$0xff]   ;;  %v3129_v15 = vld [vmem:[%s3925_s5 + $0x88] sm:$0xff]   ;;  %v3134_v20 = vld [vmem:[%s3925_s5 + $0x58] sm:$0xff]  }
  0x22   : > { %v3135_v21 = vld [vmem:[%s3925_s5 + $0xd8] sm:$0xff]   ;;  %v3138_v24 = vld [vmem:[%s3925_s5 + $0x60] sm:$0xff]   ;;  %v3142_v28 = vld [vmem:[%s3925_s5 + $0x68] sm:$0xff]  }
  0x23   : > { %v3136_v22 = vld [vmem:[%s3925_s5 + $0x18] sm:$0xff]   ;;  %v3139_v25 = vld [vmem:[%s3925_s5 + $0xe0] sm:$0xff]   ;;  %v3143_v29 = vld [vmem:[%s3925_s5 + $0xe8] sm:$0xff]  }
  0x24   : > { %761 = vmatpush1.bf16.msra.mxu0 %v3072_v31  ;;  %804 = vmatpush1.bf16.msra.mxu1 %v3073_v32  ;;  %v3137_v23 = vld [vmem:[%s3925_s5 + $0x98] sm:$0xff]   ;;  %v3140_v26 = vld [vmem:[%s3925_s5 + $0x20] sm:$0xff]   ;;  %v3144_v30 = vld [vmem:[%s3925_s5 + $0x28] sm:$0xff]  }
  0x25   : > { %992 = vmatprep.subr.bf16.mxu0 %v3076_v35  ;;  %1035 = vmatprep.subr.bf16.mxu1 %v3079_v36  ;;  %v3141_v27 = vld [vmem:[%s3925_s5 + $0xa0] sm:$0xff]   ;;  %v3145_v31 = vld [vmem:[%s3925_s5 + $0xa8] sm:$0xff]   ;;  %v3146_v32 = vld [vmem:[%s3925_s5 + $0x70] sm:$0xff]  }
  0x26   : > { %v3147_v33 = vld [vmem:[%s3925_s5 + $0xf0] sm:$0xff]   ;;  %v3150_v36 = vld [vmem:[%s3925_s5 + $0x78] sm:$0xff]  }
  0x27   : > { %779 = vmatmul.mubr.bf16.vlgmr.msra.gmra.mrb[0].mxu0 %v521_v37  ;;  %822 = vmatmul.mubr.bf16.vlgmr.msra.gmra.mrb[0].mxu1 %v521_v37  ;;  %v3148_v34 = vld [vmem:[%s3925_s5 + $0x30] sm:$0xff]   ;;  %v3151_v37 = vld [vmem:[%s3925_s5 + $0xf8] sm:$0xff]  }
  0x28   : > { %993 = vmatpush1.bf16.msra.mxu0 %v3074_v38  ;;  %1036 = vmatpush1.bf16.msra.mxu1 %v3077_v39  ;;  %v3149_v35 = vld [vmem:[%s3925_s5 + $0xb0] sm:$0xff]   ;;  %v3152_v38 = vld [vmem:[%s3925_s5 + $0x38] sm:$0xff]  }
  0x29   : > { %994 = vmatprep.subr.bf16.mxu0 %v3082_v40  ;;  %1037 = vmatprep.subr.bf16.mxu1 %v3085_v41  ;;  %v3153_v39 = vld [vmem:[%s3925_s5 + $0xb8] sm:$0xff]   ;;  %v1080_v40 = vlaneseq }
  0x2a   : > { %1024 = vmatprep.mubr.bf16.mxu0 %v3242_v2  ;;  %1067 = vmatprep.mubr.bf16.mxu1 %v3242_v2 }
  0x2b   : > { %v3642_v41 = vshrl.u32 %v1080_v40, 7 }
  0x2c   : > { %995 = vmatpush1.bf16.msra.mxu0 %v3080_v42  ;;  %1038 = vmatpush1.bf16.msra.mxu1 %v3083_v43 }
  0x2d   : > { %996 = vmatprep.subr.bf16.mxu0 %v3088_v44  ;;  %1039 = vmatprep.subr.bf16.mxu1 %v3091_v45  ;;  %v1082_v42 = vsub.s32 0, %v3642_v41  ;;  %v1090_v43 = vsub.s32 2, %v3642_v41  ;;  %v1078_v44 = vld [vmem:[%s3924_s4] sm:$0xf]  ;;  %v1086_v45 = vsub.s32 1, %v3642_v41 }
  0x30   : > { %997 = vmatpush1.bf16.msra.mxu0 %v3086_v46  ;;  %1040 = vmatpush1.bf16.msra.mxu1 %v3089_v47  ;;  %v1094_v46 = vsub.s32 3, %v3642_v41  ;;  %v1083_v47 = vrot.slane %v1078_v44, %v1082_v42 }
  0x31   : > { %998 = vmatprep.subr.bf16.mxu0 %v3094_v48  ;;  %1041 = vmatprep.subr.bf16.mxu1 %v3097_v49  ;;  %v1091_v48 = vrot.slane %v1078_v44, %v1090_v43  ;;  %v1087_v49 = vrot.slane %v1078_v44, %v1086_v45 }
  0x34   : > { %999 = vmatpush1.bf16.msra.mxu0 %v3092_v50  ;;  %1042 = vmatpush1.bf16.msra.mxu1 %v3095_v51  ;;  %v1095_v50 = vrot.slane %v1078_v44, %v1094_v46 }
  0x35   : > { %1000 = vmatprep.subr.bf16.mxu0 %v3100_v52  ;;  %1043 = vmatprep.subr.bf16.mxu1 %v3103_v53 }
  0x38   : > { %1001 = vmatpush1.bf16.msra.mxu0 %v3098_v54  ;;  %1044 = vmatpush1.bf16.msra.mxu1 %v3101_v55 }
  0x39   : > { %1002 = vmatprep.subr.bf16.mxu0 %v3106_v56  ;;  %1045 = vmatprep.subr.bf16.mxu1 %v3109_v57 }
  0x3c   : > { %1003 = vmatpush1.bf16.msra.mxu0 %v3104_v58  ;;  %1046 = vmatpush1.bf16.msra.mxu1 %v3107_v59 }
  0x3d   : > { %1004 = vmatprep.subr.bf16.mxu0 %v3112_v60  ;;  %1047 = vmatprep.subr.bf16.mxu1 %v3115_v61 }
  0x40   : > { %1005 = vmatpush1.bf16.msra.mxu0 %v3110_v62  ;;  %1048 = vmatpush1.bf16.msra.mxu1 %v3113_v63 }
  0x41   : > { %1006 = vmatprep.subr.bf16.mxu0 %v3118_v0  ;;  %1049 = vmatprep.subr.bf16.mxu1 %v3121_v1 }
  0x44   : > { %1007 = vmatpush1.bf16.msra.mxu0 %v3116_v3  ;;  %1050 = vmatpush1.bf16.msra.mxu1 %v3119_v4 }
  0x45   : > { %2809 = vmatprep.subr.bf16.mxu0 %v3122_v7  ;;  %2831 = vmatprep.subr.bf16.mxu1 %v3123_v8 }
  0x47   : > { %1025 = vmatmul.mubr.bf16.vlgmr.msra.gmra.mrb[0].mxu0 %v518_v10  ;;  %1068 = vmatmul.mubr.bf16.vlgmr.msra.gmra.mrb[0].mxu1 %v518_v10 }
  0x48   : > { %2810 = vmatpush3.bf16.msra.mxu0 %v3124_v9  ;;  %2832 = vmatpush3.bf16.msra.mxu1 %v3125_v11 }
  0x49   : > { %2811 = vmatprep.subr.bf16.mxu0 %v3126_v12  ;;  %2833 = vmatprep.subr.bf16.mxu1 %v3127_v13 }
  0x4c   : > { %2812 = vmatpush3.bf16.msra.mxu0 %v3128_v14  ;;  %2834 = vmatpush3.bf16.msra.mxu1 %v3129_v15 }
  0x4d   : > { %2813 = vmatprep.subr.bf16.mxu0 %v3130_v16  ;;  %2835 = vmatprep.subr.bf16.mxu1 %v3131_v17 }
  0x50   : > { %2814 = vmatpush3.bf16.msra.mxu0 %v3132_v18  ;;  %2836 = vmatpush3.bf16.msra.mxu1 %v3133_v19  ;;  %v2722_v18 = vld [vmem:[%s3926_s6] ss:$0 sm:$0xff] }
  0x51   : > { %2815 = vmatprep.subr.bf16.mxu0 %v3134_v20  ;;  %2837 = vmatprep.subr.bf16.mxu1 %v3135_v21 }
  0x54   : > { %2816 = vmatpush3.bf16.msra.mxu0 %v3136_v22  ;;  %2838 = vmatpush3.bf16.msra.mxu1 %v3137_v23 }
  0x55   : > { %2817 = vmatprep.subr.bf16.mxu0 %v3138_v24  ;;  %2839 = vmatprep.subr.bf16.mxu1 %v3139_v25 }
  0x58   : > { %2818 = vmatpush3.bf16.msra.mxu0 %v3140_v26  ;;  %2840 = vmatpush3.bf16.msra.mxu1 %v3141_v27 }
  0x59   : > { %2819 = vmatprep.subr.bf16.mxu0 %v3142_v28  ;;  %2841 = vmatprep.subr.bf16.mxu1 %v3143_v29 }
  0x5c   : > { %2820 = vmatpush3.bf16.msra.mxu0 %v3144_v30  ;;  %2842 = vmatpush3.bf16.msra.mxu1 %v3145_v31 }
  0x5d   : > { %2821 = vmatprep.subr.bf16.mxu0 %v3146_v32  ;;  %2843 = vmatprep.subr.bf16.mxu1 %v3147_v33  ;;  %v3154_v33 = vld [vmem:[%s3929_s9] ss:$12 sps:$4 sm:$0xff]  }
  0x60   : > { %2822 = vmatpush3.bf16.msra.mxu0 %v3148_v34  ;;  %2844 = vmatpush3.bf16.msra.mxu1 %v3149_v35  ;;  %v3156_v34 = vld [vmem:[%s3929_s9 + $0x4] ss:$12 sps:$4 sm:$0xff]   ;;  %v3243_v35 = vmov 0.0  }
  0x61   : > { %2823 = vmatprep.subr.bf16.mxu0 %v3150_v36  ;;  %2845 = vmatprep.subr.bf16.mxu1 %v3151_v37  ;;  %v3157_v36 = vld [vmem:[%s3929_s9 + $0x8] ss:$12 sps:$4 sm:$0xff]  }
  0x62   : > { %v3160_v37 = vld [vmem:[%s3929_s9 + $0x1c] ss:$12 sps:$4 sm:$0xff]  }
  0x64   : > { %2824 = vmatpush3.bf16.msra.mxu0 %v3152_v38  ;;  %2846 = vmatpush3.bf16.msra.mxu1 %v3153_v39  ;;  %v3158_v38 = vld [vmem:[%s3929_s9 + $0x18] ss:$12 sps:$4 sm:$0xff]  }
  0x65   : > { %2890 = vmatprep.subr.bf16.mxu1 %v3243_v35  ;;  %1687 = vmatprep.subr.bf16.mxu0 %v3156_v34 }
 0x11a   : > { %v1026_v51 = vpop.f32.mrb[0].mxu0  ;;  %v1069_v52 = vpop.f32.mrb[0].mxu1 }
 0x11b   : > { %v1100_v53 = vadd.f32 %v1083_v47, %v1026_v51  ;;  %v1102_v54 = vadd.f32 %v1091_v48, %v1069_v52  ;;  %v1028_v55 = vpop.f32.mrb[1].mxu0  ;;  %v1071_v56 = vpop.f32.mrb[1].mxu1  ;;  %v3161_v52 = vld [vmem:[%s3929_s9 + $0x20] ss:$12 sps:$4 sm:$0xff]  }
 0x11c   : > { %v1101_v57 = vadd.f32 %v1087_v49, %v1028_v55  ;;  %v1103_v58 = vadd.f32 %v1095_v50, %v1071_v56  ;;  %v1030_v59 = vpop.f32.mrb[2].mxu0  ;;  %v1073_v60 = vpop.f32.mrb[2].mxu1  ;;  %v3165_v55 = vld [vmem:[%s3929_s9 + $0x38] ss:$12 sps:$4 sm:$0xff]  }
 0x11d   : > { %v1104_v61 = vadd.f32 %v1083_v47, %v1030_v59  ;;  %v1106_v62 = vadd.f32 %v1091_v48, %v1073_v60  ;;  %v1032_v63 = vpop.f32.mrb[3].mxu0  ;;  %v1075_v0 = vpop.f32.mrb[3].mxu1  ;;  %v1108_v4 = vmax.f32 %v1100_v53, 0.0  ;;  %v1110_v5 = vmax.f32 %v1102_v54, 0.0  ;;  %v3164_v53 = vld [vmem:[%s3929_s9 + $0x34] ss:$12 sps:$4 sm:$0xff]  }
 0x11e   : > { %v1105_v1 = vadd.f32 %v1087_v49, %v1032_v63  ;;  %v1107_v3 = vadd.f32 %v1095_v50, %v1075_v0  ;;  %v1109_v8 = vmax.f32 %v1101_v57, 0.0  ;;  %v1111_v9 = vmax.f32 %v1103_v58, 0.0  ;;  %v3162_v54 = vld [vmem:[%s3929_s9 + $0x30] ss:$12 sps:$4 sm:$0xff]   ;;  %v3168_v56 = vld [vmem:[%s3929_s9 + $0x4c] ss:$12 sps:$4 sm:$0xff]  }
 0x11f   : > { %v1112_v6 = vmax.f32 %v1104_v61, 0.0  ;;  %v1114_v7 = vmax.f32 %v1106_v62, 0.0  ;;  %v3166_v57 = vld [vmem:[%s3929_s9 + $0x48] ss:$12 sps:$4 sm:$0xff]   ;;  %v3169_v58 = vld [vmem:[%s3929_s9 + $0x50] ss:$12 sps:$4 sm:$0xff]  }
 0x120   : > { %v1113_v10 = vmax.f32 %v1105_v1, 0.0  ;;  %v1115_v11 = vmax.f32 %v1107_v3, 0.0  ;;  %v3172_v59 = vld [vmem:[%s3929_s9 + $0x64] ss:$12 sps:$4 sm:$0xff]   ;;  %v3170_v60 = vld [vmem:[%s3929_s9 + $0x60] ss:$12 sps:$4 sm:$0xff]  }
 0x121   : > { %v1116_v12 = vpack.c.bf16 %v1112_v6, %v1108_v4  ;;  %v1118_v13 = vpack.c.bf16 %v1114_v7, %v1110_v5  ;;  %v3173_v61 = vld [vmem:[%s3929_s9 + $0x68] ss:$12 sps:$4 sm:$0xff]   ;;  %v3174_v63 = vld [vmem:[%s3929_s9 + $0x78] ss:$12 sps:$4 sm:$0xff]   ;;  %v3177_v0 = vld [vmem:[%s3929_s9 + $0x80] ss:$12 sps:$4 sm:$0xff]  }
 0x122   : > { %v1117_v14 = vpack.c.bf16 %v1113_v10, %v1109_v8  ;;  %v1119_v15 = vpack.c.bf16 %v1115_v11, %v1111_v9  ;;  %v3176_v62 = vld [vmem:[%s3929_s9 + $0x7c] ss:$12 sps:$4 sm:$0xff]   ;;  %v3180_v1 = vld [vmem:[%s3929_s9 + $0x94] ss:$12 sps:$4 sm:$0xff]   ;;  %v3181_v4 = vld [vmem:[%s3929_s9 + $0x98] ss:$12 sps:$4 sm:$0xff]  }
 0x123   : > { %v3178_v3 = vld [vmem:[%s3929_s9 + $0x90] ss:$12 sps:$4 sm:$0xff]   ;;  %v3184_v5 = vld [vmem:[%s3929_s9 + $0xac] ss:$12 sps:$4 sm:$0xff]   ;;  %v3182_v6 = vld [vmem:[%s3929_s9 + $0xa8] ss:$12 sps:$4 sm:$0xff]  }
 0x124   : > { %1415 = vmatprep.mubr.bf16.mxu0 %v1117_v14  ;;  %1456 = vmatprep.mubr.bf16.mxu1 %v1119_v15  ;;  %v3185_v7 = vld [vmem:[%s3929_s9 + $0xb0] ss:$12 sps:$4 sm:$0xff]  }
 0x125   : > { %1416 = vmatmul.mubr.bf16.vlgmr.msra.gmra.mrb[4].mxu0 %v1116_v12  ;;  %1457 = vmatmul.mubr.bf16.vlgmr.msra.gmra.mrb[4].mxu1 %v1118_v13 }
 0x126   : > { %1719 = vmatprep.mubr.bf16.mxu0 %v3242_v2  ;;  %1688 = vmatpush1.bf16.msra.mxu0 %v3154_v33 }
 0x127   : > { %2891 = vmatpush3.bf16.msra.mxu1 %v3157_v36  ;;  %1689 = vmatprep.subr.bf16.mxu0 %v3160_v37 }
 0x128   : > { %2892 = vmatprep.subr.bf16.mxu1 %v3243_v35  ;;  %2906 = vmatprep.mubr.msk.bf16.mxu1 %vm3244_vm1, %v3243_v35 }
 0x12a   : > { %1690 = vmatpush1.bf16.msra.mxu0 %v3158_v38 }
 0x12b   : > { %2893 = vmatpush3.bf16.msra.mxu1 %v3161_v52  ;;  %1691 = vmatprep.subr.bf16.mxu0 %v3164_v53 }
 0x12c   : > { %2894 = vmatprep.subr.bf16.mxu1 %v3243_v35 }
 0x12e   : > { %1692 = vmatpush1.bf16.msra.mxu0 %v3162_v54 }
 0x12f   : > { %2895 = vmatpush3.bf16.msra.mxu1 %v3165_v55  ;;  %1693 = vmatprep.subr.bf16.mxu0 %v3168_v56 }
 0x130   : > { %2896 = vmatprep.subr.bf16.mxu1 %v3243_v35 }
 0x132   : > { %1694 = vmatpush1.bf16.msra.mxu0 %v3166_v57 }
 0x133   : > { %2897 = vmatpush3.bf16.msra.mxu1 %v3169_v58  ;;  %1695 = vmatprep.subr.bf16.mxu0 %v3172_v59 }
 0x134   : > { %2898 = vmatprep.subr.bf16.mxu1 %v3243_v35 }
 0x136   : > { %1696 = vmatpush1.bf16.msra.mxu0 %v3170_v60 }
 0x137   : > { %2899 = vmatpush3.bf16.msra.mxu1 %v3173_v61  ;;  %1697 = vmatprep.subr.bf16.mxu0 %v3176_v62 }
 0x138   : > { %2900 = vmatprep.subr.bf16.mxu1 %v3243_v35 }
 0x13a   : > { %1698 = vmatpush1.bf16.msra.mxu0 %v3174_v63 }
 0x13b   : > { %2901 = vmatpush3.bf16.msra.mxu1 %v3177_v0  ;;  %1699 = vmatprep.subr.bf16.mxu0 %v3180_v1 }
 0x13c   : > { %2902 = vmatprep.subr.bf16.mxu1 %v3243_v35 }
 0x13e   : > { %1700 = vmatpush1.bf16.msra.mxu0 %v3178_v3  ;;  %v3186_v3 = vld [vmem:[%s3931_s11] sm:$0xff]  }
 0x13f   : > { %2903 = vmatpush3.bf16.msra.mxu1 %v3181_v4  ;;  %1701 = vmatprep.subr.bf16.mxu0 %v3184_v5 }
 0x140   : > { %2904 = vmatprep.subr.bf16.mxu1 %v3243_v35 }
 0x142   : > { %1702 = vmatpush1.bf16.msra.mxu0 %v3182_v6 }
 0x143   : > { %2905 = vmatpush3.bf16.msra.mxu1 %v3185_v7  ;;  %2922 = vmatprep.subr.bf16.mxu0 %v3243_v35 }
 0x144   : > { %2910 = vmatprep.subr.bf16.mxu1 %v3243_v35 }
 0x1f8   : > { %v2825_v16 = vpop.f32.mrb[4].mxu0  ;;  %v2847_v17 = vpop.f32.mrb[4].mxu1 }
 0x1f9   : > { %v2826_v19 = vpop.f32.mrb[5].mxu0  ;;  %v2848_v20 = vpop.f32.mrb[5].mxu1 }
 0x1fa   : > { %v2827_v21 = vadd.f32 %v2826_v19, %v2825_v16  ;;  %v2849_v22 = vadd.f32 %v2848_v20, %v2847_v17  ;;  %v2828_v23 = vpop.f32.mrb[6].mxu0  ;;  %v2850_v24 = vpop.f32.mrb[6].mxu1  ;;  %v2755_v16 = vld [vmem:[%s3927_s7] ss:$0 sm:$0xff] }
 0x1fb   : > { %v2829_v25 = vpop.f32.mrb[7].mxu0  ;;  %v2851_v26 = vpop.f32.mrb[7].mxu1  ;;  %v2756_v20 = vld [vmem:[%s3928_s8] ss:$0 sm:$0xff] }
 0x1fc   : > { %v1418_v27 = vadd.f32 %v2827_v21, %v2722_v18  ;;  %v2830_v28 = vadd.f32 %v2829_v25, %v2828_v23  ;;  %v2852_v29 = vadd.f32 %v2851_v26, %v2850_v24  ;;  %v1542_v25 = vld [vmem:[%s3930_s10] sm:$0x7] }
 0x1fd   : > { %v1547_v26 = vrot.slane %v1542_v25, %v1082_v42 }
 0x1fe   : > { %v1421_v30 = vadd.f32 %v2830_v28, %v2722_v18  ;;  %v1459_v31 = vadd.f32 %v2849_v22, %v1418_v27  ;;  %v1555_v27 = vrot.slane %v1542_v25, %v1090_v43 }
 0x200   : > { %v1462_v2 = vadd.f32 %v2852_v29, %v1421_v30  ;;  %v1551_v30 = vrot.slane %v1542_v25, %v1086_v45 }
 0x202   : > { %v1470_v32 = vsel %vm1469_vm0, %v1462_v2, 0.0 }
 0x203   : > { %1471 = vadd.xlane.f32.xlu0 %v1470_v32 }
 0x207   : > { %1467 = vadd.xlane.f32.xlu0 %v1459_v31 }
 0x290   : > { %v1472_v39 = vpop.xlane.xlu0 %1471 }
 0x291   : > { %v1475_v40 = vmul.f32 0.0078125, %v1472_v39 }
 0x293   : > { %v3679_v47 = vsub.f32 %v1462_v2, %v1475_v40 }
 0x294   : > { %v1468_v44 = vpop.xlane.xlu0 %1467 }
 0x295   : > { %v1474_v46 = vmul.f32 0.0078125, %v1468_v44  ;;  %v1479_v50 = vmul.f32 %v3679_v47, %v3679_v47 }
 0x297   : > { %v3681_v48 = vsub.f32 %v1459_v31, %v1474_v46  ;;  %v1482_v51 = vsel %vm1469_vm0, %v1479_v50, 0.0 }
 0x299   : > { %v1478_v49 = vmul.f32 %v3681_v48, %v3681_v48 }
 0x29b   : > { %1480 = vadd.xlane.f32.xlu1 %v1478_v49 }
 0x29f   : > { %1483 = vadd.xlane.f32.xlu1 %v1482_v51 }
 0x328   : > { %v1481_v8 = vpop.xlane.xlu1 %1480 }
 0x329   : > { %v1485_v9 = vmul.f32 0.0078125, %v1481_v8 }
 0x32b   : > { %v1487_v10 = vadd.f32 1e-05, %v1485_v9 }
 0x32c   : > { %v1484_v11 = vpop.xlane.xlu1 %1483 }
 0x32d   : > { %3194 = vrsqrt.f32 %v1487_v10  ;;  %v1486_v12 = vmul.f32 0.0078125, %v1484_v11 }
 0x32f   : > { %v1488_v13 = vadd.f32 1e-05, %v1486_v12 }
 0x331   : > { %3196 = vrsqrt.f32 %v1488_v13 }
 0x337   : > { %v3195_v14 = vpop.eup %3194 }
 0x338   : > { %v1491_v15 = vmul.f32 %v3195_v14, %v3681_v48 }
 0x33a   : > { %v1499_v19 = vmul.f32 %v2755_v16, %v1491_v15 }
 0x33b   : > { %v3197_v17 = vpop.eup %3196 }
 0x33c   : > { %v1492_v18 = vmul.f32 %v3197_v17, %v3679_v47  ;;  %v3763_v22 = vadd.f32 %v2756_v20, %v1499_v19  ;;  %v3187_v17 = vld [vmem:[%s3931_s11 + $0x8] sm:$0xff]  }
 0x33e   : > { %v1500_v21 = vmul.f32 %v2755_v16, %v1492_v18 }
 0x340   : > { %v3765_v23 = vadd.f32 %v2756_v20, %v1500_v21 }
 0x342   : > { %v1509_v24 = vpack.c.bf16 %v3765_v23, %v3763_v22 }
 0x344   : > { %1720 = vmatmul.mubr.bf16.vlgmr.msra.gmra.mrb[8].mxu0 %v1509_v24  ;;  %2907 = vmatmul.mubr.bf16.vlgmr.msra.gmra.mrb[8].mxu1 %v1509_v24 }
 0x345   : > { %2912 = vmatprep.mubr.msk.bf16.mxu1 %vm3244_vm1, %v3243_v35  ;;  %2926 = vmatprep.mubr.msk.bf16.mxu0 %vm3244_vm1, %v3243_v35 }
 0x346   : > { %2923 = vmatpush3.bf16.msra.mxu0 %v3186_v3 }
 0x347   : > { %2924 = vmatprep.subr.bf16.mxu0 %v3243_v35 }
 0x34a   : > { %2925 = vmatpush3.bf16.msra.mxu0 %v3187_v17 }
 0x34b   : > { %2936 = vmatprep.subr.bf16.mxu0 %v3243_v35 }
 0x417   : > { %v1721_v28 = vpop.f32.mrb[8].mxu0  ;;  %v1764_v29 = vpop.f32.mrb[8].mxu1 }
 0x418   : > { %v1723_v31 = vpop.f32.mrb[9].mxu0  ;;  %v2908_v2 = vpop.f32.mrb[9].mxu1  ;;  %v1722_v34 = vadd.f32 %v1721_v28, %v1547_v26  ;;  %v1765_v36 = vadd.f32 %v1764_v29, %v1555_v27 }
 0x419   : > { %v1725_v32 = vpop.f32.mrb[10].mxu0  ;;  %v1767_v33 = vpop.f32.mrb[10].mxu1  ;;  %v1724_v44 = vadd.f32 %v1723_v31, %v1551_v30 }
 0x41a   : > { %v1726_v37 = vadd.f32 %v1725_v32, %v1547_v26  ;;  %v1768_v38 = vadd.f32 %v1767_v33, %v1555_v27  ;;  %v1727_v39 = vpop.f32.mrb[11].mxu0  ;;  %v2909_v40 = vpop.f32.mrb[11].mxu1 }
 0x41b   : > { %v1728_v42 = vadd.f32 %v1727_v39, %v1551_v30 }
 0x41c   : > { %v3782_v46 = vpack.c.bf16 %v1726_v37, %v1722_v34  ;;  %v3784_v43 = vpack.c.bf16 %v1768_v38, %v1765_v36 }
 0x41d   : > { %v3786_v47 = vpack.c.bf16 %v1728_v42, %v1724_v44 }
 0x41e   : > { %v1863_v45 = vsel %vm1861_vm3, %v3784_v43, 0 }
 0x41f   : > { %v1788_v41 = vsel %vm1783_vm2, %v3786_v47, 0 }
 0x420   : > { %2911 = vmatpush3.bf16.xpose.msra.mxu1 %v1788_v41 }
 0x421   : > { %2916 = vmatprep.subr.bf16.mxu1 %v3243_v35 }
 0x427   : > { %2913 = vmatmul.mubr.msk.bf16.vlgmr.msra.gmra.mrb[12].mxu1 %vm1783_vm2, %v3782_v46 }
 0x428   : > { %2917 = vmatpush3.bf16.msra.mxu1 %v1863_v45  ;;  %2918 = vmatprep.mubr.msk.bf16.mxu1 %vm3244_vm1, %v3243_v35 }
 0x429   : > { %2930 = vmatprep.subr.bf16.mxu1 %v3243_v35 }
 0x4fa   : > { %v1824_v48 = vpop.f32.mrb[12].mxu1 }
 0x4fb   : > { %v1831_v49 = vmul.f32 0.17677669, %v1824_v48  ;;  %v2914_v50 = vpop.f32.mrb[13].mxu1 }
 0x4fc   : > { %v1827_v51 = vpop.f32.mrb[14].mxu1 }
 0x4fd   : > { %v1832_v52 = vmul.f32 0.17677669, %v1827_v51  ;;  %v2915_v53 = vpop.f32.mrb[15].mxu1  ;;  %v1834_v54 = vsel %vm1833_vm4, %v1831_v49, -inf }
 0x4fe   : > { %1835 = vmax.xlane.f32.xlu0 %v1834_v54 }
 0x4ff   : > { %v1838_v55 = vsel %vm1837_vm5, %v1832_v52, -inf }
 0x500   : > { %1839 = vmax.xlane.f32.xlu1 %v1838_v55 }
 0x58b   : > { %v1836_v56 = vpop.xlane.xlu0 %1835 }
 0x58c   : > { %v1841_v57 = vsub.f32 %v1831_v49, %v1836_v56 }
 0x58d   : > { %v1840_v58 = vpop.xlane.xlu1 %1839 }
 0x58e   : > { %v1843_v59 = vmul.f32 1.442695, %v1841_v57  ;;  %v1842_v60 = vsub.f32 %v1832_v52, %v1840_v58 }
 0x590   : > { %3198 = vpow2.f32 %v1843_v59  ;;  %v1845_v61 = vmul.f32 1.442695, %v1842_v60 }
 0x592   : > { %3200 = vpow2.f32 %v1845_v61 }
 0x59a   : > { %v3199_v62 = vpop.eup %3198 }
 0x59b   : > { %v1847_v63 = vsel %vm1833_vm4, %v3199_v62, 0.0 }
 0x59c   : > { %v3201_v0 = vpop.eup %3200  ;;  %1848 = vadd.xlane.f32.xlu0 %v1847_v63 }
 0x59d   : > { %v1850_v1 = vsel %vm1837_vm5, %v3201_v0, 0.0 }
 0x59e   : > { %1851 = vadd.xlane.f32.xlu1 %v1850_v1 }
 0x5af   : > { %1970 = vrot.lane.b32.xlu1 %v3782_v46, %s3245_s30 }
 0x5b2   : > { %1973 = vrot.lane.b32.xlu0 %v3786_v47, %s3245_s30 }
 0x5b3   : > { %2162 = vrot.lane.b32.xlu1 %v3786_v47, %s3246_s16 }
 0x5b7   : > { %2160 = vrot.lane.b32.xlu1 %v3782_v46, %s3246_s16 }
 0x629   : > { %v1849_v4 = vpop.xlane.xlu0 %1848 }
 0x62a   : > { %3202 = vrcp.f32 %v1849_v4 }
 0x62b   : > { %v1852_v5 = vpop.xlane.xlu1 %1851 }
 0x62c   : > { %3204 = vrcp.f32 %v1852_v5 }
 0x62d   : > { %v1974_v10 = vpop.permute.xlu0 %1973 }
 0x62e   : > { %v1979_v13 = vsel %vm1783_vm2, %v1974_v10, 0 }
 0x62f   : > { %v1971_v12 = vpop.permute.xlu1 %1970 }
 0x633   : > { %v2163_v14 = vpop.permute.xlu1 %2162 }
 0x634   : > { %v3203_v6 = vpop.eup %3202  ;;  %v2168_v15 = vsel %vm1783_vm2, %v2163_v14, 0 }
 0x635   : > { %v1855_v8 = vmul.f32 %v3203_v6, %v3199_v62 }
 0x636   : > { %v3205_v7 = vpop.eup %3204 }
 0x637   : > { %v1856_v9 = vmul.f32 %v3205_v7, %v3201_v0  ;;  %v2161_v16 = vpop.permute.xlu1 %2160 }
 0x639   : > { %v1857_v11 = vpack.c.bf16 %v1856_v9, %v1855_v8 }
 0x63b   : > { %2919 = vmatmul.mubr.msk.bf16.vlgmr.msra.gmra.mrb[16].mxu1 %vm1833_vm4, %v1857_v11 }
 0x63c   : > { %2931 = vmatpush3.bf16.xpose.msra.mxu1 %v1979_v13  ;;  %2932 = vmatprep.mubr.msk.bf16.mxu1 %vm3244_vm1, %v3243_v35 }
 0x63d   : > { %2950 = vmatprep.subr.bf16.mxu1 %v3243_v35 }
 0x643   : > { %2933 = vmatmul.mubr.msk.bf16.vlgmr.msra.gmra.mrb[20].mxu1 %vm1783_vm2, %v1971_v12 }
 0x644   : > { %2951 = vmatpush3.bf16.xpose.msra.mxu1 %v2168_v15  ;;  %2952 = vmatprep.mubr.msk.bf16.mxu1 %vm3244_vm1, %v3243_v35 }
 0x645   : > { %2956 = vmatprep.subr.bf16.mxu1 %v3243_v35 }
 0x64b   : > { %2953 = vmatmul.mubr.msk.bf16.vlgmr.msra.gmra.mrb[24].mxu1 %vm1783_vm2, %v2161_v16 }
 0x64c   : > { %2958 = vmatprep.mubr.msk.bf16.mxu1 %vm3244_vm1, %v3243_v35 }
 0x70e   : > { %v1899_v18 = vpop.f32.mrb[16].mxu1 }
 0x70f   : > { %v2920_v19 = vpop.f32.mrb[17].mxu1 }
 0x710   : > { %v1902_v20 = vpop.f32.mrb[18].mxu1 }
 0x711   : > { %v1906_v21 = vpack.c.bf16 %v1902_v20, %v1899_v18  ;;  %v2921_v24 = vpop.f32.mrb[19].mxu1 }
 0x713   : > { %2927 = vmatmul.mubr.msk.bf16.vlgmr.msra.gmra.mrb[12].mxu0 %vm1783_vm2, %v1906_v21 }
 0x714   : > { %2938 = vmatprep.mubr.msk.bf16.mxu0 %vm3244_vm1, %v3243_v35 }
 0x716   : > { %v2015_v25 = vpop.f32.mrb[20].mxu1 }
 0x717   : > { %v2934_v26 = vpop.f32.mrb[21].mxu1  ;;  %v2022_v37 = vmul.f32 0.17677669, %v2015_v25 }
 0x718   : > { %v2018_v27 = vpop.f32.mrb[22].mxu1 }
 0x719   : > { %v2935_v28 = vpop.f32.mrb[23].mxu1  ;;  %v2024_v38 = vsel %vm1833_vm4, %v2022_v37, -inf  ;;  %v2023_v57 = vmul.f32 0.17677669, %v2018_v27 }
 0x71b   : > { %v2027_v58 = vsel %vm1837_vm5, %v2023_v57, -inf }
 0x71e   : > { %v2204_v29 = vpop.f32.mrb[24].mxu1 }
 0x71f   : > { %v2211_v30 = vmul.f32 0.17677669, %v2204_v29  ;;  %v2954_v31 = vpop.f32.mrb[25].mxu1 }
 0x720   : > { %v2207_v2 = vpop.f32.mrb[26].mxu1 }
 0x721   : > { %v2212_v32 = vmul.f32 0.17677669, %v2207_v2  ;;  %v2955_v33 = vpop.f32.mrb[27].mxu1  ;;  %v2213_v34 = vsel %vm1833_vm4, %v2211_v30, -inf }
 0x722   : > { %2214 = vmax.xlane.f32.xlu0 %v2213_v34  ;;  %v3188_v33 = vld [vmem:[%s3931_s11 + $0x10] sm:$0xff]   ;;  %v3189_v34 = vld [vmem:[%s3931_s11 + $0x18] sm:$0xff]  }
 0x723   : > { %v2216_v36 = vsel %vm1837_vm5, %v2212_v32, -inf }
 0x724   : > { %2217 = vmax.xlane.f32.xlu1 %v2216_v36 }
 0x735   : > { %2350 = vrot.lane.b32.xlu1 %v3786_v47, %s3247_s23 }
 0x739   : > { %2348 = vrot.lane.b32.xlu1 %v3782_v46, %s3247_s23 }
 0x75d   : > { %2025 = vmax.xlane.f32.xlu1 %v2024_v38 }
 0x76e   : > { %2048 = vrot.lane.b32.xlu1 %v3784_v43, %s3245_s30 }
 0x772   : > { %2424 = vrot.lane.b32.xlu1 %v3784_v43, %s3247_s23 }
 0x7af   : > { %v2215_v39 = vpop.xlane.xlu0 %2214 }
 0x7b0   : > { %v2219_v40 = vsub.f32 %v2211_v30, %v2215_v39 }
 0x7b1   : > { %v2218_v44 = vpop.xlane.xlu1 %2217 }
 0x7b2   : > { %v2221_v42 = vmul.f32 1.442695, %v2219_v40  ;;  %v2220_v41 = vsub.f32 %v2212_v32, %v2218_v44 }
 0x7b4   : > { %3206 = vpow2.f32 %v2221_v42  ;;  %v2223_v45 = vmul.f32 1.442695, %v2220_v41 }
 0x7b5   : > { %v2351_v50 = vpop.permute.xlu1 %2350 }
 0x7b6   : > { %3208 = vpow2.f32 %v2223_v45  ;;  %v2356_v6 = vsel %vm1783_vm2, %v2351_v50, 0  ;;  %v3190_v50 = vld [vmem:[%s3931_s11 + $0x20] sm:$0xff]  }
 0x7b9   : > { %v2349_v51 = vpop.permute.xlu1 %2348 }
 0x7be   : > { %v3207_v47 = vpop.eup %3206 }
 0x7bf   : > { %v2225_v46 = vsel %vm1833_vm4, %v3207_v47, 0.0 }
 0x7c0   : > { %v3209_v48 = vpop.eup %3208  ;;  %2226 = vadd.xlane.f32.xlu0 %v2225_v46 }
 0x7c1   : > { %v2228_v49 = vsel %vm1837_vm5, %v3209_v48, 0.0 }
 0x7c4   : > { %2229 = vadd.xlane.f32.xlu0 %v2228_v49 }
 0x7da   : > { %2236 = vrot.lane.b32.xlu0 %v3784_v43, %s3246_s16  ;;  %s514_s16 = scalar_lea.vmem %s3935_s15, %s3420_s20 }
 0x7ea   : > { %v2026_v52 = vpop.xlane.xlu1 %2025 }
 0x7eb   : > { %v2030_v53 = vsub.f32 %v2022_v37, %v2026_v52 }
 0x7ed   : > { %v2032_v54 = vmul.f32 1.442695, %v2030_v53  ;;  %v3191_v53 = vld [vmem:[%s3931_s11 + $0x28] sm:$0xff]  }
 0x7ee   : > { %v2049_v55 = vpop.permute.xlu1 %2048 }
 0x7ef   : > { %3210 = vpow2.f32 %v2032_v54  ;;  %v2054_v56 = vsel %vm1861_vm3, %v2049_v55, 0 }
 0x7f0   : > { %2937 = vmatpush3.bf16.msra.mxu0 %v2054_v56 }
 0x7f1   : > { %2942 = vmatprep.subr.bf16.mxu0 %v3243_v35 }
 0x7f2   : > { %v2425_v54 = vpop.permute.xlu1 %2424 }
 0x7f3   : > { %v2430_v55 = vsel %vm1861_vm3, %v2425_v54, 0 }
 0x7f9   : > { %v3211_v59 = vpop.eup %3210  ;;  %2028 = vmax.xlane.f32.xlu0 %v2027_v58 }
 0x7fa   : > { %v2036_v60 = vsel %vm1833_vm4, %v3211_v59, 0.0 }
 0x7fd   : > { %2037 = vadd.xlane.f32.xlu0 %v2036_v60 }
 0x84d   : > { %v2227_v43 = vpop.xlane.xlu0 %2226 }
 0x84e   : > { %3212 = vrcp.f32 %v2227_v43 }
 0x851   : > { %v2230_v61 = vpop.xlane.xlu0 %2229 }
 0x852   : > { %3214 = vrcp.f32 %v2230_v61  ;;  %v3192_v61 = vld [vmem:[%s3931_s11 + $0x30] sm:$0xff]  }
 0x855   : > { %v2237_v62 = vpop.permute.xlu0 %2236 }
 0x856   : > { %v2242_v63 = vsel %vm1861_vm3, %v2237_v62, 0 }
 0x857   : > { %2957 = vmatpush3.bf16.msra.mxu1 %v2242_v63  ;;  %v3193_v63 = vld [vmem:[%s3931_s11 + $0x38] sm:$0xff]  }
 0x858   : > { %2970 = vmatprep.subr.bf16.mxu1 %v3243_v35  ;;  %v3213_v0 = vpop.eup %3212 }
 0x859   : > { %v2233_v3 = vmul.f32 %v3213_v0, %v3207_v47 }
 0x85c   : > { %v3215_v1 = vpop.eup %3214 }
 0x85d   : > { %v2234_v4 = vmul.f32 %v3215_v1, %v3209_v48 }
 0x85f   : > { %v2235_v5 = vpack.c.bf16 %v2234_v4, %v2233_v3 }
 0x861   : > { %2959 = vmatmul.mubr.msk.bf16.vlgmr.msra.gmra.mrb[28].mxu1 %vm1833_vm4, %v2235_v5 }
 0x862   : > { %2971 = vmatpush3.bf16.xpose.msra.mxu1 %v2356_v6  ;;  %2972 = vmatprep.mubr.msk.bf16.mxu1 %vm3244_vm1, %v3243_v35  ;;  %v2781_v6 = vld [vmem:[%s3932_s12] ss:$0 sm:$0xff] }
 0x869   : > { %2973 = vmatmul.mubr.msk.bf16.vlgmr.msra.gmra.mrb[32].mxu1 %vm1783_vm2, %v2349_v51 }
 0x886   : > { %v2029_v7 = vpop.xlane.xlu0 %2028 }
 0x887   : > { %v2031_v8 = vsub.f32 %v2023_v57, %v2029_v7  ;;  %v1778_v7 = vadd.f32 %v2781_v6, %v3763_v22 }
 0x889   : > { %v2034_v9 = vmul.f32 1.442695, %v2031_v8 }
 0x88a   : > { %v2038_v12 = vpop.xlane.xlu0 %2037 }
 0x88b   : > { %3216 = vpow2.f32 %v2034_v9 }
 0x88c   : > { %3218 = vrcp.f32 %v2038_v12 }
 0x895   : > { %v3217_v10 = vpop.eup %3216 }
 0x896   : > { %v2039_v11 = vsel %vm1837_vm5, %v3217_v10, 0.0  ;;  %v3219_v14 = vpop.eup %3218 }
 0x897   : > { %2040 = vadd.xlane.f32.xlu0 %v2039_v11  ;;  %v2044_v16 = vmul.f32 %v3219_v14, %v3211_v59 }
 0x924   : > { %v2041_v13 = vpop.xlane.xlu0 %2040 }
 0x925   : > { %3220 = vrcp.f32 %v2041_v13 }
 0x92f   : > { %v3221_v15 = vpop.eup %3220 }
 0x930   : > { %v2045_v17 = vmul.f32 %v3221_v15, %v3217_v10  ;;  %v1779_v10 = vadd.f32 %v2781_v6, %v3765_v23 }
 0x932   : > { %v2046_v18 = vpack.c.bf16 %v2045_v17, %v2044_v16 }
 0x934   : > { %2939 = vmatmul.mubr.msk.bf16.vlgmr.msra.gmra.mrb[16].mxu0 %vm1833_vm4, %v2046_v18  ;;  %v2278_v19 = vpop.f32.mrb[28].mxu1 }
 0x935   : > { %v2960_v20 = vpop.f32.mrb[29].mxu1  ;;  %2946 = vmatprep.mubr.msk.bf16.mxu0 %vm3244_vm1, %v3243_v35  ;;  %2943 = vmatpush3.bf16.msra.mxu0 %v3188_v33 }
 0x936   : > { %v2281_v21 = vpop.f32.mrb[30].mxu1  ;;  %2944 = vmatprep.subr.bf16.mxu0 %v3243_v35 }
 0x937   : > { %v2285_v24 = vpack.c.bf16 %v2281_v21, %v2278_v19  ;;  %v2961_v25 = vpop.f32.mrb[31].mxu1 }
 0x939   : > { %2945 = vmatpush3.bf16.msra.mxu0 %v3189_v34 }
 0x93a   : > { %2962 = vmatprep.subr.bf16.mxu0 %v3243_v35 }
 0x93c   : > { %v2392_v26 = vpop.f32.mrb[32].mxu1 }
 0x93d   : > { %v2399_v27 = vmul.f32 0.17677669, %v2392_v26  ;;  %v2974_v28 = vpop.f32.mrb[33].mxu1 }
 0x93e   : > { %v2395_v29 = vpop.f32.mrb[34].mxu1 }
 0x93f   : > { %v2400_v30 = vmul.f32 0.17677669, %v2395_v29  ;;  %v2975_v31 = vpop.f32.mrb[35].mxu1  ;;  %v2401_v2 = vsel %vm1833_vm4, %v2399_v27, -inf }
 0x940   : > { %2402 = vmax.xlane.f32.xlu0 %v2401_v2  ;;  %v2802_v31 = vld [vmem:[%s3933_s13] ss:$0 sm:$0xff] }
 0x941   : > { %v2404_v32 = vsel %vm1837_vm5, %v2400_v30, -inf }
 0x944   : > { %2405 = vmax.xlane.f32.xlu0 %v2404_v32  ;;  %v2803_v32 = vld [vmem:[%s3934_s14] ss:$0 sm:$0xff] }
 0x9cd   : > { %v2403_v36 = vpop.xlane.xlu0 %2402 }
 0x9ce   : > { %v2407_v37 = vsub.f32 %v2399_v27, %v2403_v36 }
 0x9d0   : > { %v2409_v38 = vmul.f32 1.442695, %v2407_v37 }
 0x9d1   : > { %v2406_v39 = vpop.xlane.xlu0 %2405 }
 0x9d2   : > { %3222 = vpow2.f32 %v2409_v38  ;;  %v2408_v40 = vsub.f32 %v2400_v30, %v2406_v39 }
 0x9d4   : > { %v2411_v44 = vmul.f32 1.442695, %v2408_v40 }
 0x9d6   : > { %3224 = vpow2.f32 %v2411_v44 }
 0x9dc   : > { %v3223_v42 = vpop.eup %3222 }
 0x9dd   : > { %v2413_v41 = vsel %vm1833_vm4, %v3223_v42, 0.0 }
 0x9de   : > { %2414 = vadd.xlane.f32.xlu0 %v2413_v41 }
 0x9e0   : > { %v3225_v45 = vpop.eup %3224 }
 0x9e1   : > { %v2416_v47 = vsel %vm1837_vm5, %v3225_v45, 0.0 }
 0x9e2   : > { %2417 = vadd.xlane.f32.xlu0 %v2416_v47 }
 0xa07   : > { %v2090_v46 = vpop.f32.mrb[16].mxu0 }
 0xa08   : > { %v2940_v48 = vpop.f32.mrb[17].mxu0 }
 0xa09   : > { %v2093_v49 = vpop.f32.mrb[18].mxu0 }
 0xa0a   : > { %v2097_v51 = vpack.c.bf16 %v2093_v49, %v2090_v46  ;;  %v2941_v52 = vpop.f32.mrb[19].mxu0 }
 0xa0c   : > { %2947 = vmatmul.mubr.msk.bf16.vlgmr.msra.gmra.mrb[12].mxu0 %vm1783_vm2, %v2097_v51 }
 0xa0d   : > { %2963 = vmatpush3.bf16.msra.mxu0 %v3190_v50  ;;  %2966 = vmatprep.mubr.msk.bf16.mxu0 %vm3244_vm1, %v3243_v35 }
 0xa0e   : > { %2964 = vmatprep.subr.bf16.mxu0 %v3243_v35 }
 0xa11   : > { %2965 = vmatpush3.bf16.msra.mxu0 %v3191_v53 }
 0xa12   : > { %2976 = vmatprep.subr.bf16.mxu0 %v3243_v35 }
 0xa18   : > { %2967 = vmatmul.mubr.msk.bf16.vlgmr.msra.gmra.mrb[12].mxu0 %vm1783_vm2, %v2285_v24 }
 0xa19   : > { %2977 = vmatpush3.bf16.msra.mxu0 %v2430_v55  ;;  %2978 = vmatprep.mubr.msk.bf16.mxu0 %vm3244_vm1, %v3243_v35 }
 0xa1a   : > { %2982 = vmatprep.subr.bf16.mxu0 %v3243_v35 }
 0xa6b   : > { %v2415_v56 = vpop.xlane.xlu0 %2414 }
 0xa6c   : > { %3226 = vrcp.f32 %v2415_v56 }
 0xa6f   : > { %v2418_v57 = vpop.xlane.xlu0 %2417 }
 0xa70   : > { %3228 = vrcp.f32 %v2418_v57 }
 0xa76   : > { %v3227_v58 = vpop.eup %3226 }
 0xa77   : > { %v2421_v60 = vmul.f32 %v3227_v58, %v3223_v42 }
 0xa7a   : > { %v3229_v59 = vpop.eup %3228 }
 0xa7b   : > { %v2422_v43 = vmul.f32 %v3229_v59, %v3225_v45 }
 0xa7d   : > { %v2423_v62 = vpack.c.bf16 %v2422_v43, %v2421_v60 }
 0xa7f   : > { %2979 = vmatmul.mubr.msk.bf16.vlgmr.msra.gmra.mrb[20].mxu0 %vm1833_vm4, %v2423_v62 }
 0xa80   : > { %2983 = vmatpush3.bf16.msra.mxu0 %v3192_v61  ;;  %2986 = vmatprep.mubr.msk.bf16.mxu0 %vm3244_vm1, %v3243_v35 }
 0xa81   : > { %2984 = vmatprep.subr.bf16.mxu0 %v3243_v35 }
 0xa84   : > { %2985 = vmatpush3.bf16.msra.mxu0 %v3193_v63 }
 0xb52   : > { %v2466_v0 = vpop.f32.mrb[20].mxu0 }
 0xb53   : > { %v2980_v1 = vpop.f32.mrb[21].mxu0 }
 0xb54   : > { %v2469_v3 = vpop.f32.mrb[22].mxu0 }
 0xb55   : > { %v2473_v4 = vpack.c.bf16 %v2469_v3, %v2466_v0  ;;  %v2981_v5 = vpop.f32.mrb[23].mxu0 }
 0xb57   : > { %2987 = vmatmul.mubr.msk.bf16.vlgmr.msra.gmra.mrb[12].mxu0 %vm1783_vm2, %v2473_v4 }
 0xc2a   : > { %v2527_v8 = vpop.f32.mrb[12].mxu0 }
 0xc2b   : > { %v2990_v35 = vadd.f32 %v2527_v8, %v1778_v7  ;;  %v2988_v9 = vpop.f32.mrb[13].mxu0 }
 0xc2c   : > { %v2530_v11 = vpop.f32.mrb[14].mxu0 }
 0xc2d   : > { %v2991_v12 = vadd.f32 %v2530_v11, %v1779_v10  ;;  %2538 = vadd.xlane.f32.xlu1 %v2990_v35  ;;  %v2989_v13 = vpop.f32.mrb[15].mxu0 }
 0xc2f   : > { %v2540_v14 = vsel %vm1469_vm0, %v2991_v12, 0.0 }
 0xc30   : > { %2541 = vadd.xlane.f32.xlu0 %v2540_v14 }
 0xcba   : > { %v2539_v15 = vpop.xlane.xlu1 %2538 }
 0xcbb   : > { %v2543_v16 = vmul.f32 0.0078125, %v2539_v15 }
 0xcbd   : > { %v2545_v17 = vsub.f32 %v2990_v35, %v2543_v16  ;;  %v2542_v18 = vpop.xlane.xlu0 %2541 }
 0xcbe   : > { %v2544_v19 = vmul.f32 0.0078125, %v2542_v18 }
 0xcbf   : > { %v2547_v20 = vmul.f32 %v2545_v17, %v2545_v17 }
 0xcc0   : > { %v2546_v21 = vsub.f32 %v2991_v12, %v2544_v19 }
 0xcc1   : > { %2549 = vadd.xlane.f32.xlu0 %v2547_v20 }
 0xcc2   : > { %v2548_v22 = vmul.f32 %v2546_v21, %v2546_v21 }
 0xcc4   : > { %v2551_v24 = vsel %vm1469_vm0, %v2548_v22, 0.0 }
 0xcc5   : > { %2552 = vadd.xlane.f32.xlu0 %v2551_v24 }
 0xd4e   : > { %v2550_v23 = vpop.xlane.xlu0 %2549 }
 0xd4f   : > { %v2554_v25 = vmul.f32 0.0078125, %v2550_v23 }
 0xd51   : > { %v2556_v26 = vadd.f32 1e-05, %v2554_v25 }
 0xd52   : > { %v2553_v27 = vpop.xlane.xlu0 %2552 }
 0xd53   : > { %3230 = vrsqrt.f32 %v2556_v26  ;;  %v2555_v28 = vmul.f32 0.0078125, %v2553_v27 }
 0xd55   : > { %v2557_v29 = vadd.f32 1e-05, %v2555_v28 }
 0xd57   : > { %3232 = vrsqrt.f32 %v2557_v29 }
 0xd5d   : > { %v3231_v30 = vpop.eup %3230 }
 0xd5e   : > { %v2560_v2 = vmul.f32 %v3231_v30, %v2545_v17 }
 0xd60   : > { %v2568_v33 = vmul.f32 %v2802_v31, %v2560_v2 }
 0xd61   : > { %v3233_v34 = vpop.eup %3232 }
 0xd62   : > { %v2576_v36 = vadd.f32 %v2803_v32, %v2568_v33  ;;  %v2561_v37 = vmul.f32 %v3233_v34, %v2546_v21 }
 0xd64   : > { %2578 = vst [vmem:[%s514_s16] sm:$0xff] %v2576_v36  ;;  %v2569_v38 = vmul.f32 %v2802_v31, %v2561_v37 }
 0xd66   : > { %v2577_v39 = vadd.f32 %v2803_v32, %v2569_v38 }
 0xd68   : > { %2579 = vst [vmem:[%s514_s16 + $0x8] sm:$0x3f] %v2577_v39 }
 0xd69 PF: > { %s25_s18 = sadd.s32 1, %s3240_s18  }
 0xd6a   : > { %p22_p4 = scmp.ge.s32.totalorder %s25_s18, 4  }
 0xd6c   :  { %24 = sbr.rel (!%p22_p4) target bundleno = 1 (0x1), region = 113 }

</bundles_post_ra>
